<compile_context>
chip_gen: v7x
topology: tpu7x:2x2x1
jax: 0.10.0
libtpu: 0.0.40
codegen_flags: <defaults>
</compile_context>

<pallas_src>
import functools
import math

import jax
import jax.numpy as jnp
from jax import lax
from jax.experimental import pallas as pl
from jax.experimental.pallas import tpu as pltpu


_INT32_MAX = 0x7FFFFFFF     # sentinel key: diagonal / already-picked columns
_LANE = 128                 # lane width for the lane-dense output slab


# ============================================================================
# Fused kernel: Linear -> EdgeConv (kNN graph built in-kernel) -> Linear
# One grid step == one graph; everything stays VMEM-resident.
# ============================================================================
def _fused_lin_ec_lin_kernel(K, SHIFT, x_ref, w1_ref, b1_ref, wa_ref, wb_ref,
                             b2_ref, w3_ref, b3_ref, o_ref):
    N = x_ref.shape[0]
    D1 = w1_ref.shape[1]

    # ---- Layer 1: Linear ---------------------------------------------------
    x1 = (jnp.dot(x_ref[...], w1_ref[...], preferred_element_type=jnp.float32)
          + b1_ref[...])                                          # [N, D1]

    # ---- kNN distances (Gram-matrix form, MXU) -------------------------------
    # d_eff[i, j] = ||x_j||^2 - 2 x_i . x_j   (per-row constant ||x_i||^2
    # does not change the per-row ranking, so it is dropped).
    gram = lax.dot_general(x1, x1, (((1,), (1,)), ((), ())),
                           preferred_element_type=jnp.float32)     # [N, N]
    sq_row = lax.dot_general(jnp.ones((1, D1), jnp.float32), x1 * x1,
                             (((1,), (1,)), ((), ())),
                             preferred_element_type=jnp.float32)   # [1, N]
    d = sq_row - 2.0 * gram                                        # [N, N]

    row_ids = lax.broadcasted_iota(jnp.int32, (N, N), 0)
    col_ids = lax.broadcasted_iota(jnp.int32, (N, N), 1)

    # Sort-monotone packed int32 key: distance bits (sign-fixed so ordering is
    # preserved for negative values, low SHIFT mantissa bits truncated) in the
    # high bits, column index in the low bits -> one integer min per K step
    # does argmin + lowest-index tie-break at once.
    bits = pltpu.bitcast(d, jnp.int32)
    mono = jnp.where(bits >= 0, bits, bits ^ _INT32_MAX)
    key0 = ((mono >> SHIFT) << SHIFT) | col_ids
    key0 = jnp.where(row_ids == col_ids, _INT32_MAX, key0)         # no self loops

    # ---- EdgeConv (distributive rewrite) -------------------------------------
    center = jnp.dot(x1, wa_ref[...], preferred_element_type=jnp.float32)
    y = jnp.dot(x1, wb_ref[...], preferred_element_type=jnp.float32)  # [N, D2]

    def select_one_neighbor(_, carry):
        key_cur, agg = carry
        kmin = jnp.min(key_cur, axis=1, keepdims=True)              # [N, 1]
        picked = key_cur == kmin                                    # unique/row
        onehot = picked.astype(jnp.float32)
        gathered = jnp.dot(onehot, y, preferred_element_type=jnp.float32)
        agg = jnp.maximum(agg, gathered)
        key_cur = jnp.where(picked, _INT32_MAX, key_cur)            # remove picked
        return key_cur, agg

    neg = jnp.full_like(y, -jnp.inf)
    _, agg = lax.fori_loop(0, K, select_one_neighbor, (key0, neg), unroll=True)
    x2 = center + (agg - y) + b2_ref[...]                           # [N, D2]

    # ---- Layer 3: Linear, lane-dense (padded) store --------------------------
    o_ref[...] = (jnp.dot(x2, w3_ref[...], preferred_element_type=jnp.float32)
                  + b3_ref[...]).astype(o_ref.dtype)


def fused_lin_edgeconv_lin(x, w1, b1, wa, wb, b2, w3, b3, *, k):
    assert k >= 1, "EdgeConv needs at least one neighbor (K >= 1)"
    B, N, Din = x.shape
    D1 = w1.shape[1]      # EdgeConv input dim
    D2 = wa.shape[1]      # EdgeConv output dim
    D3 = w3.shape[1]      # final output dim
    Dpad = max(_LANE, ((D3 + _LANE - 1) // _LANE) * _LANE)

    # Zero-pad final weight/bias so the output store is lane-dense (128-wide).
    w3p = jnp.zeros((D2, Dpad), w3.dtype).at[:, :D3].set(w3)
    b3p = jnp.zeros((1, Dpad), b3.dtype).at[0, :D3].set(b3)

    shift = max(1, int(math.ceil(math.log2(N))))
    kernel = functools.partial(_fused_lin_ec_lin_kernel, k, shift)

    def wspec(shape):
        return pl.BlockSpec(shape, lambda b, _s=shape: (0,) * len(_s))

    out = pl.pallas_call(
        kernel,
        out_shape=jax.ShapeDtypeStruct((B, N, Dpad), x.dtype),
        grid_spec=pltpu.PrefetchScalarGridSpec(
            num_scalar_prefetch=0,
            grid=(B,),                        # one graph per grid step
            in_specs=[
                pl.BlockSpec((None, N, Din), lambda b: (b, 0, 0)),
                wspec((Din, D1)), wspec((1, D1)),
                wspec((D1, D2)), wspec((D1, D2)), wspec((1, D2)),
                wspec((D2, Dpad)), wspec((1, Dpad)),
            ],
            out_specs=pl.BlockSpec((None, N, Dpad), lambda b: (b, 0, 0)),
        ),
        compiler_params=pltpu.CompilerParams(
            dimension_semantics=("parallel",)),   # v7x: shard batch over 2 TCs
    )(x, w1, b1.reshape(1, D1), wa, wb, b2.reshape(1, D2), w3p, b3p)
    return out[:, :, :D3]


# ============================================================================
# Generic per-layer fallback kernels (arbitrary configs from the JSON),
# batched over a leading graph axis.
# TODO(synk): fuse consecutive Linear+EdgeConv pairs in this path as well.
# ============================================================================
def _linear_kernel(x_ref, w_ref, b_ref, o_ref):
    o_ref[...] = (jnp.dot(x_ref[...], w_ref[...],
                          preferred_element_type=jnp.float32)
                  + b_ref[...]).astype(o_ref.dtype)


def linear_pallas(x, w, b):
    B, N, Din = x.shape
    Dout = w.shape[1]
    return pl.pallas_call(
        _linear_kernel,
        out_shape=jax.ShapeDtypeStruct((B, N, Dout), x.dtype),
        grid_spec=pltpu.PrefetchScalarGridSpec(
            num_scalar_prefetch=0,
            grid=(B,),
            in_specs=[
                pl.BlockSpec((None, N, Din), lambda i: (i, 0, 0)),
                pl.BlockSpec((Din, Dout), lambda i: (0, 0)),
                pl.BlockSpec((1, Dout), lambda i: (0, 0)),
            ],
            out_specs=pl.BlockSpec((None, N, Dout), lambda i: (i, 0, 0)),
        ),
        compiler_params=pltpu.CompilerParams(
            dimension_semantics=("parallel",)),
    )(x, w, b.reshape(1, Dout))


def _edgeconv_kernel(K, x_ref, idx_ref, wa_ref, wb_ref, b_ref, o_ref):
    # Distributive rewrite + in-kernel one-hot gather (no [N,K,D] HBM tensor).
    # TODO(synk): for large N use scalar-prefetched indices + DMA row-gather
    # instead of the O(N^2) one-hot matmuls.
    N = x_ref.shape[0]
    x = x_ref[...]
    idx = idx_ref[...]                                            # [N, K] int32
    center = jnp.dot(x, wa_ref[...], preferred_element_type=jnp.float32)
    y = jnp.dot(x, wb_ref[...], preferred_element_type=jnp.float32)
    col_ids = lax.broadcasted_iota(jnp.int32, (N, N), 1)
    agg = jnp.full_like(y, -jnp.inf)
    for kk in range(K):                                           # K static & tiny
        onehot = (col_ids == idx[:, kk:kk + 1]).astype(jnp.float32)
        agg = jnp.maximum(
            agg, jnp.dot(onehot, y, preferred_element_type=jnp.float32))
    o_ref[...] = (center + (agg - y) + b_ref[...]).astype(o_ref.dtype)


def edgeconv_pallas(x, edge_index, wa, wb, b):
    B, N, D = x.shape
    K = edge_index.shape[-1]
    Dout = wa.shape[1]
    kernel = functools.partial(_edgeconv_kernel, K)
    return pl.pallas_call(
        kernel,
        out_shape=jax.ShapeDtypeStruct((B, N, Dout), x.dtype),
        grid_spec=pltpu.PrefetchScalarGridSpec(
            num_scalar_prefetch=0,
            grid=(B,),
            in_specs=[
                pl.BlockSpec((None, N, D), lambda i: (i, 0, 0)),
                pl.BlockSpec((None, N, K), lambda i: (i, 0, 0)),
                pl.BlockSpec((D, Dout), lambda i: (0, 0)),
                pl.BlockSpec((D, Dout), lambda i: (0, 0)),
                pl.BlockSpec((1, Dout), lambda i: (0, 0)),
            ],
            out_specs=pl.BlockSpec((None, N, Dout), lambda i: (i, 0, 0)),
        ),
        compiler_params=pltpu.CompilerParams(
            dimension_semantics=("parallel",)),
    )(x, edge_index.astype(jnp.int32), wa, wb, b.reshape(1, Dout))


# ----------------------------------------------------------------------------
# Graph construction (arm.construct_graph equivalent) — JAX glue, used by the
# generic fallback path and the pure-JAX reference (single graph [N, D]).
# ----------------------------------------------------------------------------
def construct_graph(x, k):
    gram = jnp.dot(x, x.T, precision=lax.Precision.HIGHEST)
    sq = jnp.sum(x * x, axis=-1)
    d = sq[None, :] - 2.0 * gram            # row-constant ||x_i||^2 dropped
    d = jnp.where(jnp.eye(x.shape[0], dtype=bool), jnp.inf, d)
    _, idx = lax.top_k(-d, k)
    return idx.astype(jnp.int32)


# ----------------------------------------------------------------------------
# Model forward (mirrors Model.forward layer dispatch); x is [B, N, D]
# (a batch of B independent graphs, kNN graph built per graph).
# ----------------------------------------------------------------------------
def model_forward(x, layers, k_neighbors=8, edge_index=None, use_fused=True):
    kinds = [kind for kind, _ in layers]
    # Fast path: the exact stack [Linear, EdgeConv, Linear] with the graph
    # built from the first Linear's output -> one fused, batched pallas_call.
    if (use_fused and edge_index is None
            and kinds == ["Linear", "EdgeConv", "Linear"]):
        w1, b1 = layers[0][1]
        wa, wb, b2 = layers[1][1]
        w3, b3 = layers[2][1]
        return fused_lin_edgeconv_lin(x, w1, b1, wa, wb, b2, w3, b3,
                                      k=k_neighbors)
    # Generic per-layer path for arbitrary configs.
    out = x
    for kind, params in layers:
        if kind == "Linear":
            w, b = params
            out = linear_pallas(out, w, b)
        elif kind == "EdgeConv":
            wa, wb, b = params
            if edge_index is None:
                edge_index = jax.vmap(
                    lambda g: construct_graph(g, k_neighbors))(out)
            out = edgeconv_pallas(out, edge_index, wa, wb, b)
        else:
            raise Exception("Unrecognizable layer type")
    return out


# ----------------------------------------------------------------------------
# Pure-JAX reference (per-neighbor diff form, no distributive rewrite)
# ----------------------------------------------------------------------------
def model_forward_ref(x, layers, k_neighbors=8):
    hp = lax.Precision.HIGHEST

    def single(xg):
        xx = xg
        edge_index = None
        for kind, params in layers:
            if kind == "Linear":
                w, b = params
                xx = jnp.dot(xx, w, precision=hp) + b
            else:
                wa, wb, b = params
                if edge_index is None:
                    edge_index = construct_graph(xx, k_neighbors)
                nbr = jnp.take(xx, edge_index, axis=0)        # [N, K, D]
                diff = nbr - xx[:, None, :]
                e = jnp.einsum("nkd,do->nko", diff, wb, precision=hp)
                xx = jnp.dot(xx, wa, precision=hp) + jnp.max(e, axis=1) + b
        return xx

    return jax.vmap(single)(x)


if __name__ == "__main__":
    key = jax.random.PRNGKey(0)
    B, N, D_IN, D_HID, D_OUT, K = 4, 64, 32, 32, 16, 8

    ks = jax.random.split(key, 8)
    x = jax.random.normal(ks[0], (B, N, D_IN), dtype=jnp.float32)

    # Deterministic synthetic parameters (config: Linear, EdgeConv, Linear).
    w1 = jax.random.normal(ks[1], (D_IN, D_HID), jnp.float32) * 0.1
    b1 = jax.random.normal(ks[2], (D_HID,), jnp.float32) * 0.1
    wa = jax.random.normal(ks[3], (D_HID, D_HID), jnp.float32) * 0.1   # on x_i
    wb = jax.random.normal(ks[4], (D_HID, D_HID), jnp.float32) * 0.1   # on x_j - x_i
    b2 = jax.random.normal(ks[5], (D_HID,), jnp.float32) * 0.1
    w3 = jax.random.normal(ks[6], (D_HID, D_OUT), jnp.float32) * 0.1
    b3 = jax.random.normal(ks[7], (D_OUT,), jnp.float32) * 0.1

    layers = [
        ("Linear", (w1, b1)),
        ("EdgeConv", (wa, wb, b2)),
        ("Linear", (w3, b3)),
    ]

    # Fused single-kernel path (main) and generic per-layer fallback path.
    out_fused = jax.block_until_ready(model_forward(x, layers, k_neighbors=K))
    out_layered = jax.block_until_ready(
        model_forward(x, layers, k_neighbors=K, use_fused=False))

    ref = model_forward_ref(x, layers, k_neighbors=K)

    assert out_fused.shape == (B, N, D_OUT)
    assert jnp.allclose(out_layered, ref, atol=1e-3, rtol=1e-3)
    assert jnp.allclose(out_fused, ref, atol=1e-3, rtol=1e-3)

    print("KERNEL_OK")
</pallas_src>

<mosaic_0001>
module attributes {stable_mosaic.version = 11 : i64} {
  func.func @_fused_lin_ec_lin_kernel(%arg0: i32, %arg1: memref<1x64x32xf32, #tpu.memory_space<vmem>>, %arg2: memref<32x32xf32, #tpu.memory_space<vmem>>, %arg3: memref<1x32xf32, #tpu.memory_space<vmem>>, %arg4: memref<32x32xf32, #tpu.memory_space<vmem>>, %arg5: memref<32x32xf32, #tpu.memory_space<vmem>>, %arg6: memref<1x32xf32, #tpu.memory_space<vmem>>, %arg7: memref<32x128xf32, #tpu.memory_space<vmem>>, %arg8: memref<1x128xf32, #tpu.memory_space<vmem>>, %arg9: memref<1x64x128xf32, #tpu.memory_space<vmem>>) attributes {dimension_semantics = [#tpu.dimension_semantics<parallel>], iteration_bounds = array<i64: 4>, scalar_prefetch = 0 : i64, scratch_operands = 0 : i64, tpu.core_type = #tpu.core_type<tc>, window_params = [{transform_indices = @transform_0, window_bounds = array<i64: 1, 64, 32>}, {pipeline_mode = #tpu.pipeline_mode<synchronous>, transform_indices = @transform_1, window_bounds = array<i64: 32, 32>}, {pipeline_mode = #tpu.pipeline_mode<synchronous>, transform_indices = @transform_2, window_bounds = array<i64: 1, 32>}, {pipeline_mode = #tpu.pipeline_mode<synchronous>, transform_indices = @transform_3, window_bounds = array<i64: 32, 32>}, {pipeline_mode = #tpu.pipeline_mode<synchronous>, transform_indices = @transform_4, window_bounds = array<i64: 32, 32>}, {pipeline_mode = #tpu.pipeline_mode<synchronous>, transform_indices = @transform_5, window_bounds = array<i64: 1, 32>}, {pipeline_mode = #tpu.pipeline_mode<synchronous>, transform_indices = @transform_6, window_bounds = array<i64: 32, 128>}, {pipeline_mode = #tpu.pipeline_mode<synchronous>, transform_indices = @transform_7, window_bounds = array<i64: 1, 128>}, {transform_indices = @transform_8, window_bounds = array<i64: 1, 64, 128>}]} {
    %c0 = arith.constant 0 : index
    %c0_0 = arith.constant 0 : index
    %c0_1 = arith.constant 0 : index
    %0 = vector.load %arg1[%c0, %c0_0, %c0_1] : memref<1x64x32xf32, #tpu.memory_space<vmem>>, vector<1x64x32xf32>
    %1 = vector.shape_cast %0 : vector<1x64x32xf32> to vector<64x32xf32>
    %c0_2 = arith.constant 0 : index
    %c0_3 = arith.constant 0 : index
    %2 = vector.load %arg2[%c0_2, %c0_3] : memref<32x32xf32, #tpu.memory_space<vmem>>, vector<32x32xf32>
    %cst = arith.constant dense<0.000000e+00> : vector<64x32xf32>
    %3 = tpu.matmul %1, %2, %cst {dimension_numbers = #tpu.dot_dimension_numbers<[1], [0], [0], [1], [0, 0, 1, 1], [], []>} : vector<64x32xf32>, vector<32x32xf32>, vector<64x32xf32> -> vector<64x32xf32>
    %c0_4 = arith.constant 0 : index
    %c0_5 = arith.constant 0 : index
    %4 = vector.load %arg3[%c0_4, %c0_5] : memref<1x32xf32, #tpu.memory_space<vmem>>, vector<1x32xf32>
    %5 = vector.broadcast %4 : vector<1x32xf32> to vector<64x32xf32>
    %6 = arith.addf %3, %5 : vector<64x32xf32>
    %cst_6 = arith.constant dense<0.000000e+00> : vector<64x64xf32>
    %7 = tpu.matmul %6, %6, %cst_6 {dimension_numbers = #tpu.dot_dimension_numbers<[1], [1], [0], [0], [0, 0, 1, 0], [], []>} : vector<64x32xf32>, vector<64x32xf32>, vector<64x64xf32> -> vector<64x64xf32>
    %cst_7 = arith.constant 1.000000e+00 : f32
    %8 = vector.broadcast %cst_7 : f32 to vector<1x32xf32>
    %9 = arith.mulf %6, %6 : vector<64x32xf32>
    %cst_8 = arith.constant dense<0.000000e+00> : vector<1x64xf32>
    %10 = tpu.matmul %8, %9, %cst_8 {dimension_numbers = #tpu.dot_dimension_numbers<[1], [1], [0], [0], [0, 0, 1, 0], [], []>} : vector<1x32xf32>, vector<64x32xf32>, vector<1x64xf32> -> vector<1x64xf32>
    %cst_9 = arith.constant 2.000000e+00 : f32
    %11 = vector.broadcast %cst_9 : f32 to vector<64x64xf32>
    %12 = arith.mulf %11, %7 : vector<64x64xf32>
    %13 = vector.broadcast %10 : vector<1x64xf32> to vector<64x64xf32>
    %14 = arith.subf %13, %12 : vector<64x64xf32>
    %15 = tpu.iota {dimensions = array<i32: 0>} : vector<64x64xi32>
    %16 = tpu.iota {dimensions = array<i32: 1>} : vector<64x64xi32>
    %17 = tpu.bitcast %14 : vector<64x64xf32> -> vector<64x64xi32>
    %c0_i32 = arith.constant 0 : i32
    %18 = vector.broadcast %c0_i32 : i32 to vector<64x64xi32>
    %19 = arith.cmpi sge, %17, %18 : vector<64x64xi32>
    %c2147483647_i32 = arith.constant 2147483647 : i32
    %20 = vector.broadcast %c2147483647_i32 : i32 to vector<64x64xi32>
    %21 = arith.xori %17, %20 : vector<64x64xi32>
    %22 = arith.select %19, %17, %21 : vector<64x64xi1>, vector<64x64xi32>
    %c6_i32 = arith.constant 6 : i32
    %23 = vector.broadcast %c6_i32 : i32 to vector<64x64xi32>
    %24 = arith.shrsi %22, %23 : vector<64x64xi32>
    %c6_i32_10 = arith.constant 6 : i32
    %25 = vector.broadcast %c6_i32_10 : i32 to vector<64x64xi32>
    %26 = arith.shli %24, %25 : vector<64x64xi32>
    %27 = arith.ori %26, %16 : vector<64x64xi32>
    %28 = arith.cmpi eq, %15, %16 : vector<64x64xi32>
    %c2147483647_i32_11 = arith.constant 2147483647 : i32
    %29 = vector.broadcast %c2147483647_i32_11 : i32 to vector<64x64xi32>
    %30 = arith.select %28, %29, %27 : vector<64x64xi1>, vector<64x64xi32>
    %c0_12 = arith.constant 0 : index
    %c0_13 = arith.constant 0 : index
    %31 = vector.load %arg4[%c0_12, %c0_13] : memref<32x32xf32, #tpu.memory_space<vmem>>, vector<32x32xf32>
    %cst_14 = arith.constant dense<0.000000e+00> : vector<64x32xf32>
    %32 = tpu.matmul %6, %31, %cst_14 {dimension_numbers = #tpu.dot_dimension_numbers<[1], [0], [0], [1], [0, 0, 1, 1], [], []>} : vector<64x32xf32>, vector<32x32xf32>, vector<64x32xf32> -> vector<64x32xf32>
    %c0_15 = arith.constant 0 : index
    %c0_16 = arith.constant 0 : index
    %33 = vector.load %arg5[%c0_15, %c0_16] : memref<32x32xf32, #tpu.memory_space<vmem>>, vector<32x32xf32>
    %cst_17 = arith.constant dense<0.000000e+00> : vector<64x32xf32>
    %34 = tpu.matmul %6, %33, %cst_17 {dimension_numbers = #tpu.dot_dimension_numbers<[1], [0], [0], [1], [0, 0, 1, 1], [], []>} : vector<64x32xf32>, vector<32x32xf32>, vector<64x32xf32> -> vector<64x32xf32>
    %cst_18 = arith.constant 0xFF800000 : f32
    %35 = vector.broadcast %cst_18 : f32 to vector<64x32xf32>
    %c0_i32_19 = arith.constant 0 : i32
    %cst_20 = arith.constant dense<2147483647> : vector<64xi32>
    %36 = vector.multi_reduction <minsi>, %30, %cst_20 [1] : vector<64x64xi32> to vector<64xi32>
    %37 = vector.shape_cast %36 : vector<64xi32> to vector<64x1xi32>
    %38 = vector.broadcast %37 : vector<64x1xi32> to vector<64x64xi32>
    %39 = arith.cmpi eq, %30, %38 : vector<64x64xi32>
    %40 = arith.extui %39 : vector<64x64xi1> to vector<64x64xi32>
    %41 = arith.sitofp %40 : vector<64x64xi32> to vector<64x64xf32>
    %cst_21 = arith.constant dense<0.000000e+00> : vector<64x32xf32>
    %42 = tpu.matmul %41, %34, %cst_21 {dimension_numbers = #tpu.dot_dimension_numbers<[1], [0], [0], [1], [0, 0, 1, 1], [], []>} : vector<64x64xf32>, vector<64x32xf32>, vector<64x32xf32> -> vector<64x32xf32>
    %43 = arith.maximumf %35, %42 : vector<64x32xf32>
    %c2147483647_i32_22 = arith.constant 2147483647 : i32
    %44 = vector.broadcast %c2147483647_i32_22 : i32 to vector<64x64xi32>
    %45 = arith.select %39, %44, %30 : vector<64x64xi1>, vector<64x64xi32>
    %c1_i32 = arith.constant 1 : i32
    %cst_23 = arith.constant dense<2147483647> : vector<64xi32>
    %46 = vector.multi_reduction <minsi>, %45, %cst_23 [1] : vector<64x64xi32> to vector<64xi32>
    %47 = vector.shape_cast %46 : vector<64xi32> to vector<64x1xi32>
    %48 = vector.broadcast %47 : vector<64x1xi32> to vector<64x64xi32>
    %49 = arith.cmpi eq, %45, %48 : vector<64x64xi32>
    %50 = arith.extui %49 : vector<64x64xi1> to vector<64x64xi32>
    %51 = arith.sitofp %50 : vector<64x64xi32> to vector<64x64xf32>
    %cst_24 = arith.constant dense<0.000000e+00> : vector<64x32xf32>
    %52 = tpu.matmul %51, %34, %cst_24 {dimension_numbers = #tpu.dot_dimension_numbers<[1], [0], [0], [1], [0, 0, 1, 1], [], []>} : vector<64x64xf32>, vector<64x32xf32>, vector<64x32xf32> -> vector<64x32xf32>
    %53 = arith.maximumf %43, %52 : vector<64x32xf32>
    %c2147483647_i32_25 = arith.constant 2147483647 : i32
    %54 = vector.broadcast %c2147483647_i32_25 : i32 to vector<64x64xi32>
    %55 = arith.select %49, %54, %45 : vector<64x64xi1>, vector<64x64xi32>
    %c2_i32 = arith.constant 2 : i32
    %cst_26 = arith.constant dense<2147483647> : vector<64xi32>
    %56 = vector.multi_reduction <minsi>, %55, %cst_26 [1] : vector<64x64xi32> to vector<64xi32>
    %57 = vector.shape_cast %56 : vector<64xi32> to vector<64x1xi32>
    %58 = vector.broadcast %57 : vector<64x1xi32> to vector<64x64xi32>
    %59 = arith.cmpi eq, %55, %58 : vector<64x64xi32>
    %60 = arith.extui %59 : vector<64x64xi1> to vector<64x64xi32>
    %61 = arith.sitofp %60 : vector<64x64xi32> to vector<64x64xf32>
    %cst_27 = arith.constant dense<0.000000e+00> : vector<64x32xf32>
    %62 = tpu.matmul %61, %34, %cst_27 {dimension_numbers = #tpu.dot_dimension_numbers<[1], [0], [0], [1], [0, 0, 1, 1], [], []>} : vector<64x64xf32>, vector<64x32xf32>, vector<64x32xf32> -> vector<64x32xf32>
    %63 = arith.maximumf %53, %62 : vector<64x32xf32>
    %c2147483647_i32_28 = arith.constant 2147483647 : i32
    %64 = vector.broadcast %c2147483647_i32_28 : i32 to vector<64x64xi32>
    %65 = arith.select %59, %64, %55 : vector<64x64xi1>, vector<64x64xi32>
    %c3_i32 = arith.constant 3 : i32
    %cst_29 = arith.constant dense<2147483647> : vector<64xi32>
    %66 = vector.multi_reduction <minsi>, %65, %cst_29 [1] : vector<64x64xi32> to vector<64xi32>
    %67 = vector.shape_cast %66 : vector<64xi32> to vector<64x1xi32>
    %68 = vector.broadcast %67 : vector<64x1xi32> to vector<64x64xi32>
    %69 = arith.cmpi eq, %65, %68 : vector<64x64xi32>
    %70 = arith.extui %69 : vector<64x64xi1> to vector<64x64xi32>
    %71 = arith.sitofp %70 : vector<64x64xi32> to vector<64x64xf32>
    %cst_30 = arith.constant dense<0.000000e+00> : vector<64x32xf32>
    %72 = tpu.matmul %71, %34, %cst_30 {dimension_numbers = #tpu.dot_dimension_numbers<[1], [0], [0], [1], [0, 0, 1, 1], [], []>} : vector<64x64xf32>, vector<64x32xf32>, vector<64x32xf32> -> vector<64x32xf32>
    %73 = arith.maximumf %63, %72 : vector<64x32xf32>
    %c2147483647_i32_31 = arith.constant 2147483647 : i32
    %74 = vector.broadcast %c2147483647_i32_31 : i32 to vector<64x64xi32>
    %75 = arith.select %69, %74, %65 : vector<64x64xi1>, vector<64x64xi32>
    %c4_i32 = arith.constant 4 : i32
    %cst_32 = arith.constant dense<2147483647> : vector<64xi32>
    %76 = vector.multi_reduction <minsi>, %75, %cst_32 [1] : vector<64x64xi32> to vector<64xi32>
    %77 = vector.shape_cast %76 : vector<64xi32> to vector<64x1xi32>
    %78 = vector.broadcast %77 : vector<64x1xi32> to vector<64x64xi32>
    %79 = arith.cmpi eq, %75, %78 : vector<64x64xi32>
    %80 = arith.extui %79 : vector<64x64xi1> to vector<64x64xi32>
    %81 = arith.sitofp %80 : vector<64x64xi32> to vector<64x64xf32>
    %cst_33 = arith.constant dense<0.000000e+00> : vector<64x32xf32>
    %82 = tpu.matmul %81, %34, %cst_33 {dimension_numbers = #tpu.dot_dimension_numbers<[1], [0], [0], [1], [0, 0, 1, 1], [], []>} : vector<64x64xf32>, vector<64x32xf32>, vector<64x32xf32> -> vector<64x32xf32>
    %83 = arith.maximumf %73, %82 : vector<64x32xf32>
    %c2147483647_i32_34 = arith.constant 2147483647 : i32
    %84 = vector.broadcast %c2147483647_i32_34 : i32 to vector<64x64xi32>
    %85 = arith.select %79, %84, %75 : vector<64x64xi1>, vector<64x64xi32>
    %c5_i32 = arith.constant 5 : i32
    %cst_35 = arith.constant dense<2147483647> : vector<64xi32>
    %86 = vector.multi_reduction <minsi>, %85, %cst_35 [1] : vector<64x64xi32> to vector<64xi32>
    %87 = vector.shape_cast %86 : vector<64xi32> to vector<64x1xi32>
    %88 = vector.broadcast %87 : vector<64x1xi32> to vector<64x64xi32>
    %89 = arith.cmpi eq, %85, %88 : vector<64x64xi32>
    %90 = arith.extui %89 : vector<64x64xi1> to vector<64x64xi32>
    %91 = arith.sitofp %90 : vector<64x64xi32> to vector<64x64xf32>
    %cst_36 = arith.constant dense<0.000000e+00> : vector<64x32xf32>
    %92 = tpu.matmul %91, %34, %cst_36 {dimension_numbers = #tpu.dot_dimension_numbers<[1], [0], [0], [1], [0, 0, 1, 1], [], []>} : vector<64x64xf32>, vector<64x32xf32>, vector<64x32xf32> -> vector<64x32xf32>
    %93 = arith.maximumf %83, %92 : vector<64x32xf32>
    %c2147483647_i32_37 = arith.constant 2147483647 : i32
    %94 = vector.broadcast %c2147483647_i32_37 : i32 to vector<64x64xi32>
    %95 = arith.select %89, %94, %85 : vector<64x64xi1>, vector<64x64xi32>
    %c6_i32_38 = arith.constant 6 : i32
    %cst_39 = arith.constant dense<2147483647> : vector<64xi32>
    %96 = vector.multi_reduction <minsi>, %95, %cst_39 [1] : vector<64x64xi32> to vector<64xi32>
    %97 = vector.shape_cast %96 : vector<64xi32> to vector<64x1xi32>
    %98 = vector.broadcast %97 : vector<64x1xi32> to vector<64x64xi32>
    %99 = arith.cmpi eq, %95, %98 : vector<64x64xi32>
    %100 = arith.extui %99 : vector<64x64xi1> to vector<64x64xi32>
    %101 = arith.sitofp %100 : vector<64x64xi32> to vector<64x64xf32>
    %cst_40 = arith.constant dense<0.000000e+00> : vector<64x32xf32>
    %102 = tpu.matmul %101, %34, %cst_40 {dimension_numbers = #tpu.dot_dimension_numbers<[1], [0], [0], [1], [0, 0, 1, 1], [], []>} : vector<64x64xf32>, vector<64x32xf32>, vector<64x32xf32> -> vector<64x32xf32>
    %103 = arith.maximumf %93, %102 : vector<64x32xf32>
    %c2147483647_i32_41 = arith.constant 2147483647 : i32
    %104 = vector.broadcast %c2147483647_i32_41 : i32 to vector<64x64xi32>
    %105 = arith.select %99, %104, %95 : vector<64x64xi1>, vector<64x64xi32>
    %c7_i32 = arith.constant 7 : i32
    %cst_42 = arith.constant dense<2147483647> : vector<64xi32>
    %106 = vector.multi_reduction <minsi>, %105, %cst_42 [1] : vector<64x64xi32> to vector<64xi32>
    %107 = vector.shape_cast %106 : vector<64xi32> to vector<64x1xi32>
    %108 = vector.broadcast %107 : vector<64x1xi32> to vector<64x64xi32>
    %109 = arith.cmpi eq, %105, %108 : vector<64x64xi32>
    %110 = arith.extui %109 : vector<64x64xi1> to vector<64x64xi32>
    %111 = arith.sitofp %110 : vector<64x64xi32> to vector<64x64xf32>
    %cst_43 = arith.constant dense<0.000000e+00> : vector<64x32xf32>
    %112 = tpu.matmul %111, %34, %cst_43 {dimension_numbers = #tpu.dot_dimension_numbers<[1], [0], [0], [1], [0, 0, 1, 1], [], []>} : vector<64x64xf32>, vector<64x32xf32>, vector<64x32xf32> -> vector<64x32xf32>
    %113 = arith.maximumf %103, %112 : vector<64x32xf32>
    %c2147483647_i32_44 = arith.constant 2147483647 : i32
    %114 = vector.broadcast %c2147483647_i32_44 : i32 to vector<64x64xi32>
    %115 = arith.select %109, %114, %105 : vector<64x64xi1>, vector<64x64xi32>
    %116 = arith.subf %113, %34 : vector<64x32xf32>
    %117 = arith.addf %32, %116 : vector<64x32xf32>
    %c0_45 = arith.constant 0 : index
    %c0_46 = arith.constant 0 : index
    %118 = vector.load %arg6[%c0_45, %c0_46] : memref<1x32xf32, #tpu.memory_space<vmem>>, vector<1x32xf32>
    %119 = vector.broadcast %118 : vector<1x32xf32> to vector<64x32xf32>
    %120 = arith.addf %117, %119 : vector<64x32xf32>
    %c0_47 = arith.constant 0 : index
    %c0_48 = arith.constant 0 : index
    %121 = vector.load %arg7[%c0_47, %c0_48] : memref<32x128xf32, #tpu.memory_space<vmem>>, vector<32x128xf32>
    %cst_49 = arith.constant dense<0.000000e+00> : vector<64x128xf32>
    %122 = tpu.matmul %120, %121, %cst_49 {dimension_numbers = #tpu.dot_dimension_numbers<[1], [0], [0], [1], [0, 0, 1, 1], [], []>} : vector<64x32xf32>, vector<32x128xf32>, vector<64x128xf32> -> vector<64x128xf32>
    %c0_50 = arith.constant 0 : index
    %c0_51 = arith.constant 0 : index
    %123 = vector.load %arg8[%c0_50, %c0_51] : memref<1x128xf32, #tpu.memory_space<vmem>>, vector<1x128xf32>
    %124 = vector.broadcast %123 : vector<1x128xf32> to vector<64x128xf32>
    %125 = arith.addf %122, %124 : vector<64x128xf32>
    %c0_52 = arith.constant 0 : index
    %c0_53 = arith.constant 0 : index
    %c0_54 = arith.constant 0 : index
    %126 = vector.load %arg9[%c0_52, %c0_53, %c0_54] : memref<1x64x128xf32, #tpu.memory_space<vmem>>, vector<1x64x128xf32>
    %127 = vector.shape_cast %126 : vector<1x64x128xf32> to vector<64x128xf32>
    %128 = vector.shape_cast %125 : vector<64x128xf32> to vector<1x64x128xf32>
    tpu.vector_store %arg9[%c0_52, %c0_53, %c0_54], %128 {strides = array<i32>} : memref<1x64x128xf32, #tpu.memory_space<vmem>>, vector<1x64x128xf32>,
    return
  }
  func.func @transform_0(%arg0: i32) -> (i32, i32, i32) {
    %c0_i32 = arith.constant 0 : i32
    %c0_i32_0 = arith.constant 0 : i32
    %c0_i32_1 = arith.constant 0 : i32
    return %arg0, %c0_i32, %c0_i32_0 : i32, i32, i32
  }
  func.func @transform_1(%arg0: i32) -> (i32, i32) {
    %c0_i32 = arith.constant 0 : i32
    %c0_i32_0 = arith.constant 0 : i32
    %c0_i32_1 = arith.constant 0 : i32
    return %c0_i32, %c0_i32_0 : i32, i32
  }
  func.func @transform_2(%arg0: i32) -> (i32, i32) {
    %c0_i32 = arith.constant 0 : i32
    %c0_i32_0 = arith.constant 0 : i32
    %c0_i32_1 = arith.constant 0 : i32
    return %c0_i32, %c0_i32_0 : i32, i32
  }
  func.func @transform_3(%arg0: i32) -> (i32, i32) {
    %c0_i32 = arith.constant 0 : i32
    %c0_i32_0 = arith.constant 0 : i32
    %c0_i32_1 = arith.constant 0 : i32
    return %c0_i32, %c0_i32_0 : i32, i32
  }
  func.func @transform_4(%arg0: i32) -> (i32, i32) {
    %c0_i32 = arith.constant 0 : i32
    %c0_i32_0 = arith.constant 0 : i32
    %c0_i32_1 = arith.constant 0 : i32
    return %c0_i32, %c0_i32_0 : i32, i32
  }
  func.func @transform_5(%arg0: i32) -> (i32, i32) {
    %c0_i32 = arith.constant 0 : i32
    %c0_i32_0 = arith.constant 0 : i32
    %c0_i32_1 = arith.constant 0 : i32
    return %c0_i32, %c0_i32_0 : i32, i32
  }
  func.func @transform_6(%arg0: i32) -> (i32, i32) {
    %c0_i32 = arith.constant 0 : i32
    %c0_i32_0 = arith.constant 0 : i32
    %c0_i32_1 = arith.constant 0 : i32
    return %c0_i32, %c0_i32_0 : i32, i32
  }
  func.func @transform_7(%arg0: i32) -> (i32, i32) {
    %c0_i32 = arith.constant 0 : i32
    %c0_i32_0 = arith.constant 0 : i32
    %c0_i32_1 = arith.constant 0 : i32
    return %c0_i32, %c0_i32_0 : i32, i32
  }
  func.func @transform_8(%arg0: i32) -> (i32, i32, i32) {
    %c0_i32 = arith.constant 0 : i32
    %c0_i32_0 = arith.constant 0 : i32
    %c0_i32_1 = arith.constant 0 : i32
    return %arg0, %c0_i32, %c0_i32_0 : i32, i32, i32
  }
}

</mosaic_0001>

<bundles_post_ra>
// kernel: tpu_custom_call.1
= control target key start
LH: loop header
LB: loop body
LE: loop exit
PB: predicated region body
PF: predicated region fallthrough
CT: control target
= control target key end

     0   :  { %13 = vsyncpa [#allocation3], 0  ;;  %s6326_s0 = inlined_call_operand.vmem [shape: f32[4,64,32], index: 0, kind: input, shape index: {}]   ;;  %s6327_s1 = inlined_call_operand.vmem [shape: f32[32,32], index: 1, kind: input, shape index: {}]   ;;  %s6328_s2 = inlined_call_operand.vmem [shape: f32[1,32], index: 2, kind: input, shape index: {}]   ;;  %s6329_s3 = inlined_call_operand.vmem [shape: f32[32,32], index: 3, kind: input, shape index: {}]   ;;  %s6330_s4 = inlined_call_operand.vmem [shape: f32[32,32], index: 4, kind: input, shape index: {}]   ;;  %s6331_s5 = inlined_call_operand.vmem [shape: f32[1,32], index: 5, kind: input, shape index: {}]   ;;  %s6332_s6 = inlined_call_operand.vmem [shape: f32[32,128], index: 6, kind: input, shape index: {}]   ;;  %s6333_s7 = inlined_call_operand.vmem [shape: f32[1,128], index: 7, kind: input, shape index: {}]   ;;  %s6334_s8 = inlined_call_operand.hbm [shape: f32[4,64,128], index: 8, kind: output, shape index: {}]  }
   0x1   :  { %15 = vsyncpa [#allocation3 + $0x1], 0  ;;  %s4667_s27 = smov 0   ;;  %s4669_s28 = smov 0  }
   0x2   :  { %s4671_s29 = smov 0   ;;  %s4673_s30 = smov 0  }
   0x3 LB: > { %s4688_s9 = sadd.s32 4294967295, %s4613_s30   ;;  %s3552_s10 = sadd.s32 4294967294, %s4613_s30   ;;  %s4613_s30 = sphi %s4673_s30, %s6384_s30   ;;  %s4609_s29 = sphi %s4671_s29, %s6383_s29   ;;  %s4605_s28 = sphi %s4669_s28, %s6382_s28   ;;  %s4601_s27 = sphi %s4667_s27, %s6381_s27  }
   0x4   : > { %s4692_s11 = sadd.s32 1, %s4613_s30   ;;  %s201_s12 = sadd.s32 1, %s4609_s29 }
   0x5   : > { %s198_s13 = ssub.s32 %s4613_s30, %s4692_s11  ;;  %p211_p0 = scmp.ne.s32.totalorder %s4609_s29, %s4605_s28 }
   0x6   : > { %p199_p1 = scmp.eq.s32.totalorder %s198_s13, 0  ;;  %p212_p2 = scmp.eq.s32.totalorder %s4688_s9, 3 }
   0x7   : > { %p217_p3 = scmp.ne.s32.totalorder %s4605_s28, %s4601_s27  ;;  %p218_p4 = scmp.eq.s32.totalorder %s3552_s10, 3 }
   0x8   : > { %s4703_s14 = scalar_select %p199_p1, %s4609_s29, %s201_s12  }
   0x9   : > { %p4705_p5 = por %p212_p2, %p211_p0  ;;  %p4709_p6 = por %p218_p4, %p217_p3 }
   0xa   : > { %p3555_p7 = scmp.ge.s32.totalorder %s4613_s30, 1  ;;  %p265_p8 = scmp.lt.s32.totalorder %s4613_s30, 5 }
   0xc   : > { %p266_p9 = pnand %p3555_p7, %p265_p8 }
   0xe   : > { %269 = sbr.rel (%p266_p9) target bundleno = 3359 (0xd1f), region = 52 }
  0x15   : > { %v312_v0 = vld [vmem:[%s6327_s1] sm:$0xff]  ;;  %v313_v1 = vld [vmem:[%s6327_s1 + $0x8] sm:$0xff]  ;;  %v314_v2 = vld [vmem:[%s6327_s1 + $0x10] sm:$0xff]  ;;  %p299_p10 = scmp.lt.s32.totalorder %s4688_s9, 3  ;;  %vm323_vm0 = vcmask 261120   ;;  %v4615_v14 = vmov 0.0|0.0   ;;  %v695_v57 = vlaneseq }
  0x16   : > { %v4306_v3 = vpack.c.bf16 %v313_v1, %v312_v0  ;;  %v315_v4 = vld [vmem:[%s6327_s1 + $0x18] sm:$0xff]  ;;  %4338 = vmatprep.subr.bf16.mxu0 %v4615_v14  ;;  %vm4616_vm1 = vmmov 0   ;;  %v6335_v15 = vmov 0.0   ;;  %v3559_v16 = vld [vmem:[%s6328_s2] ss:$0 sm:$0xff]  ;;  %vm4750_vm2 = vmpackc.low %vm323_vm0, %vm323_vm0  ;;  %v4618_v56 = vmov 1.0  }
  0x17   : > { %v4310_v5 = vpack.c.bf16 %v315_v4, %v314_v2  ;;  %s300_s25 = scalar_select %p299_p10, %s4688_s9, 3  ;;  %4019 = vmatprep.mubr.msk.f32.mxu0 %vm4616_vm1, %v6335_v15  ;;  %v794_v49 = vld [vmem:[%s6330_s4] sm:$0xff]  ;;  %v795_v50 = vld [vmem:[%s6330_s4 + $0x8] sm:$0xff]  ;;  %v796_v53 = vld [vmem:[%s6330_s4 + $0x10] sm:$0xff]  ;;  %v4859_v58 = vshrl.u32 %v695_v57, 7  ;;  %vm903_vm7 = vcmask 523264  }
  0x18   : > { %4307 = vmatprep.subr.bf16.mxu1 %v4306_v3  ;;  %v4354_v52 = vpack.c.bf16 %v795_v50, %v794_v49  ;;  %v797_v54 = vld [vmem:[%s6330_s4 + $0x18] sm:$0xff]  ;;  %s296_s19 = sand.u32 1, %s4605_s28   ;;  %s3753_s24 = sshll.u32 %s4688_s9, 10 }
  0x19   : > { %4309 = vmatpush3.bf16.msra.mxu1 %v4306_v3  ;;  %s3752_s26 = sshll.u32 %s300_s25, 6  ;;  %v4358_v55 = vpack.c.bf16 %v797_v54, %v796_v53  ;;  %v697_v59 = vsub.s32 0, %v4859_v58  ;;  %v4864_v3 = vand.u32 127, %v695_v57  ;;  %s3556_s20 = sshll.u32 %s296_s19, 6 }
  0x1a   : > { %4311 = vmatprep.subr.bf16.mxu1 %v4310_v5  ;;  %s303_s13 = scalar_lea.vmem %s6326_s0, %s3752_s26  ;;  %s298_s23 = scalar_lea.vmem [#allocation2], %s3556_s20 }
  0x1b   : > { %v304_v6 = vld [vmem:[%s303_s13] sm:$0xff]  ;;  %v305_v7 = vld [vmem:[%s303_s13 + $0x8] sm:$0xff]  ;;  %v306_v8 = vld [vmem:[%s303_s13 + $0x10] sm:$0xff]  ;;  %vm774_vm5 = vcmp.eq.s32.totalorder %v4859_v58, %v4864_v3  ;;  %s3490_s25 = sshll.u32 %s298_s23, 4  ;;  %s6279_s12 = scalar_lea.hbm %s6334_s8, %s3753_s24  ;;  %s6281_s25 = int_to_ptr.vmem [resolvable:$true] %s3490_s25 }
  0x1c   : > { %3963 = vmatprep.mubr.msk.f32.mxu1 %vm323_vm0, %v304_v6  ;;  %v307_v9 = vld [vmem:[%s303_s13 + $0x18] sm:$0xff]  ;;  %v308_v10 = vld [vmem:[%s303_s13 + $0x20] sm:$0xff]  ;;  %v309_v11 = vld [vmem:[%s303_s13 + $0x28] sm:$0xff]  ;;  %s6285_s9 = scalar_lea.sflag [#allocation3], %s296_s19  ;;  %s4619_s17 = smov [#allocation2]  }
  0x1d   : > { %4313 = vmatpush3.bf16.msra.mxu1 %v4310_v5  ;;  %v310_v12 = vld [vmem:[%s303_s13 + $0x30] sm:$0xff]  ;;  %v311_v13 = vld [vmem:[%s303_s13 + $0x38] sm:$0xff]  ;;  %s4551_s13 = scalar_lea.vmem %s6281_s25, 1024  ;;  %s4555_s18 = sshll.u32 %s4619_s17, 4  ;;  %s4556_s18 = int_to_ptr.vmem [resolvable:$false] %s4555_s18 }
  0x1e   : > { %p4552_p11 = scmp.ne.s32.totalorder %s6281_s25, %s4551_s13  ;;  %s4557_s20 = scalar_lea.vmem %s4556_s18, 2048 }
  0x1f   : > { %p4558_p0 = scmp.lt.s32.totalorder %s6281_s25, %s4556_s18  ;;  %p4559_p1 = scmp.lt.s32.totalorder %s4557_s20, %s4551_s13 }
  0x20   : > { %3964 = vmatmul.mubr.msk.f32.vlgmr.msra.gmra.mrb[0].mxu1 %vm323_vm0, %v305_v7  ;;  %p4553_p12 = pnand %p4552_p11, %p4705_p5 }
  0x21   : > { %3966 = vmatprep.mubr.msk.f32.mxu1 %vm323_vm0, %v306_v8  ;;  %p4560_p2 = por %p4559_p1, %p4558_p0 }
  0x22   : > { %p4554_p13 = pneg %p4553_p12 }
  0x24   : > { %3967 = vmatmul.mubr.msk.f32.gmra.mrb[2].mxu1 %vm323_vm0, %v307_v9  ;;  %v4869_v9 = vadd.s32 8, %v4859_v58  ;;  %p4561_p3 = pnand %p4560_p2, %p4554_p13 }
  0x25   : > { %3969 = vmatprep.mubr.msk.f32.mxu1 %vm323_vm0, %v308_v10  ;;  %v4872_v10 = vadd.s32 16, %v4859_v58 }
  0x26   : > { %vm775_vm10 = vcmp.eq.s32.totalorder %v4869_v9, %v4864_v3 }
  0x27   : > { %vm776_vm9 = vcmp.eq.s32.totalorder %v4872_v10, %v4864_v3 }
  0x28   : > { %3970 = vmatmul.mubr.msk.f32.gmra.mrb[4].mxu1 %vm323_vm0, %v309_v11  ;;  %v4875_v11 = vadd.s32 24, %v4859_v58 }
  0x29   : > { %3972 = vmatprep.mubr.msk.f32.mxu1 %vm323_vm0, %v310_v12 }
  0x2a   : > { %vm777_vm12 = vcmp.eq.s32.totalorder %v4875_v11, %v4864_v3 }
  0x2c   : > { %3973 = vmatmul.mubr.msk.f32.gmra.mrb[6].mxu1 %vm323_vm0, %v311_v13 }
  0xf3   : > { %v3965_v17 = vpop.f32.mrb[0].mxu1 }
  0xf4   : > { %v4744_v18 = vadd.f32 %v3965_v17, %v3559_v16  ;;  %v414_v19 = vpop.f32.mrb[1].mxu1  ;;  %v4879_v17 = vadd.s32 32, %v4859_v58 }
  0xf5   : > { %v4746_v20 = vadd.f32 %v3559_v16, %v414_v19  ;;  %v4882_v19 = vadd.s32 40, %v4859_v58 }
  0xf6   : > { %v583_v22 = vmul.f32 %v4744_v18, %v4744_v18  ;;  %vm778_vm13 = vcmp.eq.s32.totalorder %v4879_v17, %v4864_v3 }
  0xf7   : > { %3991 = vmatprep.mubr.msk.f32.mxu1 %vm323_vm0, %v4746_v20  ;;  %v4314_v23 = vpack.c.bf16 %v4744_v18, %v4746_v20  ;;  %v3968_v24 = vpop.f32.mrb[2].mxu1  ;;  %v582_v25 = vmul.f32 %v4746_v20, %v4746_v20  ;;  %vm779_vm15 = vcmp.eq.s32.totalorder %v4882_v19, %v4864_v3 }
  0xf8   : > { %v4762_v26 = vadd.f32 %v3968_v24, %v3559_v16  ;;  %v424_v27 = vpop.f32.mrb[3].mxu1  ;;  %v4888_v24 = vadd.s32 48, %v4859_v58 }
  0xf9   : > { %4316 = vmatprep.subr.msk.bf16.mxu1 %vm4750_vm2, %v4314_v23  ;;  %v4766_v28 = vadd.f32 %v3559_v16, %v424_v27  ;;  %v4339_v29 = vpack.c.bf16 %v583_v22, %v582_v25  ;;  %v4891_v25 = vadd.s32 56, %v4859_v58 }
  0xfa   : > { %4319 = vmatpush3.bf16.xpose.msk.msra.mxu1 %vm4750_vm2, %v4314_v23  ;;  %v585_v33 = vmul.f32 %v4762_v26, %v4762_v26  ;;  %vm780_vm1 = vcmp.eq.s32.totalorder %v4888_v24, %v4864_v3 }
  0xfb   : > { %4341 = vmatpush3.bf16.xpose.msk.msra.mxu0 %vm4750_vm2, %v4339_v29  ;;  %v4320_v30 = vpack.c.bf16 %v4762_v26, %v4766_v28  ;;  %v3971_v31 = vpop.f32.mrb[4].mxu1  ;;  %v584_v32 = vmul.f32 %v4766_v28, %v4766_v28 }
  0xfc   : > { %v4778_v34 = vadd.f32 %v3971_v31, %v3559_v16  ;;  %4342 = vmatprep.subr.bf16.mxu0 %v4615_v14  ;;  %v434_v35 = vpop.f32.mrb[5].mxu1 }
  0xfd   : > { %4322 = vmatprep.subr.msk.bf16.mxu1 %vm4750_vm2, %v4320_v30  ;;  %v4782_v36 = vadd.f32 %v3559_v16, %v434_v35  ;;  %v4343_v37 = vpack.c.bf16 %v585_v33, %v584_v32 }
  0xfe   : > { %v587_v41 = vmul.f32 %v4778_v34, %v4778_v34 }
  0xff   : > { %v4326_v38 = vpack.c.bf16 %v4778_v34, %v4782_v36  ;;  %v3974_v39 = vpop.f32.mrb[6].mxu1  ;;  %v586_v44 = vmul.f32 %v4782_v36, %v4782_v36 }
 0x100   : > { %v444_v40 = vpop.f32.mrb[7].mxu1  ;;  %v4794_v42 = vadd.f32 %v3974_v39, %v3559_v16 }
 0x101   : > { %v4796_v43 = vadd.f32 %v3559_v16, %v444_v40  ;;  %v4347_v45 = vpack.c.bf16 %v587_v41, %v586_v44 }
 0x102   : > { %4325 = vmatpush3.bf16.xpose.msk.msra.mxu1 %vm4750_vm2, %v4320_v30  ;;  %v589_v48 = vmul.f32 %v4794_v42, %v4794_v42 }
 0x103   : > { %4345 = vmatpush3.bf16.xpose.msk.msra.mxu0 %vm4750_vm2, %v4343_v37  ;;  %4328 = vmatprep.subr.msk.bf16.mxu1 %vm4750_vm2, %v4326_v38  ;;  %v4332_v46 = vpack.c.bf16 %v4794_v42, %v4796_v43  ;;  %v588_v47 = vmul.f32 %v4796_v43, %v4796_v43 }
 0x104   : > { %4346 = vmatprep.subr.bf16.mxu0 %v4615_v14 }
 0x105   : > { %v4351_v51 = vpack.c.bf16 %v589_v48, %v588_v47 }
 0x10a   : > { %4331 = vmatpush3.bf16.xpose.msk.msra.mxu1 %vm4750_vm2, %v4326_v38 }
 0x10b   : > { %4349 = vmatpush3.bf16.xpose.msk.msra.mxu0 %vm4750_vm2, %v4347_v45  ;;  %4334 = vmatprep.subr.msk.bf16.mxu1 %vm4750_vm2, %v4332_v46 }
 0x10c   : > { %4350 = vmatprep.subr.bf16.mxu0 %v4615_v14 }
 0x112   : > { %4337 = vmatpush3.bf16.xpose.msk.msra.mxu1 %vm4750_vm2, %v4332_v46 }
 0x113   : > { %4353 = vmatpush3.bf16.xpose.msk.msra.mxu0 %vm4750_vm2, %v4351_v51 }
 0x114   : > { %4355 = vmatprep.subr.bf16.mxu0 %v4354_v52 }
 0x119   : > { %3992 = vmatmul.mubr.msk.f32.vlgmr.msra.gmra.mrb[8].mxu1 %vm323_vm0, %v4744_v18 }
 0x11a   : > { %3994 = vmatprep.mubr.msk.f32.mxu1 %vm323_vm0, %v4766_v28  ;;  %4020 = vmatmul.mubr.msk.f32.vlgmr.msra.gmra.mrb[0].mxu0 %vm323_vm0, %v4618_v56 }
 0x11b   : > { %4357 = vmatpush3.bf16.msra.mxu0 %v4354_v52  ;;  %4030 = vmatprep.mubr.msk.f32.mxu0 %vm323_vm0, %v4746_v20 }
 0x11c   : > { %4359 = vmatprep.subr.bf16.mxu0 %v4358_v55 }
 0x11d   : > { %3995 = vmatmul.mubr.msk.f32.gmra.mrb[10].mxu1 %vm323_vm0, %v4762_v26 }
 0x11e   : > { %3997 = vmatprep.mubr.msk.f32.mxu1 %vm323_vm0, %v4782_v36 }
 0x11f   : > { %4361 = vmatpush3.bf16.msra.mxu0 %v4358_v55 }
 0x121   : > { %3998 = vmatmul.mubr.msk.f32.gmra.mrb[12].mxu1 %vm323_vm0, %v4778_v34 }
 0x122   : > { %4000 = vmatprep.mubr.msk.f32.mxu1 %vm323_vm0, %v4796_v43  ;;  %4031 = vmatmul.mubr.msk.f32.vlgmr.msra.gmra.mrb[2].mxu0 %vm323_vm0, %v4744_v18 }
 0x123   : > { %4033 = vmatprep.mubr.msk.f32.mxu0 %vm323_vm0, %v4766_v28 }
 0x125   : > { %4001 = vmatmul.mubr.msk.f32.gmra.mrb[14].mxu1 %vm323_vm0, %v4794_v42 }
 0x126   : > { %4034 = vmatmul.mubr.msk.f32.gmra.mrb[4].mxu0 %vm323_vm0, %v4762_v26 }
 0x127   : > { %4036 = vmatprep.mubr.msk.f32.mxu0 %vm323_vm0, %v4782_v36 }
 0x12a   : > { %4037 = vmatmul.mubr.msk.f32.gmra.mrb[6].mxu0 %vm323_vm0, %v4778_v34 }
 0x12b   : > { %4039 = vmatprep.mubr.msk.f32.mxu0 %vm323_vm0, %v4796_v43 }
 0x12e   : > { %4040 = vmatmul.mubr.msk.f32.gmra.mrb[8].mxu0 %vm323_vm0, %v4794_v42 }
 0x1ec   : > { %v3993_v60 = vpop.f32.mrb[8].mxu1 }
 0x1ed   : > { %v688_v61 = vmul.f32 2.0, %v3993_v60  ;;  %v543_v62 = vpop.f32.mrb[9].mxu1  ;;  %v683_v63 = vpop.f32.mrb[0].mxu0 }
 0x1ee   : > { %v687_v0 = vmul.f32 2.0, %v543_v62  ;;  %v4862_v1 = vrot.slane %v683_v63, %v697_v59  ;;  %v4021_v2 = vpop.f32.mrb[1].mxu0 }
 0x1f0   : > { %v3996_v4 = vpop.f32.mrb[10].mxu1  ;;  %v699_v5 = vsub.f32 %v4862_v1, %v687_v0  ;;  %v700_v6 = vsub.f32 %v4862_v1, %v688_v61 }
 0x1f1   : > { %v690_v7 = vmul.f32 2.0, %v3996_v4  ;;  %v553_v8 = vpop.f32.mrb[11].mxu1 }
 0x1f2   : > { %v689_v12 = vmul.f32 2.0, %v553_v8  ;;  %vm726_vm3 = vcmp.ge.s32.totalorder %v699_v5, 0  ;;  %v734_v13 = vxor.u32 2147483647, %v699_v5  ;;  %vm727_vm4 = vcmp.ge.s32.totalorder %v700_v6, 0 }
 0x1f3   : > { %v702_v14 = vsub.f32 %v4862_v1, %v690_v7  ;;  %v735_v16 = vxor.u32 2147483647, %v700_v6 }
 0x1f4   : > { %v701_v21 = vsub.f32 %v4862_v1, %v689_v12  ;;  %v3999_v22 = vpop.f32.mrb[12].mxu1  ;;  %v742_v23 = vsel %vm726_vm3, %v699_v5, %v734_v13 }
 0x1f5   : > { %vm729_vm6 = vcmp.ge.s32.totalorder %v702_v14, 0  ;;  %v737_v27 = vxor.u32 2147483647, %v702_v14  ;;  %v692_v29 = vmul.f32 2.0, %v3999_v22  ;;  %v563_v30 = vpop.f32.mrb[13].mxu1  ;;  %v4893_v31 = vpop.f32.mrb[2].mxu0  ;;  %v743_v32 = vsel %vm727_vm4, %v700_v6, %v735_v16 }
 0x1f6   : > { %vm728_vm8 = vcmp.ge.s32.totalorder %v701_v21, 0  ;;  %v736_v33 = vxor.u32 2147483647, %v701_v21  ;;  %v691_v35 = vmul.f32 2.0, %v563_v30  ;;  %v4896_v37 = vpop.f32.mrb[3].mxu0  ;;  %v750_v38 = vshra.s32 %v742_v23, 6 }
 0x1f7   : > { %6348 = vst [vmem:[#allocation5_spill] sm:$0xff] %v4896_v37  ;;  %v745_v39 = vsel %vm729_vm6, %v702_v14, %v737_v27  ;;  %v704_v40 = vsub.f32 %v4862_v1, %v692_v29  ;;  %v4903_v41 = vpack.c.bf16 %v4893_v31, %v4896_v37  ;;  %v751_v44 = vshra.s32 %v743_v32, 6 }
 0x1f8   : > { %v753_v45 = vshra.s32 %v745_v39, 6  ;;  %v744_v46 = vsel %vm728_vm8, %v701_v21, %v736_v33  ;;  %v703_v47 = vsub.f32 %v4862_v1, %v691_v35  ;;  %v4002_v48 = vpop.f32.mrb[14].mxu1  ;;  %v758_v49 = vshll.u32 %v750_v38, 6 }
 0x1f9   : > { %v752_v50 = vshra.s32 %v744_v46, 6  ;;  %vm731_vm11 = vcmp.ge.s32.totalorder %v704_v40, 0  ;;  %v739_v51 = vxor.u32 2147483647, %v704_v40  ;;  %v694_v52 = vmul.f32 2.0, %v4002_v48  ;;  %v573_v53 = vpop.f32.mrb[15].mxu1  ;;  %4363 = vmatprep.subr.bf16.mxu1 %v4903_v41  ;;  %4379 = vmatprep.subr.bf16.mxu0 %v4903_v41 }
 0x1fa   : > { %v761_v54 = vshll.u32 %v753_v45, 6  ;;  %vm730_vm14 = vcmp.ge.s32.totalorder %v703_v47, 0  ;;  %v738_v55 = vxor.u32 2147483647, %v703_v47  ;;  %v693_v56 = vmul.f32 2.0, %v573_v53  ;;  %v4914_v57 = vpop.f32.mrb[4].mxu0  ;;  %4365 = vmatpush3.bf16.msra.mxu1 %v4903_v41  ;;  %4381 = vmatpush3.bf16.msra.mxu0 %v4903_v41 }
 0x1fb   : > { %6349 = vst [vmem:[#allocation6_spill] sm:$0xff] %v4914_v57  ;;  %v760_v59 = vshll.u32 %v752_v50, 6  ;;  %v747_v60 = vsel %vm731_vm11, %v704_v40, %v739_v51  ;;  %v706_v61 = vsub.f32 %v4862_v1, %v694_v52  ;;  %v4920_v62 = vpop.f32.mrb[5].mxu0  ;;  %v766_v63 = vor.u32 %v758_v49, %v4864_v3 }
 0x1fc   : > { %6350 = vst [vmem:[#allocation7_spill] sm:$0xff] %v4920_v62  ;;  %v755_v0 = vshra.s32 %v747_v60, 6  ;;  %v746_v2 = vsel %vm730_vm14, %v703_v47, %v738_v55  ;;  %v705_v4 = vsub.f32 %v4862_v1, %v693_v56  ;;  %v4926_v5 = vpack.c.bf16 %v4914_v57, %v4920_v62 }
 0x1fd   : > { %v754_v6 = vshra.s32 %v746_v2, 6  ;;  %vm733_vm2 = vcmp.ge.s32.totalorder %v706_v61, 0  ;;  %v741_v7 = vxor.u32 2147483647, %v706_v61  ;;  %v4932_v8 = vpop.f32.mrb[6].mxu0  ;;  %v759_v12 = vshll.u32 %v751_v44, 6 }
 0x1fe   : > { %6351 = vst [vmem:[#allocation8_spill] sm:$0xff] %v4932_v8  ;;  %v763_v13 = vshll.u32 %v755_v0, 6  ;;  %vm732_vm3 = vcmp.ge.s32.totalorder %v705_v4, 0  ;;  %v740_v14 = vxor.u32 2147483647, %v705_v4  ;;  %4367 = vmatprep.subr.bf16.mxu1 %v4926_v5  ;;  %4383 = vmatprep.subr.bf16.mxu0 %v4926_v5  ;;  %v4936_v1 = vpop.f32.mrb[7].mxu0  ;;  %v768_v16 = vor.u32 %v760_v59, %v4864_v3 }
 0x1ff   : > { %6352 = vst [vmem:[#allocation9_spill] sm:$0xff] %v4936_v1  ;;  %v762_v21 = vshll.u32 %v754_v6, 6  ;;  %v749_v22 = vsel %vm733_vm2, %v706_v61, %v741_v7  ;;  %v4941_v23 = vpack.c.bf16 %v4932_v8, %v4936_v1  ;;  %4369 = vmatpush3.bf16.msra.mxu1 %v4926_v5  ;;  %4385 = vmatpush3.bf16.msra.mxu0 %v4926_v5  ;;  %v4948_v27 = vsel %vm774_vm5, 2147483647, %v766_v63 }
 0x200   : > { %v757_v29 = vshra.s32 %v749_v22, 6  ;;  %v748_v30 = vsel %vm732_vm3, %v705_v4, %v740_v14  ;;  %v4952_v32 = vsel %vm903_vm7, %v4948_v27, 2147483647  ;;  %v767_v33 = vor.u32 %v759_v12, %v4864_v3 }
 0x201   : > { %v756_v35 = vshra.s32 %v748_v30, 6  ;;  %v4955_v38 = vpop.f32.mrb[8].mxu0  ;;  %4371 = vmatprep.subr.bf16.mxu1 %v4941_v23  ;;  %4387 = vmatprep.subr.bf16.mxu0 %v4941_v23  ;;  %v906_v39 = vshra.s32 %v4952_v32, 16  ;;  %v4963_v58 = vsel %vm776_vm9, 2147483647, %v768_v16  ;;  %v769_v40 = vor.u32 %v761_v54, %v4864_v3 }
 0x202   : > { %6353 = vst [vmem:[#allocation10_spill] sm:$0xff] %v4955_v38  ;;  %v765_v44 = vshll.u32 %v757_v29, 6  ;;  %v4966_v45 = vpop.f32.mrb[9].mxu0  ;;  %v4971_v46 = vsel %vm775_vm10, 2147483647, %v767_v33  ;;  %v770_v48 = vor.u32 %v762_v21, %v4864_v3  ;;  %v771_v59 = vor.u32 %v763_v13, %v4864_v3 }
 0x203   : > { %6354 = vst [vmem:[#allocation11_spill] sm:$0xff] %v4966_v45  ;;  %v934_v47 = vsel %vm903_vm7, %v4963_v58, 2147483647  ;;  %v764_v49 = vshll.u32 %v756_v35, 6  ;;  %v908_v50 = vcvt.s32.f32 %v906_v39  ;;  %v4978_v10 = vpack.c.bf16 %v4955_v38, %v4966_v45  ;;  %4373 = vmatpush3.bf16.msra.mxu1 %v4941_v23  ;;  %4389 = vmatpush3.bf16.msra.mxu0 %v4941_v23 }
 0x204   : > { %v919_v9 = vsel %vm903_vm7, %v4971_v46, 2147483647  ;;  %v936_v52 = vshra.s32 %v934_v47, 16  ;;  %v4987_v53 = vsel %vm777_vm12, 2147483647, %v769_v40  ;;  %vm781_vm4 = vcmp.eq.s32.totalorder %v4891_v25, %v4864_v3 }
 0x205   : > { %v921_v51 = vshra.s32 %v919_v9, 16  ;;  %v4992_v54 = vsel %vm778_vm13, 2147483647, %v770_v48  ;;  %909 = vmin.xlane.f32.xlu0 %v908_v50  ;;  %4375 = vmatprep.subr.bf16.mxu1 %v4978_v10  ;;  %v949_v55 = vsel %vm903_vm7, %v4987_v53, 2147483647  ;;  %v772_v11 = vor.u32 %v764_v49, %v4864_v3 }
 0x206   : > { %v964_v56 = vsel %vm903_vm7, %v4992_v54, 2147483647  ;;  %4391 = vmatprep.subr.bf16.mxu0 %v4978_v10  ;;  %v938_v60 = vcvt.s32.f32 %v936_v52  ;;  %v951_v61 = vshra.s32 %v949_v55, 16  ;;  %v5009_v0 = vsel %vm779_vm15, 2147483647, %v771_v59 }
 0x207   : > { %v966_v17 = vshra.s32 %v964_v56, 16  ;;  %v923_v63 = vcvt.s32.f32 %v921_v51  ;;  %4377 = vmatpush3.bf16.msra.mxu1 %v4978_v10  ;;  %4393 = vmatpush3.bf16.msra.mxu0 %v4978_v10  ;;  %v5014_v2 = vsel %vm780_vm1, 2147483647, %v772_v11  ;;  %v773_v4 = vor.u32 %v765_v44, %v4864_v3 }
 0x208   : > { %939 = vmin.xlane.f32.xlu1 %v938_v60  ;;  %4395 = vmatprep.subr.bf16.mxu1 %v4903_v41  ;;  %v979_v25 = vsel %vm903_vm7, %v5009_v0, 2147483647  ;;  %v994_v6 = vsel %vm903_vm7, %v5014_v2, 2147483647  ;;  %v953_v24 = vcvt.s32.f32 %v951_v61  ;;  %v905_v29 = vand.u32 65535, %v4952_v32 }
 0x209   : > { %924 = vmin.xlane.f32.xlu0 %v923_v63  ;;  %4411 = vmatprep.subr.bf16.mxu0 %v4903_v41  ;;  %v968_v19 = vcvt.s32.f32 %v966_v17  ;;  %v996_v7 = vshra.s32 %v994_v6, 16  ;;  %v5023_v12 = vsel %vm781_vm4, 2147483647, %v773_v4  ;;  %v981_v13 = vshra.s32 %v979_v25, 16 }
 0x20a   : > { %v1009_v3 = vsel %vm903_vm7, %v5023_v12, 2147483647  ;;  %v935_v30 = vand.u32 65535, %v934_v47  ;;  %v907_v35 = vcvt.s32.f32 %v905_v29  ;;  %v920_v39 = vand.u32 65535, %v919_v9 }
 0x20b   : > { %v998_v14 = vcvt.s32.f32 %v996_v7  ;;  %v983_v16 = vcvt.s32.f32 %v981_v13  ;;  %v1011_v21 = vshra.s32 %v1009_v3, 16  ;;  %v950_v49 = vand.u32 65535, %v949_v55 }
 0x20c   : > { %954 = vmin.xlane.f32.xlu1 %v953_v24  ;;  %v937_v48 = vcvt.s32.f32 %v935_v30  ;;  %v922_v52 = vcvt.s32.f32 %v920_v39  ;;  %v965_v59 = vand.u32 65535, %v964_v56  ;;  %v980_v17 = vand.u32 65535, %v979_v25 }
 0x20d   : > { %969 = vmin.xlane.f32.xlu0 %v968_v19  ;;  %v1013_v22 = vcvt.s32.f32 %v1011_v21  ;;  %v952_v47 = vcvt.s32.f32 %v950_v49  ;;  %v995_v9 = vand.u32 65535, %v994_v6  ;;  %v1010_v56 = vand.u32 65535, %v1009_v3 }
 0x20f   : > { %v997_v21 = vcvt.s32.f32 %v995_v9 }
 0x210   : > { %984 = vmin.xlane.f32.xlu1 %v983_v16 }
 0x211   : > { %999 = vmin.xlane.f32.xlu0 %v998_v14 }
 0x214   : > { %1014 = vmin.xlane.f32.xlu1 %v1013_v22 }
 0x292   : > { %v910_v33 = vpop.xlane.xlu0 %909 }
 0x293   : > { %vm911_vm5 = vcmp.eq.f32.partialorder %v908_v50, %v910_v33  ;;  %v967_v50 = vcvt.s32.f32 %v965_v59 }
 0x294   : > { %v912_v40 = vsel %vm911_vm5, %v907_v35, inf }
 0x295   : > { %913 = vmin.xlane.f32.xlu0 %v912_v40  ;;  %v940_v44 = vpop.xlane.xlu1 %939 }
 0x296   : > { %v925_v51 = vpop.xlane.xlu0 %924  ;;  %vm941_vm6 = vcmp.eq.f32.partialorder %v938_v60, %v940_v44  ;;  %v982_v60 = vcvt.s32.f32 %v980_v17  ;;  %v946_v35 = vcvt.f32.s32 %v940_v44 }
 0x297   : > { %vm926_vm8 = vcmp.eq.f32.partialorder %v923_v63, %v925_v51  ;;  %v942_v11 = vsel %vm941_vm6, %v937_v48, inf  ;;  %v931_v3 = vcvt.f32.s32 %v925_v51 }
 0x298   : > { %v927_v61 = vsel %vm926_vm8, %v922_v52, inf  ;;  %v947_v52 = vshll.u32 %v946_v35, 16 }
 0x299   : > { %928 = vmin.xlane.f32.xlu1 %v927_v61  ;;  %943 = vmin.xlane.f32.xlu0 %v942_v11  ;;  %v955_v32 = vpop.xlane.xlu1 %954 }
 0x29a   : > { %v970_v4 = vpop.xlane.xlu0 %969  ;;  %vm956_vm9 = vcmp.eq.f32.partialorder %v953_v24, %v955_v32  ;;  %v1012_v24 = vcvt.s32.f32 %v1010_v56 }
 0x29b   : > { %v957_v7 = vsel %vm956_vm9, %v952_v47, inf  ;;  %vm971_vm10 = vcmp.eq.f32.partialorder %v968_v19, %v970_v4  ;;  %v916_v19 = vcvt.f32.s32 %v910_v33  ;;  %v932_v47 = vshll.u32 %v931_v3, 16 }
 0x29c   : > { %v972_v13 = vsel %vm971_vm10, %v967_v50, inf }
 0x29d   : > { %958 = vmin.xlane.f32.xlu1 %v957_v7  ;;  %973 = vmin.xlane.f32.xlu0 %v972_v13  ;;  %v985_v55 = vpop.xlane.xlu1 %984  ;;  %v917_v40 = vshll.u32 %v916_v19, 16 }
 0x29e   : > { %v1000_v63 = vpop.xlane.xlu0 %999  ;;  %vm986_vm11 = vcmp.eq.f32.partialorder %v983_v16, %v985_v55  ;;  %v961_v16 = vcvt.f32.s32 %v955_v32  ;;  %v991_v59 = vcvt.f32.s32 %v985_v55 }
 0x29f   : > { %v987_v29 = vsel %vm986_vm11, %v982_v60, inf  ;;  %vm1001_vm12 = vcmp.eq.f32.partialorder %v998_v14, %v1000_v63  ;;  %v976_v14 = vcvt.f32.s32 %v970_v4  ;;  %v1006_v13 = vcvt.f32.s32 %v1000_v63 }
 0x2a0   : > { %v1002_v30 = vsel %vm1001_vm12, %v997_v21, inf  ;;  %v962_v44 = vshll.u32 %v961_v16, 16  ;;  %v992_v7 = vshll.u32 %v991_v59, 16 }
 0x2a1   : > { %988 = vmin.xlane.f32.xlu1 %v987_v29  ;;  %1003 = vmin.xlane.f32.xlu0 %v1002_v30  ;;  %v5028_v25 = vpop.xlane.xlu1 %1014  ;;  %v977_v4 = vshll.u32 %v976_v14, 16 }
 0x2a2   : > { %vm1016_vm13 = vcmp.eq.f32.partialorder %v1013_v22, %v5028_v25  ;;  %v1021_v3 = vcvt.f32.s32 %v5028_v25 }
 0x2a3   : > { %v1017_v6 = vsel %vm1016_vm13, %v1012_v24, inf }
 0x2a5   : > { %1018 = vmin.xlane.f32.xlu1 %v1017_v6 }
 0x322   : > { %v914_v39 = vpop.xlane.xlu0 %913 }
 0x323   : > { %v915_v48 = vcvt.f32.s32 %v914_v39 }
 0x325   : > { %v918_v49 = vadd.s32 %v917_v40, %v915_v48  ;;  %v1007_v40 = vshll.u32 %v1006_v13, 16 }
 0x326   : > { %v929_v11 = vpop.xlane.xlu1 %928  ;;  %v944_v61 = vpop.xlane.xlu0 %943 }
 0x327   : > { %v930_v17 = vcvt.f32.s32 %v929_v11  ;;  %v945_v50 = vcvt.f32.s32 %v944_v61  ;;  %vm1024_vm14 = vcmp.eq.s32.totalorder %v4948_v27, %v918_v49 }
 0x328   : > { %v3601_v22 = vsel %vm1024_vm14, 1.0, %v6335_v15  ;;  %v5034_v33 = vsel %vm1024_vm14, 2147483647, %v4948_v27 }
 0x329   : > { %v933_v51 = vadd.s32 %v932_v47, %v930_v17  ;;  %v948_v9 = vadd.s32 %v947_v52, %v945_v50  ;;  %4058 = vmatprep.mubr.msk.f32.mxu1 %vm903_vm7, %v3601_v22  ;;  %v5039_v32 = vsel %vm903_vm7, %v5034_v33, 2147483647  ;;  %v1022_v22 = vshll.u32 %v1021_v3, 16 }
 0x32a   : > { %v959_v55 = vpop.xlane.xlu1 %958  ;;  %v974_v60 = vpop.xlane.xlu0 %973  ;;  %v1187_v56 = vshra.s32 %v5039_v32, 16 }
 0x32b   : > { %vm1025_vm15 = vcmp.eq.s32.totalorder %v4971_v46, %v933_v51  ;;  %v960_v27 = vcvt.f32.s32 %v959_v55  ;;  %v975_v21 = vcvt.f32.s32 %v974_v60  ;;  %vm1026_vm1 = vcmp.eq.s32.totalorder %v4963_v58, %v948_v9 }
 0x32c   : > { %v3602_v29 = vsel %vm1025_vm15, 1.0, %v6335_v15  ;;  %v3603_v30 = vsel %vm1026_vm1, 1.0, %v6335_v15  ;;  %v5046_v24 = vcvt.s32.f32 %v1187_v56  ;;  %v5049_v6 = vsel %vm1025_vm15, 2147483647, %v4971_v46 }
 0x32d   : > { %v963_v63 = vadd.s32 %v962_v44, %v960_v27  ;;  %v978_v19 = vadd.s32 %v977_v4, %v975_v21  ;;  %4059 = vmatmul.mubr.msk.f32.vlgmr.msra.gmra.mrb[16].mxu1 %vm903_vm7, %v3602_v29  ;;  %v5054_v35 = vsel %vm903_vm7, %v5049_v6, 2147483647  ;;  %v5057_v39 = vsel %vm1026_vm1, 2147483647, %v4963_v58 }
 0x32e   : > { %4397 = vmatpush3.bf16.msra.mxu1 %v4903_v41  ;;  %v989_v48 = vpop.xlane.xlu1 %988  ;;  %4061 = vmatprep.mubr.msk.f32.mxu1 %vm903_vm7, %v3603_v30  ;;  %v1004_v46 = vpop.xlane.xlu0 %1003  ;;  %v1202_v16 = vshra.s32 %v5054_v35, 16  ;;  %v5065_v49 = vsel %vm903_vm7, %v5057_v39, 2147483647 }
 0x32f   : > { %v990_v52 = vcvt.f32.s32 %v989_v48  ;;  %4399 = vmatprep.subr.bf16.mxu1 %v4926_v5  ;;  %1190 = vmin.xlane.f32.xlu0 %v5046_v24  ;;  %v1005_v58 = vcvt.f32.s32 %v1004_v46  ;;  %vm1027_vm2 = vcmp.eq.s32.totalorder %v4987_v53, %v963_v63  ;;  %vm1028_vm3 = vcmp.eq.s32.totalorder %v4992_v54, %v978_v19 }
 0x330   : > { %v3604_v25 = vsel %vm1027_vm2, 1.0, %v6335_v15  ;;  %v5072_v14 = vcvt.s32.f32 %v1202_v16  ;;  %v3605_v59 = vsel %vm1028_vm3, 1.0, %v6335_v15  ;;  %v1217_v11 = vshra.s32 %v5065_v49, 16 }
 0x331   : > { %v993_v61 = vadd.s32 %v992_v7, %v990_v52  ;;  %v1008_v47 = vadd.s32 %v1007_v40, %v1005_v58  ;;  %4062 = vmatmul.mubr.msk.f32.gmra.mrb[18].mxu1 %vm903_vm7, %v3604_v25  ;;  %v5078_v17 = vsel %vm1027_vm2, 2147483647, %v4987_v53  ;;  %v5081_v50 = vsel %vm1028_vm3, 2147483647, %v4992_v54 }
 0x332   : > { %4401 = vmatpush3.bf16.msra.mxu1 %v4926_v5  ;;  %1205 = vmin.xlane.f32.xlu1 %v5072_v14  ;;  %v1019_v44 = vpop.xlane.xlu1 %1018  ;;  %v1219_v51 = vcvt.s32.f32 %v1217_v11  ;;  %v1230_v9 = vsel %vm903_vm7, %v5078_v17, 2147483647  ;;  %v5089_v4 = vsel %vm903_vm7, %v5081_v50, 2147483647  ;;  %v1186_v58 = vand.u32 65535, %v5039_v32 }
 0x333   : > { %v1020_v7 = vcvt.f32.s32 %v1019_v44  ;;  %4064 = vmatprep.mubr.msk.f32.mxu1 %vm903_vm7, %v3605_v59  ;;  %4403 = vmatprep.subr.bf16.mxu1 %v4941_v23  ;;  %vm1029_vm4 = vcmp.eq.s32.totalorder %v5009_v0, %v993_v61  ;;  %v1232_v53 = vshra.s32 %v1230_v9, 16  ;;  %v1247_v54 = vshra.s32 %v5089_v4, 16 }
 0x334   : > { %1220 = vmin.xlane.f32.xlu0 %v1219_v51  ;;  %v3606_v13 = vsel %vm1029_vm4, 1.0, %v6335_v15  ;;  %vm1030_vm5 = vcmp.eq.s32.totalorder %v5014_v2, %v1008_v47  ;;  %v5098_v55 = vsel %vm1029_vm4, 2147483647, %v5009_v0  ;;  %v1188_v59 = vcvt.s32.f32 %v1186_v58 }
 0x335   : > { %v1023_v60 = vadd.s32 %v1022_v22, %v1020_v7  ;;  %4065 = vmatmul.mubr.msk.f32.gmra.mrb[20].mxu1 %vm903_vm7, %v3606_v13  ;;  %v1234_v56 = vcvt.s32.f32 %v1232_v53  ;;  %v1249_v27 = vcvt.s32.f32 %v1247_v54  ;;  %v3607_v21 = vsel %vm1030_vm5, 1.0, %v6335_v15 }
 0x336   : > { %4405 = vmatpush3.bf16.msra.mxu1 %v4941_v23  ;;  %4067 = vmatprep.mubr.msk.f32.mxu1 %vm903_vm7, %v3607_v21  ;;  %v1260_v29 = vsel %vm903_vm7, %v5098_v55, 2147483647  ;;  %v5107_v30 = vsel %vm1030_vm5, 2147483647, %v5014_v2  ;;  %v1216_v11 = vand.u32 65535, %v5065_v49  ;;  %v1231_v44 = vand.u32 65535, %v1230_v9 }
 0x337   : > { %1235 = vmin.xlane.f32.xlu1 %v1234_v56  ;;  %4407 = vmatprep.subr.bf16.mxu1 %v4978_v10  ;;  %vm1031_vm6 = vcmp.eq.s32.totalorder %v5023_v12, %v1023_v60  ;;  %v1262_v0 = vshra.s32 %v1260_v29, 16  ;;  %v1275_v63 = vsel %vm903_vm7, %v5107_v30, 2147483647  ;;  %v1246_v32 = vand.u32 65535, %v5089_v4 }
 0x338   : > { %1250 = vmin.xlane.f32.xlu0 %v1249_v27  ;;  %v3608_v19 = vsel %vm1031_vm6, 1.0, %v6335_v15  ;;  %v1277_v40 = vshra.s32 %v1275_v63, 16  ;;  %v5115_v3 = vsel %vm1031_vm6, 2147483647, %v5023_v12  ;;  %v1201_v12 = vand.u32 65535, %v5054_v35 }
 0x339   : > { %4068 = vmatmul.mubr.msk.f32.gmra.mrb[22].mxu1 %vm903_vm7, %v3608_v19  ;;  %v1264_v2 = vcvt.s32.f32 %v1262_v0  ;;  %v1290_v48 = vsel %vm903_vm7, %v5115_v3, 2147483647  ;;  %v1218_v54 = vcvt.s32.f32 %v1216_v11  ;;  %v1261_v60 = vand.u32 65535, %v1260_v29 }
 0x33a   : > { %4409 = vmatpush3.bf16.msra.mxu1 %v4978_v10  ;;  %v1279_v46 = vcvt.s32.f32 %v1277_v40  ;;  %v1292_v16 = vshra.s32 %v1290_v48, 16  ;;  %v1203_v22 = vcvt.s32.f32 %v1201_v12  ;;  %v1248_v21 = vcvt.s32.f32 %v1246_v32 }
 0x33b   : > { %1265 = vmin.xlane.f32.xlu1 %v1264_v2  ;;  %4427 = vmatprep.subr.bf16.mxu1 %v4903_v41  ;;  %v1276_v0 = vand.u32 65535, %v1275_v63  ;;  %v1263_v40 = vcvt.s32.f32 %v1261_v60 }
 0x33c   : > { %1280 = vmin.xlane.f32.xlu0 %v1279_v46  ;;  %v1294_v52 = vcvt.s32.f32 %v1292_v16  ;;  %v1291_v16 = vand.u32 65535, %v1290_v48 }
 0x33e   : > { %v1293_v63 = vcvt.s32.f32 %v1291_v16 }
 0x33f   : > { %1295 = vmin.xlane.f32.xlu1 %v1294_v52 }
 0x3bc   : > { %v1191_v25 = vpop.xlane.xlu0 %1190 }
 0x3bd   : > { %vm1192_vm8 = vcmp.eq.f32.partialorder %v5046_v24, %v1191_v25  ;;  %v1233_v24 = vcvt.s32.f32 %v1231_v44  ;;  %v1197_v44 = vcvt.f32.s32 %v1191_v25 }
 0x3be   : > { %v1193_v61 = vsel %vm1192_vm8, %v1188_v59, inf }
 0x3bf   : > { %1194 = vmin.xlane.f32.xlu0 %v1193_v61  ;;  %v1206_v47 = vpop.xlane.xlu1 %1205 }
 0x3c0   : > { %vm1207_vm9 = vcmp.eq.f32.partialorder %v5072_v14, %v1206_v47 }
 0x3c1   : > { %v1221_v7 = vpop.xlane.xlu0 %1220  ;;  %v1208_v53 = vsel %vm1207_vm9, %v1203_v22, inf }
 0x3c2   : > { %1209 = vmin.xlane.f32.xlu1 %v1208_v53  ;;  %vm1222_vm10 = vcmp.eq.f32.partialorder %v1219_v51, %v1221_v7  ;;  %v1278_v51 = vcvt.s32.f32 %v1276_v0  ;;  %v1227_v32 = vcvt.f32.s32 %v1221_v7 }
 0x3c3   : > { %v1223_v35 = vsel %vm1222_vm10, %v1218_v54, inf  ;;  %v1198_v54 = vshll.u32 %v1197_v44, 16 }
 0x3c4   : > { %1224 = vmin.xlane.f32.xlu0 %v1223_v35  ;;  %v1236_v13 = vpop.xlane.xlu1 %1235 }
 0x3c5   : > { %v1251_v49 = vpop.xlane.xlu0 %1250  ;;  %vm1237_vm11 = vcmp.eq.f32.partialorder %v1234_v56, %v1236_v13 }
 0x3c6   : > { %v1238_v19 = vsel %vm1237_vm11, %v1233_v24, inf  ;;  %vm1252_vm12 = vcmp.eq.f32.partialorder %v1249_v27, %v1251_v49  ;;  %v1242_v24 = vcvt.f32.s32 %v1236_v13  ;;  %v1257_v60 = vcvt.f32.s32 %v1251_v49 }
 0x3c7   : > { %1239 = vmin.xlane.f32.xlu1 %v1238_v19  ;;  %v1253_v14 = vsel %vm1252_vm12, %v1248_v21, inf }
 0x3c8   : > { %1254 = vmin.xlane.f32.xlu0 %v1253_v14  ;;  %v1266_v9 = vpop.xlane.xlu1 %1265  ;;  %v1243_v7 = vshll.u32 %v1242_v24, 16 }
 0x3c9   : > { %v5128_v4 = vpop.xlane.xlu0 %1280  ;;  %vm1267_vm13 = vcmp.eq.f32.partialorder %v1264_v2, %v1266_v9  ;;  %v1272_v16 = vcvt.f32.s32 %v1266_v9 }
 0x3ca   : > { %v1268_v58 = vsel %vm1267_vm13, %v1263_v40, inf  ;;  %vm1282_vm14 = vcmp.eq.f32.partialorder %v1279_v46, %v5128_v4  ;;  %v1228_v40 = vshll.u32 %v1227_v32, 16  ;;  %v1287_v49 = vcvt.f32.s32 %v5128_v4 }
 0x3cb   : > { %1269 = vmin.xlane.f32.xlu1 %v1268_v58  ;;  %v1283_v29 = vsel %vm1282_vm14, %v1278_v51, inf }
 0x3cc   : > { %1284 = vmin.xlane.f32.xlu0 %v1283_v29  ;;  %v5131_v56 = vpop.xlane.xlu1 %1295 }
 0x3cd   : > { %vm1297_vm15 = vcmp.eq.f32.partialorder %v1294_v52, %v5131_v56  ;;  %v1212_v52 = vcvt.f32.s32 %v1206_v47 }
 0x3ce   : > { %v1298_v27 = vsel %vm1297_vm15, %v1293_v63, inf  ;;  %v1258_v63 = vshll.u32 %v1257_v60, 16 }
 0x3cf   : > { %1299 = vmin.xlane.f32.xlu1 %v1298_v27  ;;  %v1213_v19 = vshll.u32 %v1212_v52, 16  ;;  %v1273_v52 = vshll.u32 %v1272_v16, 16 }
 0x400   : > { %v5134_v12 = vpop.f32.mrb[16].mxu1 }
 0x401   : > { %v5136_v48 = vpop.f32.mrb[17].mxu1 }
 0x404   : > { %v5138_v59 = vpop.f32.mrb[18].mxu1 }
 0x405   : > { %v5140_v2 = vpop.f32.mrb[19].mxu1 }
 0x408   : > { %v5142_v11 = vpop.f32.mrb[20].mxu1 }
 0x409   : > { %v5144_v46 = vpop.f32.mrb[21].mxu1 }
 0x40c   : > { %v5146_v61 = vpop.f32.mrb[22].mxu1 }
 0x40d   : > { %v5148_v22 = vpop.f32.mrb[23].mxu1 }
 0x44c   : > { %v1195_v53 = vpop.xlane.xlu0 %1194 }
 0x44d   : > { %v1196_v35 = vcvt.f32.s32 %v1195_v53 }
 0x44f   : > { %v1199_v21 = vadd.s32 %v1198_v54, %v1196_v35  ;;  %v1210_v0 = vpop.xlane.xlu1 %1209 }
 0x450   : > { %v1211_v14 = vcvt.f32.s32 %v1210_v0 }
 0x451   : > { %v1225_v51 = vpop.xlane.xlu0 %1224  ;;  %vm1305_vm1 = vcmp.eq.s32.totalorder %v5034_v33, %v1199_v21 }
 0x452   : > { %v1214_v58 = vadd.s32 %v1213_v19, %v1211_v14  ;;  %v1226_v29 = vcvt.f32.s32 %v1225_v51  ;;  %v3617_v25 = vsel %vm1305_vm1, 1.0, %v6335_v15  ;;  %v5153_v47 = vsel %vm1305_vm1, 2147483647, %v5034_v33 }
 0x453   : > { %4086 = vmatprep.mubr.msk.f32.mxu0 %vm903_vm7, %v3617_v25  ;;  %v5158_v13 = vsel %vm903_vm7, %v5153_v47, 2147483647  ;;  %v1288_v19 = vshll.u32 %v1287_v49, 16  ;;  %v1302_v14 = vcvt.f32.s32 %v5131_v56 }
 0x454   : > { %vm1306_vm2 = vcmp.eq.s32.totalorder %v5049_v6, %v1214_v58  ;;  %v1229_v9 = vadd.s32 %v1228_v40, %v1226_v29  ;;  %v1240_v27 = vpop.xlane.xlu1 %1239  ;;  %v1476_v44 = vshra.s32 %v5158_v13, 16 }
 0x455   : > { %v3618_v33 = vsel %vm1306_vm2, 1.0, %v6335_v15  ;;  %v1241_v53 = vcvt.f32.s32 %v1240_v27  ;;  %v1255_v54 = vpop.xlane.xlu0 %1254  ;;  %v5165_v32 = vsel %vm1306_vm2, 2147483647, %v5049_v6 }
 0x456   : > { %v1256_v35 = vcvt.f32.s32 %v1255_v54  ;;  %4087 = vmatmul.mubr.msk.f32.vlgmr.msra.gmra.mrb[10].mxu0 %vm903_vm7, %v3618_v33  ;;  %v5168_v24 = vcvt.s32.f32 %v1476_v44  ;;  %vm1307_vm3 = vcmp.eq.s32.totalorder %v5057_v39, %v1229_v9  ;;  %v5173_v4 = vsel %vm903_vm7, %v5165_v32, 2147483647 }
 0x457   : > { %v1244_v60 = vadd.s32 %v1243_v7, %v1241_v53  ;;  %4413 = vmatpush3.bf16.msra.mxu0 %v4903_v41  ;;  %v3619_v21 = vsel %vm1307_vm3, 1.0, %v6335_v15  ;;  %v1491_v0 = vshra.s32 %v5173_v4, 16  ;;  %v5179_v6 = vsel %vm1307_vm3, 2147483647, %v5057_v39 }
 0x458   : > { %v1259_v40 = vadd.s32 %v1258_v63, %v1256_v35  ;;  %v1270_v16 = vpop.xlane.xlu1 %1269  ;;  %1479 = vmin.xlane.f32.xlu0 %v5168_v24  ;;  %4089 = vmatprep.mubr.msk.f32.mxu0 %vm903_vm7, %v3619_v21  ;;  %v5186_v51 = vsel %vm903_vm7, %v5179_v6, 2147483647  ;;  %v1303_v54 = vshll.u32 %v1302_v14, 16 }
 0x459   : > { %v1271_v58 = vcvt.f32.s32 %v1270_v16  ;;  %4415 = vmatprep.subr.bf16.mxu0 %v4926_v5  ;;  %v1285_v29 = vpop.xlane.xlu0 %1284  ;;  %vm1308_vm4 = vcmp.eq.s32.totalorder %v5078_v17, %v1244_v60  ;;  %v5190_v39 = vcvt.s32.f32 %v1491_v0  ;;  %v1506_v56 = vshra.s32 %v5186_v51, 16 }
 0x45a   : > { %v1286_v25 = vcvt.f32.s32 %v1285_v29  ;;  %v3620_v7 = vsel %vm1308_vm4, 1.0, %v6335_v15  ;;  %vm1309_vm5 = vcmp.eq.s32.totalorder %v5081_v50, %v1259_v40  ;;  %v5196_v63 = vsel %vm1308_vm4, 2147483647, %v5078_v17 }
 0x45b   : > { %v1274_v49 = vadd.s32 %v1273_v52, %v1271_v58  ;;  %4090 = vmatmul.mubr.msk.f32.gmra.mrb[12].mxu0 %vm903_vm7, %v3620_v7  ;;  %1494 = vmin.xlane.f32.xlu1 %v5190_v39  ;;  %v5200_v9 = vcvt.s32.f32 %v1506_v56  ;;  %v3621_v27 = vsel %vm1309_vm5, 1.0, %v6335_v15  ;;  %v5205_v44 = vsel %vm903_vm7, %v5196_v63, 2147483647 }
 0x45c   : > { %v1289_v33 = vadd.s32 %v1288_v19, %v1286_v25  ;;  %4417 = vmatpush3.bf16.msra.mxu0 %v4926_v5  ;;  %v1300_v53 = vpop.xlane.xlu1 %1299  ;;  %4092 = vmatprep.mubr.msk.f32.mxu0 %vm903_vm7, %v3621_v27  ;;  %v1521_v17 = vshra.s32 %v5205_v44, 16  ;;  %v5211_v52 = vsel %vm1309_vm5, 2147483647, %v5081_v50 }
 0x45d   : > { %v1301_v35 = vcvt.f32.s32 %v1300_v53  ;;  %4419 = vmatprep.subr.bf16.mxu0 %v4941_v23  ;;  %1509 = vmin.xlane.f32.xlu0 %v5200_v9  ;;  %vm1310_vm6 = vcmp.eq.s32.totalorder %v5098_v55, %v1274_v49  ;;  %v1534_v60 = vsel %vm903_vm7, %v5211_v52, 2147483647 }
 0x45e   : > { %v3622_v21 = vsel %vm1310_vm6, 1.0, %v6335_v15  ;;  %v1523_v0 = vcvt.s32.f32 %v1521_v17  ;;  %v1536_v19 = vshra.s32 %v1534_v60, 16  ;;  %vm1311_vm8 = vcmp.eq.s32.totalorder %v5107_v30, %v1289_v33 }
 0x45f   : > { %v1304_v40 = vadd.s32 %v1303_v54, %v1301_v35  ;;  %4093 = vmatmul.mubr.msk.f32.gmra.mrb[14].mxu0 %vm903_vm7, %v3622_v21  ;;  %v3623_v50 = vsel %vm1311_vm8, 1.0, %v6335_v15  ;;  %v5223_v14 = vsel %vm1310_vm6, 2147483647, %v5098_v55  ;;  %v5226_v16 = vsel %vm1311_vm8, 2147483647, %v5107_v30 }
 0x460   : > { %4421 = vmatpush3.bf16.msra.mxu0 %v4941_v23  ;;  %1524 = vmin.xlane.f32.xlu1 %v1523_v0  ;;  %v1538_v58 = vcvt.s32.f32 %v1536_v19  ;;  %v1549_v29 = vsel %vm903_vm7, %v5223_v14, 2147483647  ;;  %v1564_v56 = vsel %vm903_vm7, %v5226_v16, 2147483647  ;;  %v1475_v54 = vand.u32 65535, %v5158_v13 }
 0x461   : > { %4423 = vmatprep.subr.bf16.mxu0 %v4978_v10  ;;  %4095 = vmatprep.mubr.msk.f32.mxu0 %vm903_vm7, %v3623_v50  ;;  %vm1312_vm9 = vcmp.eq.s32.totalorder %v5115_v3, %v1304_v40  ;;  %v1551_v55 = vshra.s32 %v1549_v29, 16  ;;  %v1566_v25 = vshra.s32 %v1564_v56, 16  ;;  %v1505_v19 = vand.u32 65535, %v5186_v51 }
 0x462   : > { %1539 = vmin.xlane.f32.xlu0 %v1538_v58  ;;  %v3624_v30 = vsel %vm1312_vm9, 1.0, %v6335_v15  ;;  %v5238_v7 = vsel %vm1312_vm9, 2147483647, %v5115_v3  ;;  %v1490_v3 = vand.u32 65535, %v5173_v4  ;;  %v1477_v21 = vcvt.s32.f32 %v1475_v54 }
 0x463   : > { %4096 = vmatmul.mubr.msk.f32.gmra.mrb[16].mxu0 %vm903_vm7, %v3624_v30  ;;  %v1553_v49 = vcvt.s32.f32 %v1551_v55  ;;  %v1568_v27 = vcvt.s32.f32 %v1566_v25  ;;  %v1579_v33 = vsel %vm903_vm7, %v5238_v7, 2147483647  ;;  %v1520_v13 = vand.u32 65535, %v5205_v44 }
 0x464   : > { %4425 = vmatpush3.bf16.msra.mxu0 %v4978_v10  ;;  %v1581_v53 = vshra.s32 %v1579_v33, 16  ;;  %v1492_v55 = vcvt.s32.f32 %v1490_v3  ;;  %v1507_v30 = vcvt.s32.f32 %v1505_v19  ;;  %v1550_v3 = vand.u32 65535, %v1549_v29 }
 0x465   : > { %1554 = vmin.xlane.f32.xlu1 %v1553_v49  ;;  %4443 = vmatprep.subr.bf16.mxu0 %v4903_v41  ;;  %v1522_v54 = vcvt.s32.f32 %v1520_v13 }
 0x466   : > { %1569 = vmin.xlane.f32.xlu0 %v1568_v27  ;;  %v1583_v17 = vcvt.s32.f32 %v1581_v53 }
 0x469   : > { %1584 = vmin.xlane.f32.xlu1 %v1583_v17 }
 0x4e5   : > { %v5247_v35 = vpop.xlane.xlu0 %1479 }
 0x4e6   : > { %vm1481_vm10 = vcmp.eq.f32.partialorder %v5168_v24, %v5247_v35  ;;  %v1535_v24 = vand.u32 65535, %v1534_v60  ;;  %v1552_v60 = vcvt.s32.f32 %v1550_v3 }
 0x4e7   : > { %v1482_v40 = vsel %vm1481_vm10, %v1477_v21, inf }
 0x4e8   : > { %1483 = vmin.xlane.f32.xlu0 %v1482_v40  ;;  %v5252_v50 = vpop.xlane.xlu1 %1494  ;;  %v1537_v21 = vcvt.s32.f32 %v1535_v24  ;;  %v1565_v40 = vand.u32 65535, %v1564_v56 }
 0x4e9   : > { %vm1496_vm11 = vcmp.eq.f32.partialorder %v5190_v39, %v5252_v50 }
 0x4ea   : > { %v5257_v25 = vpop.xlane.xlu0 %1509  ;;  %v1497_v4 = vsel %vm1496_vm11, %v1492_v55, inf  ;;  %v1580_v55 = vand.u32 65535, %v1579_v33 }
 0x4eb   : > { %1498 = vmin.xlane.f32.xlu1 %v1497_v4  ;;  %vm1511_vm12 = vcmp.eq.f32.partialorder %v5200_v9, %v5257_v25 }
 0x4ec   : > { %v1512_v51 = vsel %vm1511_vm12, %v1507_v30, inf }
 0x4ed   : > { %1513 = vmin.xlane.f32.xlu0 %v1512_v51  ;;  %v5261_v53 = vpop.xlane.xlu1 %1524 }
 0x4ee   : > { %vm1526_vm13 = vcmp.eq.f32.partialorder %v1523_v0, %v5261_v53  ;;  %v1567_v0 = vcvt.s32.f32 %v1565_v40 }
 0x4ef   : > { %v5264_v39 = vpop.xlane.xlu0 %1539  ;;  %v1527_v44 = vsel %vm1526_vm13, %v1522_v54, inf }
 0x4f0   : > { %1528 = vmin.xlane.f32.xlu1 %v1527_v44  ;;  %vm1541_vm14 = vcmp.eq.f32.partialorder %v1538_v58, %v5264_v39  ;;  %v1582_v58 = vcvt.s32.f32 %v1580_v55  ;;  %v1546_v38 = vcvt.f32.s32 %v5264_v39 }
 0x4f1   : > { %v1542_v19 = vsel %vm1541_vm14, %v1537_v21, inf }
 0x4f2   : > { %1543 = vmin.xlane.f32.xlu0 %v1542_v19  ;;  %v5267_v9 = vpop.xlane.xlu1 %1554  ;;  %v1531_v19 = vcvt.f32.s32 %v5261_v53 }
 0x4f3   : > { %v5269_v4 = vpop.xlane.xlu0 %1569  ;;  %vm1556_vm15 = vcmp.eq.f32.partialorder %v1553_v49, %v5267_v9 }
 0x4f4   : > { %v1557_v29 = vsel %vm1556_vm15, %v1552_v60, inf  ;;  %vm1571_vm1 = vcmp.eq.f32.partialorder %v1568_v27, %v5269_v4 }
 0x4f5   : > { %1558 = vmin.xlane.f32.xlu1 %v1557_v29  ;;  %v1572_v13 = vsel %vm1571_vm1, %v1567_v0, inf }
 0x4f6   : > { %1573 = vmin.xlane.f32.xlu0 %v1572_v13  ;;  %v5273_v56 = vpop.xlane.xlu1 %1584  ;;  %v1486_v13 = vcvt.f32.s32 %v5247_v35 }
 0x4f7   : > { %vm1586_vm2 = vcmp.eq.f32.partialorder %v1583_v17, %v5273_v56  ;;  %v1516_v17 = vcvt.f32.s32 %v5257_v25  ;;  %v1532_v25 = vshll.u32 %v1531_v19, 16 }
 0x4f8   : > { %v1587_v30 = vsel %vm1586_vm2, %v1582_v58, inf  ;;  %v1501_v58 = vcvt.f32.s32 %v5252_v50  ;;  %v1487_v21 = vshll.u32 %v1486_v13, 16  ;;  %v6355_v50 = vmov 0.0  }
 0x4f9   : > { %1588 = vmin.xlane.f32.xlu1 %v1587_v30  ;;  %v1517_v45 = vshll.u32 %v1516_v17, 16 }
 0x4fa   : > { %v1502_v15 = vshll.u32 %v1501_v58, 16 }
 0x529   : > { %v5276_v24 = vpop.f32.mrb[10].mxu0 }
 0x52a   : > { %v5280_v49 = vpop.f32.mrb[11].mxu0 }
 0x52e   : > { %v5284_v51 = vpop.f32.mrb[12].mxu0 }
 0x52f   : > { %v5288_v3 = vpop.f32.mrb[13].mxu0 }
 0x532   : > { %v5292_v44 = vpop.f32.mrb[14].mxu0 }
 0x533   : > { %v5296_v40 = vpop.f32.mrb[15].mxu0 }
 0x536   : > { %v5300_v60 = vpop.f32.mrb[16].mxu0 }
 0x537   : > { %v5304_v0 = vpop.f32.mrb[17].mxu0 }
 0x575   : > { %v1484_v30 = vpop.xlane.xlu0 %1483 }
 0x576   : > { %v1485_v54 = vcvt.f32.s32 %v1484_v30 }
 0x578   : > { %v1488_v27 = vadd.s32 %v1487_v21, %v1485_v54  ;;  %v1499_v33 = vpop.xlane.xlu1 %1498 }
 0x579   : > { %v1500_v55 = vcvt.f32.s32 %v1499_v33  ;;  %v1561_v33 = vcvt.f32.s32 %v5267_v9 }
 0x57a   : > { %v1514_v1 = vpop.xlane.xlu0 %1513  ;;  %vm1594_vm3 = vcmp.eq.s32.totalorder %v5153_v47, %v1488_v27 }
 0x57b   : > { %v1503_v35 = vadd.s32 %v1502_v15, %v1500_v55  ;;  %v1515_v29 = vcvt.f32.s32 %v1514_v1  ;;  %v3633_v8 = vsel %vm1594_vm3, 1.0, %v6355_v50  ;;  %v5316_v13 = vsel %vm1594_vm3, 2147483647, %v5153_v47 }
 0x57c   : > { %4114 = vmatprep.mubr.msk.f32.mxu1 %vm903_vm7, %v3633_v8  ;;  %v5321_v53 = vsel %vm903_vm7, %v5316_v13, 2147483647  ;;  %v1547_v1 = vshll.u32 %v1546_v38, 16  ;;  %v1576_v8 = vcvt.f32.s32 %v5269_v4  ;;  %v1562_v4 = vshll.u32 %v1561_v33, 16 }
 0x57d   : > { %vm1595_vm4 = vcmp.eq.s32.totalorder %v5165_v32, %v1503_v35  ;;  %v1518_v39 = vadd.s32 %v1517_v45, %v1515_v29  ;;  %v1529_v27 = vpop.xlane.xlu1 %1528  ;;  %v1765_v15 = vshra.s32 %v5321_v53, 16  ;;  %v1591_v29 = vcvt.f32.s32 %v5273_v56 }
 0x57e   : > { %v3634_v54 = vsel %vm1595_vm4, 1.0, %v6355_v50  ;;  %v1530_v47 = vcvt.f32.s32 %v1529_v27  ;;  %v5328_v17 = vsel %vm1595_vm4, 2147483647, %v5165_v32 }
 0x57f   : > { %v1544_v21 = vpop.xlane.xlu0 %1543  ;;  %4115 = vmatmul.mubr.msk.f32.vlgmr.msra.gmra.mrb[24].mxu1 %vm903_vm7, %v3634_v54  ;;  %v5332_v19 = vcvt.s32.f32 %v1765_v15  ;;  %vm1596_vm5 = vcmp.eq.s32.totalorder %v5179_v6, %v1518_v39  ;;  %v5337_v45 = vsel %vm903_vm7, %v5328_v17, 2147483647 }
 0x580   : > { %v1533_v38 = vadd.s32 %v1532_v25, %v1530_v47  ;;  %v1545_v9 = vcvt.f32.s32 %v1544_v21  ;;  %4429 = vmatpush3.bf16.msra.mxu1 %v4903_v41  ;;  %v3635_v32 = vsel %vm1596_vm5, 1.0, %v6355_v50  ;;  %v1780_v55 = vshra.s32 %v5337_v45, 16 }
 0x581   : > { %1768 = vmin.xlane.f32.xlu0 %v5332_v19  ;;  %4117 = vmatprep.mubr.msk.f32.mxu1 %vm903_vm7, %v3635_v32  ;;  %v5346_v58 = vsel %vm1596_vm5, 2147483647, %v5179_v6 }
 0x582   : > { %v1548_v30 = vadd.s32 %v1547_v1, %v1545_v9  ;;  %v1559_v35 = vpop.xlane.xlu1 %1558  ;;  %4431 = vmatprep.subr.bf16.mxu1 %v4926_v5  ;;  %vm1597_vm6 = vcmp.eq.s32.totalorder %v5196_v63, %v1533_v38  ;;  %v5350_v25 = vcvt.s32.f32 %v1780_v55  ;;  %v5354_v33 = vsel %vm903_vm7, %v5346_v58, 2147483647 }
 0x583   : > { %v1560_v56 = vcvt.f32.s32 %v1559_v35  ;;  %v1574_v39 = vpop.xlane.xlu0 %1573  ;;  %v3636_v27 = vsel %vm1597_vm6, 1.0, %v6355_v50  ;;  %v1795_v15 = vshra.s32 %v5354_v33, 16  ;;  %v5359_v6 = vsel %vm1597_vm6, 2147483647, %v5196_v63 }
 0x584   : > { %v1577_v1 = vshll.u32 %v1576_v8, 16  ;;  %v1575_v54 = vcvt.f32.s32 %v1574_v39  ;;  %4118 = vmatmul.mubr.msk.f32.gmra.mrb[26].mxu1 %vm903_vm7, %v3636_v27  ;;  %1783 = vmin.xlane.f32.xlu1 %v5350_v25  ;;  %vm1598_vm8 = vcmp.eq.s32.totalorder %v5211_v52, %v1548_v30  ;;  %v5366_v47 = vsel %vm903_vm7, %v5359_v6, 2147483647 }
 0x585   : > { %v1563_v21 = vadd.s32 %v1562_v4, %v1560_v56  ;;  %4433 = vmatpush3.bf16.msra.mxu1 %v4926_v5  ;;  %v5369_v38 = vcvt.s32.f32 %v1795_v15  ;;  %v3637_v63 = vsel %vm1598_vm8, 1.0, %v6355_v50  ;;  %v1810_v8 = vshra.s32 %v5366_v47, 16 }
 0x586   : > { %v1592_v9 = vshll.u32 %v1591_v29, 16  ;;  %v1578_v32 = vadd.s32 %v1577_v1, %v1575_v54  ;;  %v1589_v55 = vpop.xlane.xlu1 %1588  ;;  %4435 = vmatprep.subr.bf16.mxu1 %v4941_v23  ;;  %4120 = vmatprep.mubr.msk.f32.mxu1 %vm903_vm7, %v3637_v63  ;;  %v5376_v30 = vsel %vm1598_vm8, 2147483647, %v5211_v52 }
 0x587   : > { %v1590_v35 = vcvt.f32.s32 %v1589_v55  ;;  %1798 = vmin.xlane.f32.xlu0 %v5369_v38  ;;  %vm1599_vm9 = vcmp.eq.s32.totalorder %v5223_v14, %v1563_v21  ;;  %v1812_v4 = vcvt.s32.f32 %v1810_v8  ;;  %v1823_v56 = vsel %vm903_vm7, %v5376_v30, 2147483647 }
 0x588   : > { %v3638_v29 = vsel %vm1599_vm9, 1.0, %v6355_v50  ;;  %v1825_v39 = vshra.s32 %v1823_v56, 16  ;;  %vm1600_vm10 = vcmp.eq.s32.totalorder %v5226_v16, %v1578_v32  ;;  %v5385_v27 = vsel %vm1599_vm9, 2147483647, %v5223_v14 }
 0x589   : > { %v1593_v15 = vadd.s32 %v1592_v9, %v1590_v35  ;;  %4121 = vmatmul.mubr.msk.f32.gmra.mrb[28].mxu1 %vm903_vm7, %v3638_v29  ;;  %1813 = vmin.xlane.f32.xlu1 %v1812_v4  ;;  %v3639_v52 = vsel %vm1600_vm10, 1.0, %v6355_v50  ;;  %v1838_v1 = vsel %vm903_vm7, %v5385_v27, 2147483647  ;;  %v5392_v54 = vsel %vm1600_vm10, 2147483647, %v5226_v16 }
 0x58a   : > { %4437 = vmatpush3.bf16.msra.mxu1 %v4941_v23  ;;  %v1827_v21 = vcvt.s32.f32 %v1825_v39  ;;  %4123 = vmatprep.mubr.msk.f32.mxu1 %vm903_vm7, %v3639_v52  ;;  %v1840_v63 = vshra.s32 %v1838_v1, 16  ;;  %v1853_v14 = vsel %vm903_vm7, %v5392_v54, 2147483647 }
 0x58b   : > { %4439 = vmatprep.subr.bf16.mxu1 %v4978_v10  ;;  %vm1601_vm11 = vcmp.eq.s32.totalorder %v5238_v7, %v1593_v15  ;;  %v1855_v8 = vshra.s32 %v1853_v14, 16  ;;  %v1764_v15 = vand.u32 65535, %v5321_v53  ;;  %v1809_v53 = vand.u32 65535, %v5366_v47 }
 0x58c   : > { %1828 = vmin.xlane.f32.xlu0 %v1827_v21  ;;  %v3640_v9 = vsel %vm1601_vm11, 1.0, %v6355_v50  ;;  %v1842_v32 = vcvt.s32.f32 %v1840_v63  ;;  %v5402_v16 = vsel %vm1601_vm11, 2147483647, %v5238_v7  ;;  %v1779_v7 = vand.u32 65535, %v5337_v45 }
 0x58d   : > { %4124 = vmatmul.mubr.msk.f32.gmra.mrb[30].mxu1 %vm903_vm7, %v3640_v9  ;;  %v1857_v55 = vcvt.s32.f32 %v1855_v8  ;;  %v1868_v35 = vsel %vm903_vm7, %v5402_v16, 2147483647  ;;  %v1766_v63 = vcvt.s32.f32 %v1764_v15  ;;  %v1794_v9 = vand.u32 65535, %v5354_v33 }
 0x58e   : > { %4441 = vmatpush3.bf16.msra.mxu1 %v4978_v10  ;;  %1843 = vmin.xlane.f32.xlu1 %v1842_v32  ;;  %v1870_v29 = vshra.s32 %v1868_v35, 16  ;;  %v1781_v57 = vcvt.s32.f32 %v1779_v7  ;;  %v1839_v7 = vand.u32 65535, %v1838_v1  ;;  %v1854_v47 = vand.u32 65535, %v1853_v14 }
 0x58f   : > { %4459 = vmatprep.subr.bf16.mxu1 %v4903_v41  ;;  %v1796_v15 = vcvt.s32.f32 %v1794_v9 }
 0x590   : > { %1858 = vmin.xlane.f32.xlu0 %v1857_v55  ;;  %v1872_v39 = vcvt.s32.f32 %v1870_v29  ;;  %v1856_v1 = vcvt.s32.f32 %v1854_v47 }
 0x592   : > { %1873 = vmin.xlane.f32.xlu1 %v1872_v39 }
 0x60e   : > { %v5411_v52 = vpop.xlane.xlu0 %1768 }
 0x60f   : > { %vm1770_vm12 = vcmp.eq.f32.partialorder %v5332_v19, %v5411_v52  ;;  %v1824_v19 = vand.u32 65535, %v1823_v56  ;;  %v1869_v56 = vand.u32 65535, %v1868_v35 }
 0x610   : > { %v1771_v8 = vsel %vm1770_vm12, %v1766_v63, inf }
 0x611   : > { %1772 = vmin.xlane.f32.xlu0 %v1771_v8  ;;  %v5416_v62 = vpop.xlane.xlu1 %1783  ;;  %v1811_v8 = vcvt.s32.f32 %v1809_v53  ;;  %v1871_v14 = vcvt.s32.f32 %v1869_v56 }
 0x612   : > { %vm1785_vm13 = vcmp.eq.f32.partialorder %v5350_v25, %v5416_v62 }
 0x613   : > { %v1786_v29 = vsel %vm1785_vm13, %v1781_v57, inf  ;;  %v1826_v57 = vcvt.s32.f32 %v1824_v19 }
 0x614   : > { %v5421_v45 = vpop.xlane.xlu0 %1798  ;;  %1787 = vmin.xlane.f32.xlu1 %v1786_v29 }
 0x615   : > { %vm1800_vm14 = vcmp.eq.f32.partialorder %v5369_v38, %v5421_v45  ;;  %v1841_v38 = vcvt.s32.f32 %v1839_v7  ;;  %v6357_v7 = vmax.f32 %v5136_v48, %v5280_v49  ;;  %v6361_v49 = vmax.f32 %v5144_v46, %v5296_v40 }
 0x616   : > { %v1801_v63 = vsel %vm1800_vm14, %v1796_v15, inf  ;;  %v5425_v33 = vpop.xlane.xlu1 %1813 }
 0x617   : > { %1802 = vmin.xlane.f32.xlu0 %v1801_v63  ;;  %vm1815_vm15 = vcmp.eq.f32.partialorder %v1812_v4, %v5425_v33 }
 0x618   : > { %v1816_v25 = vsel %vm1815_vm15, %v1811_v8, inf }
 0x619   : > { %v5428_v37 = vpop.xlane.xlu0 %1828  ;;  %1817 = vmin.xlane.f32.xlu1 %v1816_v25 }
 0x61a   : > { %vm1830_vm1 = vcmp.eq.f32.partialorder %v1827_v21, %v5428_v37 }
 0x61b   : > { %v1831_v9 = vsel %vm1830_vm1, %v1826_v57, inf  ;;  %v5431_v29 = vpop.xlane.xlu1 %1843  ;;  %v6358_v57 = vmax.f32 %v5138_v59, %v5284_v51  ;;  %v6362_v51 = vmax.f32 %v5146_v61, %v5300_v60  ;;  %v1820_v60 = vcvt.f32.s32 %v5425_v33 }
 0x61c   : > { %1832 = vmin.xlane.f32.xlu0 %v1831_v9  ;;  %vm1845_vm2 = vcmp.eq.f32.partialorder %v1842_v32, %v5431_v29  ;;  %v6356_v32 = vmax.f32 %v5134_v12, %v5276_v24  ;;  %v6359_v9 = vmax.f32 %v5140_v2, %v5288_v3  ;;  %v6360_v24 = vmax.f32 %v5142_v11, %v5292_v44 }
 0x61d   : > { %v5434_v53 = vpop.xlane.xlu0 %1858  ;;  %v1846_v4 = vsel %vm1845_vm2, %v1841_v38, inf  ;;  %v6363_v3 = vmax.f32 %v5148_v22, %v5304_v0  ;;  %v1775_v11 = vcvt.f32.s32 %v5411_v52  ;;  %v1790_v44 = vcvt.f32.s32 %v5416_v62 }
 0x61e   : > { %1847 = vmin.xlane.f32.xlu1 %v1846_v4  ;;  %vm1860_vm3 = vcmp.eq.f32.partialorder %v1857_v55, %v5434_v53  ;;  %v1835_v22 = vcvt.f32.s32 %v5428_v37  ;;  %v1821_v33 = vshll.u32 %v1820_v60, 16 }
 0x61f   : > { %v1861_v15 = vsel %vm1860_vm3, %v1856_v1, inf  ;;  %v5437_v19 = vpop.xlane.xlu1 %1873  ;;  %v1776_v46 = vshll.u32 %v1775_v11, 16  ;;  %v1791_v61 = vshll.u32 %v1790_v44, 16 }
 0x620   : > { %1862 = vmin.xlane.f32.xlu0 %v1861_v15  ;;  %vm1875_vm4 = vcmp.eq.f32.partialorder %v1872_v39, %v5437_v19 }
 0x621   : > { %v1876_v21 = vsel %vm1875_vm4, %v1871_v14, inf }
 0x622   : > { %1877 = vmin.xlane.f32.xlu1 %v1876_v21  ;;  %v1805_v21 = vcvt.f32.s32 %v5421_v45 }
 0x652   : > { %v4116_v35 = vpop.f32.mrb[24].mxu1 }
 0x653   : > { %v5443_v63 = vmax.f32 %v6356_v32, %v4116_v35  ;;  %v1708_v8 = vpop.f32.mrb[25].mxu1 }
 0x654   : > { %v5448_v55 = vmax.f32 %v6357_v7, %v1708_v8 }
 0x657   : > { %v4119_v25 = vpop.f32.mrb[26].mxu1 }
 0x658   : > { %v5453_v47 = vmax.f32 %v6358_v57, %v4119_v25  ;;  %v1718_v39 = vpop.f32.mrb[27].mxu1  ;;  %v1806_v25 = vshll.u32 %v1805_v21, 16 }
 0x659   : > { %v5458_v38 = vmax.f32 %v6359_v9, %v1718_v39  ;;  %v1850_v39 = vcvt.f32.s32 %v5431_v29 }
 0x65b   : > { %v1851_v11 = vshll.u32 %v1850_v39, 16 }
 0x65c   : > { %v4122_v12 = vpop.f32.mrb[28].mxu1 }
 0x65d   : > { %v5463_v56 = vmax.f32 %v6360_v24, %v4122_v12  ;;  %v1728_v48 = vpop.f32.mrb[29].mxu1 }
 0x65e   : > { %v5468_v4 = vmax.f32 %v6361_v49, %v1728_v48  ;;  %v1836_v49 = vshll.u32 %v1835_v22, 16 }
 0x660   : > { %v4125_v59 = vpop.f32.mrb[30].mxu1 }
 0x661   : > { %v5473_v1 = vmax.f32 %v6362_v51, %v4125_v59  ;;  %v1738_v2 = vpop.f32.mrb[31].mxu1  ;;  %v1865_v51 = vcvt.f32.s32 %v5434_v53  ;;  %v1880_v53 = vcvt.f32.s32 %v5437_v19 }
 0x662   : > { %v5478_v15 = vmax.f32 %v6363_v3, %v1738_v2 }
 0x69e   : > { %v1773_v14 = vpop.xlane.xlu0 %1772 }
 0x69f   : > { %v1774_v40 = vcvt.f32.s32 %v1773_v14 }
 0x6a1   : > { %v1777_v35 = vadd.s32 %v1776_v46, %v1774_v40  ;;  %v1788_v32 = vpop.xlane.xlu1 %1787 }
 0x6a2   : > { %v1789_v8 = vcvt.f32.s32 %v1788_v32 }
 0x6a3   : > { %vm1883_vm5 = vcmp.eq.s32.totalorder %v5316_v13, %v1777_v35 }
 0x6a4   : > { %v1792_v0 = vadd.s32 %v1791_v61, %v1789_v8  ;;  %v1803_v7 = vpop.xlane.xlu0 %1802  ;;  %v3649_v52 = vsel %vm1883_vm5, 1.0, %v6355_v50  ;;  %v5488_v62 = vsel %vm1883_vm5, 2147483647, %v5316_v13  ;;  %v1866_v8 = vshll.u32 %v1865_v51, 16 }
 0x6a5   : > { %v1804_v57 = vcvt.f32.s32 %v1803_v7  ;;  %4142 = vmatprep.mubr.msk.f32.mxu0 %vm903_vm7, %v3649_v52  ;;  %v5493_v45 = vsel %vm903_vm7, %v5488_v62, 2147483647 }
 0x6a6   : > { %vm1884_vm6 = vcmp.eq.s32.totalorder %v5328_v17, %v1792_v0  ;;  %v1818_v37 = vpop.xlane.xlu1 %1817  ;;  %v2054_v9 = vshra.s32 %v5493_v45, 16 }
 0x6a7   : > { %v3650_v12 = vsel %vm1884_vm6, 1.0, %v6355_v50  ;;  %v1807_v13 = vadd.s32 %v1806_v25, %v1804_v57  ;;  %v1819_v24 = vcvt.f32.s32 %v1818_v37  ;;  %v5500_v48 = vsel %vm1884_vm6, 2147483647, %v5328_v17 }
 0x6a8   : > { %4143 = vmatmul.mubr.msk.f32.vlgmr.msra.gmra.mrb[18].mxu0 %vm903_vm7, %v3650_v12  ;;  %v5503_v59 = vcvt.s32.f32 %v2054_v9  ;;  %v5507_v29 = vsel %vm903_vm7, %v5500_v48, 2147483647  ;;  %v1881_v25 = vshll.u32 %v1880_v53, 16 }
 0x6a9   : > { %v1822_v2 = vadd.s32 %v1821_v33, %v1819_v24  ;;  %v1833_v3 = vpop.xlane.xlu0 %1832  ;;  %4445 = vmatpush3.bf16.msra.mxu0 %v4903_v41  ;;  %vm1885_vm8 = vcmp.eq.s32.totalorder %v5346_v58, %v1807_v13  ;;  %v2069_v17 = vshra.s32 %v5507_v29, 16 }
 0x6aa   : > { %v1834_v44 = vcvt.f32.s32 %v1833_v3  ;;  %2057 = vmin.xlane.f32.xlu0 %v5503_v59  ;;  %v3651_v14 = vsel %vm1885_vm8, 1.0, %v6355_v50  ;;  %4447 = vmatprep.subr.bf16.mxu0 %v4926_v5  ;;  %v5517_v46 = vsel %vm1885_vm8, 2147483647, %v5346_v58 }
 0x6ab   : > { %v1848_v40 = vpop.xlane.xlu1 %1847  ;;  %4145 = vmatprep.mubr.msk.f32.mxu0 %vm903_vm7, %v3651_v14  ;;  %vm1886_vm9 = vcmp.eq.s32.totalorder %v5359_v6, %v1822_v2  ;;  %v5522_v21 = vcvt.s32.f32 %v2069_v17  ;;  %v5526_v35 = vsel %vm903_vm7, %v5517_v46, 2147483647 }
 0x6ac   : > { %v1837_v32 = vadd.s32 %v1836_v49, %v1834_v44  ;;  %v1849_v61 = vcvt.f32.s32 %v1848_v40  ;;  %v3652_v60 = vsel %vm1886_vm9, 1.0, %v6355_v50  ;;  %v2084_v58 = vshra.s32 %v5526_v35, 16 }
 0x6ad   : > { %v1863_v22 = vpop.xlane.xlu0 %1862  ;;  %4146 = vmatmul.mubr.msk.f32.gmra.mrb[20].mxu0 %vm903_vm7, %v3652_v60  ;;  %2072 = vmin.xlane.f32.xlu1 %v5522_v21  ;;  %v5533_v19 = vsel %vm1886_vm9, 2147483647, %v5359_v6 }
 0x6ae   : > { %v1852_v0 = vadd.s32 %v1851_v11, %v1849_v61  ;;  %v1864_v7 = vcvt.f32.s32 %v1863_v22  ;;  %4449 = vmatpush3.bf16.msra.mxu0 %v4926_v5  ;;  %v5536_v52 = vcvt.s32.f32 %v2084_v58  ;;  %vm1887_vm10 = vcmp.eq.s32.totalorder %v5376_v30, %v1837_v32 }
 0x6af   : > { %v1878_v57 = vpop.xlane.xlu1 %1877  ;;  %4451 = vmatprep.subr.bf16.mxu0 %v4941_v23  ;;  %v3653_v33 = vsel %vm1887_vm10, 1.0, %v6355_v50  ;;  %v5543_v39 = vsel %vm903_vm7, %v5533_v19, 2147483647  ;;  %v5546_v6 = vsel %vm1887_vm10, 2147483647, %v5376_v30  ;;  %v2068_v22 = vand.u32 65535, %v5507_v29 }
 0x6b0   : > { %v1867_v37 = vadd.s32 %v1866_v8, %v1864_v7  ;;  %v1879_v9 = vcvt.f32.s32 %v1878_v57  ;;  %2087 = vmin.xlane.f32.xlu0 %v5536_v52  ;;  %4148 = vmatprep.mubr.msk.f32.mxu0 %vm903_vm7, %v3653_v33  ;;  %vm1888_vm11 = vcmp.eq.s32.totalorder %v5385_v27, %v1852_v0  ;;  %v2099_v12 = vshra.s32 %v5543_v39, 16 }
 0x6b1   : > { %v3654_v13 = vsel %vm1888_vm11, 1.0, %v6355_v50  ;;  %v2112_v24 = vsel %vm903_vm7, %v5546_v6, 2147483647  ;;  %v5556_v49 = vsel %vm1888_vm11, 2147483647, %v5385_v27  ;;  %v2083_v57 = vand.u32 65535, %v5526_v35 }
 0x6b2   : > { %v1882_v30 = vadd.s32 %v1881_v25, %v1879_v9  ;;  %4149 = vmatmul.mubr.msk.f32.gmra.mrb[22].mxu0 %vm903_vm7, %v3654_v13  ;;  %v2101_v51 = vcvt.s32.f32 %v2099_v12  ;;  %v2114_v2 = vshra.s32 %v2112_v24, 16  ;;  %vm1889_vm12 = vcmp.eq.s32.totalorder %v5392_v54, %v1867_v37 }
 0x6b3   : > { %4453 = vmatpush3.bf16.msra.mxu0 %v4941_v23  ;;  %v3655_v3 = vsel %vm1889_vm12, 1.0, %v6355_v50  ;;  %v2127_v17 = vsel %vm903_vm7, %v5556_v49, 2147483647  ;;  %v5565_v11 = vsel %vm1889_vm12, 2147483647, %v5392_v54  ;;  %v2070_v37 = vcvt.s32.f32 %v2068_v22 }
 0x6b4   : > { %2102 = vmin.xlane.f32.xlu1 %v2101_v51  ;;  %4455 = vmatprep.subr.bf16.mxu0 %v4978_v10  ;;  %v2116_v27 = vcvt.s32.f32 %v2114_v2  ;;  %vm1890_vm13 = vcmp.eq.s32.totalorder %v5402_v16, %v1882_v30  ;;  %v2129_v44 = vshra.s32 %v2127_v17, 16  ;;  %v2142_v14 = vsel %vm903_vm7, %v5565_v11, 2147483647 }
 0x6b5   : > { %4151 = vmatprep.mubr.msk.f32.mxu0 %vm903_vm7, %v3655_v3  ;;  %v3656_v53 = vsel %vm1890_vm13, 1.0, %v6355_v50  ;;  %v2144_v40 = vshra.s32 %v2142_v14, 16  ;;  %v5574_v32 = vsel %vm1890_vm13, 2147483647, %v5402_v16  ;;  %v2053_v16 = vand.u32 65535, %v5493_v45 }
 0x6b6   : > { %2117 = vmin.xlane.f32.xlu0 %v2116_v27  ;;  %4152 = vmatmul.mubr.msk.f32.gmra.mrb[24].mxu0 %vm903_vm7, %v3656_v53  ;;  %v2131_v54 = vcvt.s32.f32 %v2129_v44  ;;  %v2157_v61 = vsel %vm903_vm7, %v5574_v32, 2147483647  ;;  %v2085_v29 = vcvt.s32.f32 %v2083_v57  ;;  %v2098_v12 = vand.u32 65535, %v5543_v39 }
 0x6b7   : > { %4457 = vmatpush3.bf16.msra.mxu0 %v4978_v10  ;;  %v2146_v60 = vcvt.s32.f32 %v2144_v40  ;;  %v2159_v58 = vshra.s32 %v2157_v61, 16  ;;  %v2055_v7 = vcvt.s32.f32 %v2053_v16  ;;  %v2113_v13 = vand.u32 65535, %v2112_v24 }
 0x6b8   : > { %2132 = vmin.xlane.f32.xlu1 %v2131_v54  ;;  %4475 = vmatprep.subr.bf16.mxu0 %v4903_v41  ;;  %v2100_v30 = vcvt.s32.f32 %v2098_v12  ;;  %v2128_v2 = vand.u32 65535, %v2127_v17  ;;  %v2143_v53 = vand.u32 65535, %v2142_v14  ;;  %v2158_v24 = vand.u32 65535, %v2157_v61 }
 0x6b9   : > { %v2161_v8 = vcvt.s32.f32 %v2159_v58  ;;  %v2115_v44 = vcvt.s32.f32 %v2113_v13 }
 0x6ba   : > { %2147 = vmin.xlane.f32.xlu0 %v2146_v60  ;;  %v2160_v22 = vcvt.s32.f32 %v2158_v24 }
 0x6bc   : > { %2162 = vmin.xlane.f32.xlu1 %v2161_v8 }
 0x737   : > { %v5583_v0 = vpop.xlane.xlu0 %2057 }
 0x738   : > { %vm2059_vm14 = vcmp.eq.f32.partialorder %v5503_v59, %v5583_v0 }
 0x739   : > { %v2060_v25 = vsel %vm2059_vm14, %v2055_v7, inf }
 0x73a   : > { %2061 = vmin.xlane.f32.xlu0 %v2060_v25  ;;  %v5588_v33 = vpop.xlane.xlu1 %2072 }
 0x73b   : > { %vm2074_vm15 = vcmp.eq.f32.partialorder %v5522_v21, %v5588_v33 }
 0x73c   : > { %v2075_v9 = vsel %vm2074_vm15, %v2070_v37, inf }
 0x73d   : > { %v5592_v45 = vpop.xlane.xlu0 %2087  ;;  %2076 = vmin.xlane.f32.xlu1 %v2075_v9 }
 0x73e   : > { %vm2089_vm1 = vcmp.eq.f32.partialorder %v5536_v52, %v5592_v45  ;;  %v2130_v52 = vcvt.s32.f32 %v2128_v2 }
 0x73f   : > { %v2090_v59 = vsel %vm2089_vm1, %v2085_v29, inf }
 0x740   : > { %2091 = vmin.xlane.f32.xlu0 %v2090_v59 }
 0x741   : > { %v5597_v35 = vpop.xlane.xlu1 %2102 }
 0x742   : > { %vm2104_vm2 = vcmp.eq.f32.partialorder %v2101_v51, %v5597_v35  ;;  %v2145_v51 = vcvt.s32.f32 %v2143_v53  ;;  %v2079_v53 = vcvt.f32.s32 %v5588_v33 }
 0x743   : > { %v5600_v21 = vpop.xlane.xlu0 %2117  ;;  %v2105_v3 = vsel %vm2104_vm2, %v2100_v30, inf  ;;  %v2109_v30 = vcvt.f32.s32 %v5597_v35 }
 0x744   : > { %2106 = vmin.xlane.f32.xlu1 %v2105_v3  ;;  %vm2119_vm3 = vcmp.eq.f32.partialorder %v2116_v27, %v5600_v21 }
 0x745   : > { %v2120_v39 = vsel %vm2119_vm3, %v2115_v44, inf  ;;  %v5603_v40 = vpop.xlane.xlu1 %2132  ;;  %v2064_v44 = vcvt.f32.s32 %v5583_v0 }
 0x746   : > { %2121 = vmin.xlane.f32.xlu0 %v2120_v39  ;;  %vm2134_vm4 = vcmp.eq.f32.partialorder %v2131_v54, %v5603_v40 }
 0x747   : > { %v5606_v58 = vpop.xlane.xlu0 %2147  ;;  %v2135_v17 = vsel %vm2134_vm4, %v2130_v52, inf  ;;  %v2065_v52 = vshll.u32 %v2064_v44, 16 }
 0x748   : > { %2136 = vmin.xlane.f32.xlu1 %v2135_v17  ;;  %vm2149_vm5 = vcmp.eq.f32.partialorder %v2146_v60, %v5606_v58  ;;  %v2094_v17 = vcvt.f32.s32 %v5592_v45 }
 0x749   : > { %v2150_v16 = vsel %vm2149_vm5, %v2145_v51, inf  ;;  %v5609_v14 = vpop.xlane.xlu1 %2162 }
 0x74a   : > { %2151 = vmin.xlane.f32.xlu0 %v2150_v16  ;;  %vm2164_vm6 = vcmp.eq.f32.partialorder %v2161_v8, %v5609_v14  ;;  %v2095_v33 = vshll.u32 %v2094_v17, 16 }
 0x74b   : > { %v2165_v27 = vsel %vm2164_vm6, %v2160_v22, inf  ;;  %v2080_v22 = vshll.u32 %v2079_v53, 16  ;;  %v2124_v53 = vcvt.f32.s32 %v5600_v21  ;;  %v2139_v21 = vcvt.f32.s32 %v5603_v40 }
 0x74c   : > { %2166 = vmin.xlane.f32.xlu1 %v2165_v27 }
 0x77b   : > { %v5612_v61 = vpop.f32.mrb[18].mxu0 }
 0x77c   : > { %v5616_v7 = vpop.f32.mrb[19].mxu0 }
 0x780   : > { %v5620_v60 = vpop.f32.mrb[20].mxu0 }
 0x781   : > { %v5624_v37 = vpop.f32.mrb[21].mxu0 }
 0x785   : > { %v5628_v9 = vpop.f32.mrb[22].mxu0 }
 0x786   : > { %v5632_v12 = vpop.f32.mrb[23].mxu0 }
 0x789   : > { %v5636_v13 = vpop.f32.mrb[24].mxu0 }
 0x78a   : > { %v5640_v2 = vpop.f32.mrb[25].mxu0 }
 0x7c7   : > { %v2062_v39 = vpop.xlane.xlu0 %2061 }
 0x7c8   : > { %v2063_v24 = vcvt.f32.s32 %v2062_v39 }
 0x7ca   : > { %v2066_v51 = vadd.s32 %v2065_v52, %v2063_v24  ;;  %v2077_v16 = vpop.xlane.xlu1 %2076  ;;  %v2110_v24 = vshll.u32 %v2109_v30, 16  ;;  %v2154_v30 = vcvt.f32.s32 %v5606_v58  ;;  %v2169_v58 = vcvt.f32.s32 %v5609_v14 }
 0x7cb   : > { %v2078_v27 = vcvt.f32.s32 %v2077_v16 }
 0x7cc   : > { %vm2172_vm8 = vcmp.eq.s32.totalorder %v5488_v62, %v2066_v51  ;;  %v2125_v51 = vshll.u32 %v2124_v53, 16 }
 0x7cd   : > { %v2081_v59 = vadd.s32 %v2080_v22, %v2078_v27  ;;  %v2092_v29 = vpop.xlane.xlu0 %2091  ;;  %v3665_v3 = vsel %vm2172_vm8, 1.0, %v6355_v50  ;;  %v5651_v0 = vsel %vm2172_vm8, 2147483647, %v5488_v62 }
 0x7ce   : > { %v2093_v44 = vcvt.f32.s32 %v2092_v29  ;;  %4170 = vmatprep.mubr.msk.f32.mxu1 %vm903_vm7, %v3665_v3  ;;  %v5656_v45 = vsel %vm903_vm7, %v5651_v0, 2147483647 }
 0x7cf   : > { %vm2173_vm9 = vcmp.eq.s32.totalorder %v5500_v48, %v2081_v59  ;;  %v2343_v35 = vshra.s32 %v5656_v45, 16 }
 0x7d0   : > { %v3666_v39 = vsel %vm2173_vm9, 1.0, %v6355_v50  ;;  %v2096_v52 = vadd.s32 %v2095_v33, %v2093_v44  ;;  %v5663_v62 = vsel %vm2173_vm9, 2147483647, %v5500_v48 }
 0x7d1   : > { %v2107_v29 = vpop.xlane.xlu1 %2106  ;;  %4171 = vmatmul.mubr.msk.f32.vlgmr.msra.gmra.mrb[32].mxu1 %vm903_vm7, %v3666_v39  ;;  %v5666_v3 = vcvt.s32.f32 %v2343_v35  ;;  %v5670_v17 = vsel %vm903_vm7, %v5663_v62, 2147483647 }
 0x7d2   : > { %v2108_v59 = vcvt.f32.s32 %v2107_v29  ;;  %4461 = vmatpush3.bf16.msra.mxu1 %v4903_v41  ;;  %vm2174_vm10 = vcmp.eq.s32.totalorder %v5517_v46, %v2096_v52  ;;  %v2358_v48 = vshra.s32 %v5670_v17, 16  ;;  %v2140_v52 = vshll.u32 %v2139_v21, 16 }
 0x7d3   : > { %v2122_v16 = vpop.xlane.xlu0 %2121  ;;  %2346 = vmin.xlane.f32.xlu0 %v5666_v3  ;;  %v3667_v22 = vsel %vm2174_vm10, 1.0, %v6355_v50  ;;  %4463 = vmatprep.subr.bf16.mxu1 %v4926_v5  ;;  %v5681_v27 = vsel %vm2174_vm10, 2147483647, %v5517_v46  ;;  %v2155_v46 = vshll.u32 %v2154_v30, 16  ;;  %v2170_v30 = vshll.u32 %v2169_v58, 16 }
 0x7d4   : > { %v2111_v40 = vadd.s32 %v2110_v24, %v2108_v59  ;;  %v2123_v33 = vcvt.f32.s32 %v2122_v16  ;;  %4173 = vmatprep.mubr.msk.f32.mxu1 %vm903_vm7, %v3667_v22  ;;  %v5684_v44 = vcvt.s32.f32 %v2358_v48  ;;  %v5688_v53 = vsel %vm903_vm7, %v5681_v27, 2147483647 }
 0x7d5   : > { %v2137_v35 = vpop.xlane.xlu1 %2136  ;;  %v2373_v39 = vshra.s32 %v5688_v53, 16 }
 0x7d6   : > { %v2126_v29 = vadd.s32 %v2125_v51, %v2123_v33  ;;  %v2138_v8 = vcvt.f32.s32 %v2137_v35  ;;  %vm2175_vm11 = vcmp.eq.s32.totalorder %v5533_v19, %v2111_v40  ;;  %4465 = vmatpush3.bf16.msra.mxu1 %v4926_v5  ;;  %2361 = vmin.xlane.f32.xlu1 %v5684_v44 }
 0x7d7   : > { %v2152_v24 = vpop.xlane.xlu0 %2151  ;;  %v3668_v59 = vsel %vm2175_vm11, 1.0, %v6355_v50  ;;  %4467 = vmatprep.subr.bf16.mxu1 %v4941_v23  ;;  %v5697_v48 = vcvt.s32.f32 %v2373_v39  ;;  %v5700_v14 = vsel %vm2175_vm11, 2147483647, %v5533_v19 }
 0x7d8   : > { %v2141_v21 = vadd.s32 %v2140_v52, %v2138_v8  ;;  %v2153_v51 = vcvt.f32.s32 %v2152_v24  ;;  %4174 = vmatmul.mubr.msk.f32.gmra.mrb[34].mxu1 %vm903_vm7, %v3668_v59  ;;  %vm2176_vm12 = vcmp.eq.s32.totalorder %v5546_v6, %v2126_v29  ;;  %v5706_v16 = vsel %vm903_vm7, %v5700_v14, 2147483647 }
 0x7d9   : > { %v2167_v22 = vpop.xlane.xlu1 %2166  ;;  %2376 = vmin.xlane.f32.xlu0 %v5697_v48  ;;  %v3669_v40 = vsel %vm2176_vm12, 1.0, %v6355_v50  ;;  %v2388_v33 = vshra.s32 %v5706_v16, 16  ;;  %v5712_v19 = vsel %vm2176_vm12, 2147483647, %v5546_v6 }
 0x7da   : > { %v2156_v8 = vadd.s32 %v2155_v46, %v2153_v51  ;;  %v2168_v35 = vcvt.f32.s32 %v2167_v22  ;;  %4176 = vmatprep.mubr.msk.f32.mxu1 %vm903_vm7, %v3669_v40  ;;  %vm2177_vm13 = vcmp.eq.s32.totalorder %v5556_v49, %v2141_v21  ;;  %4469 = vmatpush3.bf16.msra.mxu1 %v4941_v23  ;;  %v2401_v58 = vsel %vm903_vm7, %v5712_v19, 2147483647 }
 0x7db   : > { %v3670_v39 = vsel %vm2177_vm13, 1.0, %v6355_v50  ;;  %v2390_v52 = vcvt.s32.f32 %v2388_v33  ;;  %4471 = vmatprep.subr.bf16.mxu1 %v4978_v10  ;;  %v2403_v29 = vshra.s32 %v2401_v58, 16  ;;  %v5722_v6 = vsel %vm2177_vm13, 2147483647, %v5556_v49 }
 0x7dc   : > { %v2171_v46 = vadd.s32 %v2170_v30, %v2168_v35  ;;  %4177 = vmatmul.mubr.msk.f32.gmra.mrb[36].mxu1 %vm903_vm7, %v3670_v39  ;;  %vm2178_vm14 = vcmp.eq.s32.totalorder %v5565_v11, %v2156_v8  ;;  %v2416_v24 = vsel %vm903_vm7, %v5722_v6, 2147483647 }
 0x7dd   : > { %2391 = vmin.xlane.f32.xlu1 %v2390_v52  ;;  %v2405_v59 = vcvt.s32.f32 %v2403_v29  ;;  %v3671_v21 = vsel %vm2178_vm14, 1.0, %v6355_v50  ;;  %v2418_v51 = vshra.s32 %v2416_v24, 16  ;;  %v5730_v22 = vsel %vm2178_vm14, 2147483647, %v5565_v11 }
 0x7de   : > { %4179 = vmatprep.mubr.msk.f32.mxu1 %vm903_vm7, %v3671_v21  ;;  %vm2179_vm15 = vcmp.eq.s32.totalorder %v5574_v32, %v2171_v46  ;;  %4473 = vmatpush3.bf16.msra.mxu1 %v4978_v10  ;;  %v2431_v49 = vsel %vm903_vm7, %v5730_v22, 2147483647  ;;  %v2342_v46 = vand.u32 65535, %v5656_v45  ;;  %v2357_v21 = vand.u32 65535, %v5670_v17 }
 0x7df   : > { %2406 = vmin.xlane.f32.xlu0 %v2405_v59  ;;  %v3672_v30 = vsel %vm2179_vm15, 1.0, %v6355_v50  ;;  %v2420_v40 = vcvt.s32.f32 %v2418_v51  ;;  %v2433_v33 = vshra.s32 %v2431_v49, 16  ;;  %v5739_v8 = vsel %vm2179_vm15, 2147483647, %v5574_v32 }
 0x7e0   : > { %4180 = vmatmul.mubr.msk.f32.gmra.mrb[38].mxu1 %vm903_vm7, %v3672_v30  ;;  %v2446_v11 = vsel %vm903_vm7, %v5739_v8, 2147483647  ;;  %v2344_v57 = vcvt.s32.f32 %v2342_v46  ;;  %v2372_v30 = vand.u32 65535, %v5688_v53  ;;  %v2387_v46 = vand.u32 65535, %v5706_v16 }
 0x7e1   : > { %2421 = vmin.xlane.f32.xlu1 %v2420_v40  ;;  %v2435_v35 = vcvt.s32.f32 %v2433_v33  ;;  %v2448_v39 = vshra.s32 %v2446_v11, 16  ;;  %v2359_v33 = vcvt.s32.f32 %v2357_v21  ;;  %v2417_v21 = vand.u32 65535, %v2416_v24 }
 0x7e2   : > { %v2374_v17 = vcvt.s32.f32 %v2372_v30 }
 0x7e3   : > { %2436 = vmin.xlane.f32.xlu0 %v2435_v35  ;;  %v2450_v29 = vcvt.s32.f32 %v2448_v39 }
 0x7e5   : > { %2451 = vmin.xlane.f32.xlu1 %v2450_v29 }
 0x860   : > { %v5746_v51 = vpop.xlane.xlu0 %2346 }
 0x861   : > { %vm2348_vm1 = vcmp.eq.f32.partialorder %v5666_v3, %v5746_v51  ;;  %v2402_v3 = vand.u32 65535, %v2401_v58  ;;  %v2447_v58 = vand.u32 65535, %v2446_v11 }
 0x862   : > { %v2349_v32 = vsel %vm2348_vm1, %v2344_v57, inf }
 0x863   : > { %2350 = vmin.xlane.f32.xlu0 %v2349_v32  ;;  %v5751_v25 = vpop.xlane.xlu1 %2361  ;;  %v2389_v32 = vcvt.s32.f32 %v2387_v46  ;;  %v2404_v54 = vcvt.s32.f32 %v2402_v3 }
 0x864   : > { %vm2363_vm2 = vcmp.eq.f32.partialorder %v5684_v44, %v5751_v25 }
 0x865   : > { %v2364_v39 = vsel %vm2363_vm2, %v2359_v33, inf }
 0x866   : > { %v5755_v45 = vpop.xlane.xlu0 %2376  ;;  %2365 = vmin.xlane.f32.xlu1 %v2364_v39  ;;  %v2432_v39 = vand.u32 65535, %v2431_v49 }
 0x867   : > { %vm2378_vm3 = vcmp.eq.f32.partialorder %v5697_v48, %v5755_v45  ;;  %v2419_v48 = vcvt.s32.f32 %v2417_v21 }
 0x868   : > { %v2379_v57 = vsel %vm2378_vm3, %v2374_v17, inf }
 0x869   : > { %2380 = vmin.xlane.f32.xlu0 %v2379_v57  ;;  %v2449_v57 = vcvt.s32.f32 %v2447_v58 }
 0x86a   : > { %v5760_v53 = vpop.xlane.xlu1 %2391 }
 0x86b   : > { %vm2393_vm4 = vcmp.eq.f32.partialorder %v2390_v52, %v5760_v53  ;;  %v2434_v52 = vcvt.s32.f32 %v2432_v39 }
 0x86c   : > { %v5763_v44 = vpop.xlane.xlu0 %2406  ;;  %v2394_v33 = vsel %vm2393_vm4, %v2389_v32, inf  ;;  %v6365_v32 = vmax.f32 %v5448_v55, %v5616_v7  ;;  %v6369_v7 = vmax.f32 %v5468_v4, %v5632_v12 }
 0x86d   : > { %2395 = vmin.xlane.f32.xlu1 %v2394_v33  ;;  %vm2408_vm5 = vcmp.eq.f32.partialorder %v2405_v59, %v5763_v44  ;;  %v6366_v33 = vmax.f32 %v5453_v47, %v5620_v60  ;;  %v6370_v60 = vmax.f32 %v5473_v1, %v5636_v13 }
 0x86e   : > { %v2409_v16 = vsel %vm2408_vm5, %v2404_v54, inf  ;;  %v5766_v30 = vpop.xlane.xlu1 %2421 }
 0x86f   : > { %2410 = vmin.xlane.f32.xlu0 %v2409_v16  ;;  %vm2423_vm6 = vcmp.eq.f32.partialorder %v2420_v40, %v5766_v30  ;;  %v6364_v40 = vmax.f32 %v5443_v63, %v5612_v61  ;;  %v6367_v16 = vmax.f32 %v5458_v38, %v5624_v37  ;;  %v6368_v61 = vmax.f32 %v5463_v56, %v5628_v9 }
 0x870   : > { %v5769_v17 = vpop.xlane.xlu0 %2436  ;;  %v2424_v24 = vsel %vm2423_vm6, %v2419_v48, inf  ;;  %v6371_v37 = vmax.f32 %v5478_v15, %v5640_v2  ;;  %v2353_v56 = vcvt.f32.s32 %v5746_v51  ;;  %v2368_v9 = vcvt.f32.s32 %v5751_v25 }
 0x871   : > { %2425 = vmin.xlane.f32.xlu1 %v2424_v24  ;;  %vm2438_vm8 = vcmp.eq.f32.partialorder %v2435_v35, %v5769_v17 }
 0x872   : > { %v2439_v46 = vsel %vm2438_vm8, %v2434_v52, inf  ;;  %v5772_v49 = vpop.xlane.xlu1 %2451  ;;  %v2354_v4 = vshll.u32 %v2353_v56, 16  ;;  %v2369_v1 = vshll.u32 %v2368_v9, 16 }
 0x873   : > { %2440 = vmin.xlane.f32.xlu0 %v2439_v46  ;;  %vm2453_vm9 = vcmp.eq.f32.partialorder %v2450_v29, %v5772_v49 }
 0x874   : > { %v2454_v54 = vsel %vm2453_vm9, %v2449_v57, inf }
 0x875   : > { %2455 = vmin.xlane.f32.xlu1 %v2454_v54  ;;  %v2383_v54 = vcvt.f32.s32 %v5755_v45 }
 0x877   : > { %v2384_v25 = vshll.u32 %v2383_v54, 16 }
 0x8a4   : > { %v4172_v59 = vpop.f32.mrb[32].mxu1 }
 0x8a5   : > { %v5778_v11 = vmax.f32 %v6364_v40, %v4172_v59  ;;  %v2286_v3 = vpop.f32.mrb[33].mxu1 }
 0x8a6   : > { %v5783_v35 = vmax.f32 %v6365_v32, %v2286_v3  ;;  %v2398_v3 = vcvt.f32.s32 %v5760_v53 }
 0x8ab   : > { %v4175_v21 = vpop.f32.mrb[34].mxu1 }
 0x8ac   : > { %v5788_v39 = vmax.f32 %v6366_v33, %v4175_v21  ;;  %v2296_v29 = vpop.f32.mrb[35].mxu1  ;;  %v2413_v33 = vcvt.f32.s32 %v5763_v44  ;;  %v2428_v44 = vcvt.f32.s32 %v5766_v30 }
 0x8ad   : > { %v5793_v48 = vmax.f32 %v6367_v16, %v2296_v29 }
 0x8af   : > { %v4178_v63 = vpop.f32.mrb[36].mxu1 }
 0x8b0   : > { %v5798_v58 = vmax.f32 %v6368_v61, %v4178_v63  ;;  %v2306_v55 = vpop.f32.mrb[37].mxu1  ;;  %v2399_v63 = vshll.u32 %v2398_v3, 16 }
 0x8b1   : > { %v5803_v24 = vmax.f32 %v6369_v7, %v2306_v55 }
 0x8b3   : > { %v4181_v47 = vpop.f32.mrb[38].mxu1 }
 0x8b4   : > { %v5808_v52 = vmax.f32 %v6370_v60, %v4181_v47  ;;  %v2316_v38 = vpop.f32.mrb[39].mxu1  ;;  %v2414_v60 = vshll.u32 %v2413_v33, 16 }
 0x8b5   : > { %v5813_v46 = vmax.f32 %v6371_v37, %v2316_v38  ;;  %v2443_v38 = vcvt.f32.s32 %v5769_v17  ;;  %v2458_v17 = vcvt.f32.s32 %v5772_v49 }
 0x8f0   : > { %v2351_v57 = vpop.xlane.xlu0 %2350 }
 0x8f1   : > { %v2352_v12 = vcvt.f32.s32 %v2351_v57 }
 0x8f3   : > { %v2355_v59 = vadd.s32 %v2354_v4, %v2352_v12  ;;  %v2366_v40 = vpop.xlane.xlu1 %2365 }
 0x8f4   : > { %v2367_v13 = vcvt.f32.s32 %v2366_v40 }
 0x8f5   : > { %vm2461_vm10 = vcmp.eq.s32.totalorder %v5651_v0, %v2355_v59  ;;  %v2429_v59 = vshll.u32 %v2428_v44, 16 }
 0x8f6   : > { %v2370_v15 = vadd.s32 %v2369_v1, %v2367_v13  ;;  %v2381_v2 = vpop.xlane.xlu0 %2380  ;;  %v3681_v32 = vsel %vm2461_vm10, 1.0, %v6355_v50  ;;  %v5822_v51 = vsel %vm2461_vm10, 2147483647, %v5651_v0  ;;  %v2444_v1 = vshll.u32 %v2443_v38, 16 }
 0x8f7   : > { %v2382_v21 = vcvt.f32.s32 %v2381_v2  ;;  %4198 = vmatprep.mubr.msk.f32.mxu0 %vm903_vm7, %v3681_v32  ;;  %v5827_v45 = vsel %vm903_vm7, %v5822_v51, 2147483647 }
 0x8f8   : > { %vm2462_vm11 = vcmp.eq.s32.totalorder %v5663_v62, %v2370_v15  ;;  %v2632_v53 = vshra.s32 %v5827_v45, 16 }
 0x8f9   : > { %v3682_v29 = vsel %vm2462_vm11, 1.0, %v6355_v50  ;;  %v2385_v16 = vadd.s32 %v2384_v25, %v2382_v21  ;;  %v5834_v0 = vsel %vm2462_vm11, 2147483647, %v5663_v62  ;;  %v2459_v25 = vshll.u32 %v2458_v17, 16 }
 0x8fa   : > { %v2396_v61 = vpop.xlane.xlu1 %2395  ;;  %4199 = vmatmul.mubr.msk.f32.vlgmr.msra.gmra.mrb[26].mxu0 %vm903_vm7, %v3682_v29  ;;  %v5837_v55 = vcvt.s32.f32 %v2632_v53  ;;  %v5841_v7 = vsel %vm903_vm7, %v5834_v0, 2147483647 }
 0x8fb   : > { %v2397_v47 = vcvt.f32.s32 %v2396_v61  ;;  %4477 = vmatpush3.bf16.msra.mxu0 %v4903_v41  ;;  %vm2463_vm12 = vcmp.eq.s32.totalorder %v5681_v27, %v2385_v16  ;;  %v2647_v62 = vshra.s32 %v5841_v7, 16 }
 0x8fc   : > { %v2411_v37 = vpop.xlane.xlu0 %2410  ;;  %2635 = vmin.xlane.f32.xlu0 %v5837_v55  ;;  %v3683_v56 = vsel %vm2463_vm12, 1.0, %v6355_v50  ;;  %v5851_v9 = vsel %vm2463_vm12, 2147483647, %v5681_v27  ;;  %4479 = vmatprep.subr.bf16.mxu0 %v4926_v5 }
 0x8fd   : > { %v2400_v30 = vadd.s32 %v2399_v63, %v2397_v47  ;;  %v2412_v57 = vcvt.f32.s32 %v2411_v37  ;;  %4201 = vmatprep.mubr.msk.f32.mxu0 %vm903_vm7, %v3683_v56  ;;  %v5855_v41 = vcvt.s32.f32 %v2647_v62  ;;  %v5859_v4 = vsel %vm903_vm7, %v5851_v9, 2147483647 }
 0x8fe   : > { %v2426_v12 = vpop.xlane.xlu1 %2425  ;;  %v2662_v54 = vshra.s32 %v5859_v4, 16 }
 0x8ff   : > { %v2415_v27 = vadd.s32 %v2414_v60, %v2412_v57  ;;  %v2427_v40 = vcvt.f32.s32 %v2426_v12  ;;  %vm2464_vm13 = vcmp.eq.s32.totalorder %v5700_v14, %v2400_v30  ;;  %4481 = vmatpush3.bf16.msra.mxu0 %v4926_v5  ;;  %2650 = vmin.xlane.f32.xlu1 %v5855_v41 }
 0x900   : > { %v2441_v13 = vpop.xlane.xlu0 %2440  ;;  %v3684_v3 = vsel %vm2464_vm13, 1.0, %v6355_v50  ;;  %v5868_v15 = vsel %vm2464_vm13, 2147483647, %v5700_v14  ;;  %4483 = vmatprep.subr.bf16.mxu0 %v4941_v23  ;;  %v5871_v49 = vcvt.s32.f32 %v2662_v54 }
 0x901   : > { %v2430_v2 = vadd.s32 %v2429_v59, %v2427_v40  ;;  %v2442_v32 = vcvt.f32.s32 %v2441_v13  ;;  %4202 = vmatmul.mubr.msk.f32.gmra.mrb[28].mxu0 %vm903_vm7, %v3684_v3  ;;  %vm2465_vm14 = vcmp.eq.s32.totalorder %v5712_v19, %v2415_v27  ;;  %v5877_v5 = vsel %vm903_vm7, %v5868_v15, 2147483647 }
 0x902   : > { %v2456_v21 = vpop.xlane.xlu1 %2455  ;;  %2665 = vmin.xlane.f32.xlu0 %v5871_v49  ;;  %v3685_v14 = vsel %vm2465_vm14, 1.0, %v6355_v50  ;;  %v5882_v33 = vsel %vm2465_vm14, 2147483647, %v5712_v19  ;;  %v2677_v53 = vshra.s32 %v5877_v5, 16  ;;  %v2631_v27 = vand.u32 65535, %v5827_v45 }
 0x903   : > { %v2445_v29 = vadd.s32 %v2444_v1, %v2442_v32  ;;  %v2457_v16 = vcvt.f32.s32 %v2456_v21  ;;  %4204 = vmatprep.mubr.msk.f32.mxu0 %vm903_vm7, %v3685_v14  ;;  %vm2466_vm15 = vcmp.eq.s32.totalorder %v5722_v6, %v2430_v2  ;;  %4485 = vmatpush3.bf16.msra.mxu0 %v4941_v23  ;;  %v2690_v63 = vsel %vm903_vm7, %v5882_v33, 2147483647 }
 0x904   : > { %v3686_v61 = vsel %vm2466_vm15, 1.0, %v6355_v50  ;;  %v5892_v44 = vsel %vm2466_vm15, 2147483647, %v5722_v6  ;;  %v2679_v19 = vcvt.s32.f32 %v2677_v53  ;;  %4487 = vmatprep.subr.bf16.mxu0 %v4978_v10  ;;  %v2692_v47 = vshra.s32 %v2690_v63, 16 }
 0x905   : > { %v2460_v62 = vadd.s32 %v2459_v25, %v2457_v16  ;;  %4205 = vmatmul.mubr.msk.f32.gmra.mrb[30].mxu0 %vm903_vm7, %v3686_v61  ;;  %vm2467_vm1 = vcmp.eq.s32.totalorder %v5730_v22, %v2445_v29  ;;  %v2705_v23 = vsel %vm903_vm7, %v5892_v44, 2147483647  ;;  %v2646_v40 = vand.u32 65535, %v5841_v7 }
 0x906   : > { %2680 = vmin.xlane.f32.xlu1 %v2679_v19  ;;  %v2694_v60 = vcvt.s32.f32 %v2692_v47  ;;  %v3687_v38 = vsel %vm2467_vm1, 1.0, %v6355_v50  ;;  %v5901_v37 = vsel %vm2467_vm1, 2147483647, %v5730_v22  ;;  %v2707_v6 = vshra.s32 %v2705_v23, 16 }
 0x907   : > { %4207 = vmatprep.mubr.msk.f32.mxu0 %vm903_vm7, %v3687_v38  ;;  %vm2468_vm2 = vcmp.eq.s32.totalorder %v5739_v8, %v2460_v62  ;;  %4489 = vmatpush3.bf16.msra.mxu0 %v4978_v10  ;;  %v2720_v56 = vsel %vm903_vm7, %v5901_v37, 2147483647  ;;  %v2661_v3 = vand.u32 65535, %v5859_v4  ;;  %v2648_v32 = vcvt.s32.f32 %v2646_v40 }
 0x908   : > { %2695 = vmin.xlane.f32.xlu0 %v2694_v60  ;;  %v3688_v30 = vsel %vm2468_vm2, 1.0, %v6355_v50  ;;  %v5910_v57 = vsel %vm2468_vm2, 2147483647, %v5739_v8  ;;  %v2709_v17 = vcvt.s32.f32 %v2707_v6  ;;  %v2722_v12 = vshra.s32 %v2720_v56, 16 }
 0x909   : > { %4208 = vmatmul.mubr.msk.f32.gmra.mrb[32].mxu0 %vm903_vm7, %v3688_v30  ;;  %v2735_v22 = vsel %vm903_vm7, %v5910_v57, 2147483647  ;;  %v2633_v8 = vcvt.s32.f32 %v2631_v27  ;;  %v2663_v7 = vcvt.s32.f32 %v2661_v3  ;;  %v2676_v21 = vand.u32 65535, %v5877_v5 }
 0x90a   : > { %2710 = vmin.xlane.f32.xlu1 %v2709_v17  ;;  %v2724_v54 = vcvt.s32.f32 %v2722_v12  ;;  %v2737_v59 = vshra.s32 %v2735_v22, 16  ;;  %v2691_v14 = vand.u32 65535, %v2690_v63  ;;  %v2706_v29 = vand.u32 65535, %v2705_v23  ;;  %v791_v12 = vld [vmem:[%s6329_s3 + $0x8] sm:$0xff] }
 0x90b   : > { %v2678_v53 = vcvt.s32.f32 %v2676_v21  ;;  %v2721_v47 = vand.u32 65535, %v2720_v56  ;;  %v2736_v63 = vand.u32 65535, %v2735_v22 }
 0x90c   : > { %2725 = vmin.xlane.f32.xlu0 %v2724_v54  ;;  %v2739_v10 = vcvt.s32.f32 %v2737_v59  ;;  %v2693_v61 = vcvt.s32.f32 %v2691_v14 }
 0x90e   : > { %2740 = vmin.xlane.f32.xlu1 %v2739_v10 }
 0x989   : > { %v5917_v1 = vpop.xlane.xlu0 %2635 }
 0x98a   : > { %vm2637_vm3 = vcmp.eq.f32.partialorder %v5837_v55, %v5917_v1 }
 0x98b   : > { %v2638_v13 = vsel %vm2637_vm3, %v2633_v8, inf }
 0x98c   : > { %2639 = vmin.xlane.f32.xlu0 %v2638_v13  ;;  %v5922_v2 = vpop.xlane.xlu1 %2650 }
 0x98d   : > { %vm2652_vm4 = vcmp.eq.f32.partialorder %v5855_v41, %v5922_v2 }
 0x98e   : > { %v2653_v25 = vsel %vm2652_vm4, %v2648_v32, inf }
 0x98f   : > { %v5926_v45 = vpop.xlane.xlu0 %2665  ;;  %2654 = vmin.xlane.f32.xlu1 %v2653_v25 }
 0x990   : > { %vm2667_vm5 = vcmp.eq.f32.partialorder %v5871_v49, %v5926_v45  ;;  %v2708_v49 = vcvt.s32.f32 %v2706_v29 }
 0x991   : > { %v2668_v55 = vsel %vm2667_vm5, %v2663_v7, inf }
 0x992   : > { %2669 = vmin.xlane.f32.xlu0 %v2668_v55 }
 0x993   : > { %v5931_v4 = vpop.xlane.xlu1 %2680 }
 0x994   : > { %vm2682_vm6 = vcmp.eq.f32.partialorder %v2679_v19, %v5931_v4  ;;  %v2723_v19 = vcvt.s32.f32 %v2721_v47 }
 0x995   : > { %v5934_v41 = vpop.xlane.xlu0 %2695  ;;  %v2683_v16 = vsel %vm2682_vm6, %v2678_v53, inf }
 0x996   : > { %vm2697_vm8 = vcmp.eq.f32.partialorder %v2694_v60, %v5934_v41  ;;  %2684 = vmin.xlane.f32.xlu1 %v2683_v16  ;;  %v2738_v60 = vcvt.s32.f32 %v2736_v63  ;;  %v2642_v16 = vcvt.f32.s32 %v5917_v1  ;;  %v2672_v63 = vcvt.f32.s32 %v5926_v45  ;;  %v793_v1 = vld [vmem:[%s6329_s3 + $0x18] sm:$0xff] }
 0x997   : > { %v2698_v5 = vsel %vm2697_vm8, %v2693_v61, inf  ;;  %v5937_v62 = vpop.xlane.xlu1 %2710  ;;  %v2657_v61 = vcvt.f32.s32 %v5922_v2  ;;  %v2687_v2 = vcvt.f32.s32 %v5931_v4 }
 0x998   : > { %2699 = vmin.xlane.f32.xlu0 %v2698_v5  ;;  %vm2712_vm9 = vcmp.eq.f32.partialorder %v2709_v17, %v5937_v62  ;;  %v790_v17 = vld [vmem:[%s6329_s3] sm:$0xff]  ;;  %v2643_v5 = vshll.u32 %v2642_v16, 16 }
 0x999   : > { %v5940_v38 = vpop.xlane.xlu0 %2725  ;;  %v2713_v23 = vsel %vm2712_vm9, %v2708_v49, inf  ;;  %v4490_v22 = vpack.c.bf16 %v791_v12, %v790_v17 }
 0x99a   : > { %vm2727_vm10 = vcmp.eq.f32.partialorder %v2724_v54, %v5940_v38  ;;  %2714 = vmin.xlane.f32.xlu1 %v2713_v23 }
 0x99b   : > { %v2728_v6 = vsel %vm2727_vm10, %v2723_v19, inf  ;;  %v5943_v56 = vpop.xlane.xlu1 %2740  ;;  %4491 = vmatprep.subr.bf16.mxu1 %v4490_v22 }
 0x99c   : > { %2729 = vmin.xlane.f32.xlu0 %v2728_v6  ;;  %vm2742_vm11 = vcmp.eq.f32.partialorder %v2739_v10, %v5943_v56  ;;  %v2658_v6 = vshll.u32 %v2657_v61, 16  ;;  %v2673_v61 = vshll.u32 %v2672_v63, 16 }
 0x99d   : > { %v2743_v30 = vsel %vm2742_vm11, %v2738_v60, inf }
 0x99e   : > { %2744 = vmin.xlane.f32.xlu1 %v2743_v30  ;;  %v792_v30 = vld [vmem:[%s6329_s3 + $0x10] sm:$0xff] }
 0x9cd   : > { %v5952_v54 = vpop.f32.mrb[26].mxu0 }
 0x9ce   : > { %v2615_v59 = vmax.f32 %v5778_v11, %v5952_v54  ;;  %v5956_v27 = vpop.f32.mrb[27].mxu0 }
 0x9cf   : > { %v2614_v10 = vmax.f32 %v5783_v35, %v5956_v27 }
 0x9d4   : > { %v5960_v40 = vpop.f32.mrb[28].mxu0 }
 0x9d5   : > { %v2617_v8 = vmax.f32 %v5788_v39, %v5960_v40  ;;  %v5964_v13 = vpop.f32.mrb[29].mxu0 }
 0x9d6   : > { %v2616_v3 = vmax.f32 %v5793_v48, %v5964_v13 }
 0x9d8   : > { %v5968_v32 = vpop.f32.mrb[30].mxu0 }
 0x9d9   : > { %v2619_v25 = vmax.f32 %v5798_v58, %v5968_v32  ;;  %v5972_v7 = vpop.f32.mrb[31].mxu0 }
 0x9da   : > { %v2618_v21 = vmax.f32 %v5803_v24, %v5972_v7 }
 0x9dc   : > { %v5976_v55 = vpop.f32.mrb[32].mxu0 }
 0x9dd   : > { %v5980_v53 = vpop.f32.mrb[33].mxu0  ;;  %v6372_v27 = vmax.f32 %v5808_v52, %v5976_v55 }
 0x9de   : > { %v6373_v40 = vmax.f32 %v5813_v46, %v5980_v53 }
 0xa19   : > { %v2640_v47 = vpop.xlane.xlu0 %2639 }
 0xa1a   : > { %v2641_v49 = vcvt.f32.s32 %v2640_v47 }
 0xa1c   : > { %v2644_v23 = vadd.s32 %v2643_v5, %v2641_v49  ;;  %v2655_v19 = vpop.xlane.xlu1 %2654  ;;  %v2702_v49 = vcvt.f32.s32 %v5934_v41 }
 0xa1d   : > { %v2656_v60 = vcvt.f32.s32 %v2655_v19 }
 0xa1e   : > { %vm2750_vm12 = vcmp.eq.s32.totalorder %v5822_v51, %v2644_v23  ;;  %v4494_v23 = vpack.c.bf16 %v793_v1, %v792_v30  ;;  %v2732_v1 = vcvt.f32.s32 %v5940_v38  ;;  %v2747_v38 = vcvt.f32.s32 %v5943_v56 }
 0xa1f   : > { %v2659_v17 = vadd.s32 %v2658_v6, %v2656_v60  ;;  %v2670_v12 = vpop.xlane.xlu0 %2669  ;;  %v3697_v45 = vsel %vm2750_vm12, 1.0, %v6355_v50  ;;  %v5997_v16 = vsel %vm2750_vm12, 2147483647, %v5822_v51  ;;  %v2688_v6 = vshll.u32 %v2687_v2, 16 }
 0xa20   : > { %v2671_v47 = vcvt.f32.s32 %v2670_v12  ;;  %4226 = vmatprep.mubr.msk.f32.mxu1 %vm903_vm7, %v3697_v45  ;;  %v6002_v5 = vsel %vm903_vm7, %v5997_v16, 2147483647 }
 0xa21   : > { %vm2751_vm13 = vcmp.eq.s32.totalorder %v5834_v0, %v2659_v17  ;;  %v2921_v4 = vshra.s32 %v6002_v5, 16  ;;  %v2717_v17 = vcvt.f32.s32 %v5937_v62 }
 0xa22   : > { %v3698_v19 = vsel %vm2751_vm13, 1.0, %v6355_v50  ;;  %v6009_v51 = vsel %vm2751_vm13, 2147483647, %v5834_v0  ;;  %v2674_v63 = vadd.s32 %v2673_v61, %v2671_v47  ;;  %v2703_v0 = vshll.u32 %v2702_v49, 16 }
 0xa23   : > { %v2685_v60 = vpop.xlane.xlu1 %2684  ;;  %4227 = vmatmul.mubr.msk.f32.vlgmr.msra.gmra.mrb[40].mxu1 %vm903_vm7, %v3698_v19  ;;  %v6012_v12 = vcvt.s32.f32 %v2921_v4  ;;  %v6016_v41 = vsel %vm903_vm7, %v6009_v51, 2147483647 }
 0xa24   : > { %v2686_v45 = vcvt.f32.s32 %v2685_v60  ;;  %vm2752_vm14 = vcmp.eq.s32.totalorder %v5851_v9, %v2674_v63  ;;  %v2936_v30 = vshra.s32 %v6016_v41, 16  ;;  %4493 = vmatpush3.bf16.msra.mxu1 %v4490_v22  ;;  %v2718_v60 = vshll.u32 %v2717_v17, 16 }
 0xa25   : > { %v2700_v2 = vpop.xlane.xlu0 %2699  ;;  %2924 = vmin.xlane.f32.xlu0 %v6012_v12  ;;  %v3699_v61 = vsel %vm2752_vm14, 1.0, %v6355_v50  ;;  %v6025_v47 = vsel %vm2752_vm14, 2147483647, %v5851_v9  ;;  %4495 = vmatprep.subr.bf16.mxu1 %v4494_v23 }
 0xa26   : > { %v2689_v4 = vadd.s32 %v2688_v6, %v2686_v45  ;;  %v2701_v62 = vcvt.f32.s32 %v2700_v2  ;;  %4229 = vmatprep.mubr.msk.f32.mxu1 %vm903_vm7, %v3699_v61  ;;  %v6028_v19 = vcvt.s32.f32 %v2936_v30  ;;  %v6032_v22 = vsel %vm903_vm7, %v6025_v47, 2147483647 }
 0xa27   : > { %v2715_v49 = vpop.xlane.xlu1 %2714  ;;  %v2951_v63 = vshra.s32 %v6032_v22, 16  ;;  %v2733_v6 = vshll.u32 %v2732_v1, 16 }
 0xa28   : > { %v2704_v29 = vadd.s32 %v2703_v0, %v2701_v62  ;;  %v2716_v9 = vcvt.f32.s32 %v2715_v49  ;;  %vm2753_vm15 = vcmp.eq.s32.totalorder %v5868_v15, %v2689_v4  ;;  %2939 = vmin.xlane.f32.xlu1 %v6028_v19  ;;  %4497 = vmatpush3.bf16.msra.mxu1 %v4494_v23  ;;  %v2748_v23 = vshll.u32 %v2747_v38, 16 }
 0xa29   : > { %v2730_v45 = vpop.xlane.xlu0 %2729  ;;  %v3700_v30 = vsel %vm2753_vm15, 1.0, %v6355_v50  ;;  %v6040_v2 = vsel %vm2753_vm15, 2147483647, %v5868_v15  ;;  %v6042_v61 = vcvt.s32.f32 %v2951_v63 }
 0xa2a   : > { %v2719_v56 = vadd.s32 %v2718_v60, %v2716_v9  ;;  %v2731_v14 = vcvt.f32.s32 %v2730_v45  ;;  %4230 = vmatmul.mubr.msk.f32.gmra.mrb[42].mxu1 %vm903_vm7, %v3700_v30  ;;  %vm2754_vm1 = vcmp.eq.s32.totalorder %v5882_v33, %v2704_v29  ;;  %v6048_v17 = vsel %vm903_vm7, %v6040_v2, 2147483647 }
 0xa2b   : > { %v2745_v0 = vpop.xlane.xlu1 %2744  ;;  %2954 = vmin.xlane.f32.xlu0 %v6042_v61  ;;  %v3701_v1 = vsel %vm2754_vm1, 1.0, %v6355_v50  ;;  %v6053_v15 = vsel %vm2754_vm1, 2147483647, %v5882_v33  ;;  %v2966_v4 = vshra.s32 %v6048_v17, 16 }
 0xa2c   : > { %v2734_v62 = vadd.s32 %v2733_v6, %v2731_v14  ;;  %v2746_v49 = vcvt.f32.s32 %v2745_v0  ;;  %4232 = vmatprep.mubr.msk.f32.mxu1 %vm903_vm7, %v3701_v1  ;;  %vm2755_vm2 = vcmp.eq.s32.totalorder %v5892_v44, %v2719_v56  ;;  %v6060_v29 = vsel %vm903_vm7, %v6053_v15, 2147483647 }
 0xa2d   : > { %v3702_v38 = vsel %vm2755_vm2, 1.0, %v6355_v50  ;;  %v6064_v63 = vsel %vm2755_vm2, 2147483647, %v5892_v44  ;;  %v2968_v60 = vcvt.s32.f32 %v2966_v4  ;;  %v2981_v33 = vshra.s32 %v6060_v29, 16 }
 0xa2e   : > { %v2749_v9 = vadd.s32 %v2748_v23, %v2746_v49  ;;  %4233 = vmatmul.mubr.msk.f32.gmra.mrb[44].mxu1 %vm903_vm7, %v3702_v38  ;;  %vm2756_vm3 = vcmp.eq.s32.totalorder %v5901_v37, %v2734_v62  ;;  %v2994_v14 = vsel %vm903_vm7, %v6064_v63, 2147483647 }
 0xa2f   : > { %2969 = vmin.xlane.f32.xlu1 %v2968_v60  ;;  %v2983_v6 = vcvt.s32.f32 %v2981_v33  ;;  %v3703_v45 = vsel %vm2756_vm3, 1.0, %v6355_v50  ;;  %v6073_v30 = vsel %vm2756_vm3, 2147483647, %v5901_v37  ;;  %v2996_v44 = vshra.s32 %v2994_v14, 16 }
 0xa30   : > { %4235 = vmatprep.mubr.msk.f32.mxu1 %vm903_vm7, %v3703_v45  ;;  %vm2757_vm4 = vcmp.eq.s32.totalorder %v5910_v57, %v2749_v9  ;;  %v3009_v56 = vsel %vm903_vm7, %v6073_v30, 2147483647  ;;  %v2965_v33 = vand.u32 65535, %v6048_v17 }
 0xa31   : > { %2984 = vmin.xlane.f32.xlu0 %v2983_v6  ;;  %v3704_v23 = vsel %vm2757_vm4, 1.0, %v6355_v50  ;;  %v6081_v0 = vsel %vm2757_vm4, 2147483647, %v5910_v57  ;;  %v2998_v1 = vcvt.s32.f32 %v2996_v44  ;;  %v3011_v4 = vshra.s32 %v3009_v56, 16 }
 0xa32   : > { %4236 = vmatmul.mubr.msk.f32.gmra.mrb[46].mxu1 %vm903_vm7, %v3704_v23  ;;  %v3024_v37 = vsel %vm903_vm7, %v6081_v0, 2147483647  ;;  %v2967_v45 = vcvt.s32.f32 %v2965_v33  ;;  %v2995_v44 = vand.u32 65535, %v2994_v14 }
 0xa33   : > { %2999 = vmin.xlane.f32.xlu1 %v2998_v1  ;;  %v3013_v62 = vcvt.s32.f32 %v3011_v4  ;;  %4274 = vmatprep.mubr.msk.f32.mxu1 %vm323_vm0, %v4746_v20  ;;  %v3026_v49 = vshra.s32 %v3024_v37, 16  ;;  %v2935_v20 = vand.u32 65535, %v6016_v41 }
 0xa35   : > { %3014 = vmin.xlane.f32.xlu0 %v3013_v62  ;;  %v3028_v38 = vcvt.s32.f32 %v3026_v49  ;;  %v3010_v49 = vand.u32 65535, %v3009_v56 }
 0xa36   : > { %4275 = vmatmul.mubr.msk.f32.vlgmr.msra.gmra.mrb[48].mxu1 %vm323_vm0, %v4744_v18  ;;  %v2920_v18 = vand.u32 65535, %v6002_v5 }
 0xa37   : > { %3029 = vmin.xlane.f32.xlu1 %v3028_v38  ;;  %4277 = vmatprep.mubr.msk.f32.mxu1 %vm323_vm0, %v4766_v28 }
 0xa38   : > { %v2922_v57 = vcvt.s32.f32 %v2920_v18  ;;  %v2997_v18 = vcvt.s32.f32 %v2995_v44 }
 0xa3a   : > { %4278 = vmatmul.mubr.msk.f32.gmra.mrb[50].mxu1 %vm323_vm0, %v4762_v26 }
 0xa3b   : > { %4280 = vmatprep.mubr.msk.f32.mxu1 %vm323_vm0, %v4782_v36  ;;  %v2950_v36 = vand.u32 65535, %v6032_v22  ;;  %v2980_v22 = vand.u32 65535, %v6060_v29  ;;  %v3025_v29 = vand.u32 65535, %v3024_v37  ;;  %v3329_v37 = vld [vmem:[%s6332_s6 + $0x8] sm:$0xff] }
 0xa3d   : > { %v2952_v41 = vcvt.s32.f32 %v2950_v36  ;;  %v2982_v4 = vcvt.s32.f32 %v2980_v22 }
 0xa3e   : > { %4281 = vmatmul.mubr.msk.f32.gmra.mrb[52].mxu1 %vm323_vm0, %v4778_v34 }
 0xa3f   : > { %4283 = vmatprep.mubr.msk.f32.mxu1 %vm323_vm0, %v4796_v43  ;;  %v2937_v43 = vcvt.s32.f32 %v2935_v20 }
 0xa42   : > { %4284 = vmatmul.mubr.msk.f32.gmra.mrb[54].mxu1 %vm323_vm0, %v4794_v42 }
 0xab2   : > { %v6104_v28 = vpop.xlane.xlu0 %2924 }
 0xab3   : > { %vm2926_vm5 = vcmp.eq.f32.partialorder %v6012_v12, %v6104_v28  ;;  %v2931_v46 = vcvt.f32.s32 %v6104_v28 }
 0xab4   : > { %v2927_v26 = vsel %vm2926_vm5, %v2922_v57, inf }
 0xab5   : > { %2928 = vmin.xlane.f32.xlu0 %v2927_v26  ;;  %v6109_v34 = vpop.xlane.xlu1 %2939  ;;  %v2932_v53 = vshll.u32 %v2931_v46, 16 }
 0xab6   : > { %vm2941_vm6 = vcmp.eq.f32.partialorder %v6028_v19, %v6109_v34 }
 0xab7   : > { %v2942_v42 = vsel %vm2941_vm6, %v2937_v43, inf }
 0xab8   : > { %v6113_v5 = vpop.xlane.xlu0 %2954  ;;  %2943 = vmin.xlane.f32.xlu1 %v2942_v42 }
 0xab9   : > { %vm2956_vm8 = vcmp.eq.f32.partialorder %v6042_v61, %v6113_v5  ;;  %v2961_v44 = vcvt.f32.s32 %v6113_v5 }
 0xaba   : > { %v2957_v12 = vsel %vm2956_vm8, %v2952_v41, inf }
 0xabb   : > { %2958 = vmin.xlane.f32.xlu0 %v2957_v12 }
 0xabc   : > { %v6119_v9 = vpop.xlane.xlu1 %2969 }
 0xabd   : > { %vm2971_vm9 = vcmp.eq.f32.partialorder %v2968_v60, %v6119_v9  ;;  %v3012_v60 = vcvt.s32.f32 %v3010_v49  ;;  %v2976_v28 = vcvt.f32.s32 %v6119_v9 }
 0xabe   : > { %v6122_v19 = vpop.xlane.xlu0 %2984  ;;  %v2972_v23 = vsel %vm2971_vm9, %v2967_v45, inf }
 0xabf   : > { %vm2986_vm10 = vcmp.eq.f32.partialorder %v2983_v6, %v6122_v19  ;;  %2973 = vmin.xlane.f32.xlu1 %v2972_v23  ;;  %v3027_v6 = vcvt.s32.f32 %v3025_v29 }
 0xac0   : > { %v2987_v17 = vsel %vm2986_vm10, %v2982_v4, inf  ;;  %v6125_v61 = vpop.xlane.xlu1 %2999 }
 0xac1   : > { %2988 = vmin.xlane.f32.xlu0 %v2987_v17  ;;  %vm3001_vm11 = vcmp.eq.f32.partialorder %v2998_v1, %v6125_v61  ;;  %v3328_v1 = vld [vmem:[%s6332_s6] sm:$0xff] }
 0xac2   : > { %v6128_v20 = vpop.xlane.xlu0 %3014  ;;  %v3002_v14 = vsel %vm3001_vm11, %v2997_v18, inf  ;;  %v4498_v36 = vpack.c.bf16 %v3329_v37, %v3328_v1  ;;  %v2977_v1 = vshll.u32 %v2976_v28, 16 }
 0xac3   : > { %vm3016_vm12 = vcmp.eq.f32.partialorder %v3013_v62, %v6128_v20  ;;  %3003 = vmin.xlane.f32.xlu1 %v3002_v14 }
 0xac4   : > { %v3017_v57 = vsel %vm3016_vm12, %v3012_v60, inf  ;;  %v6131_v56 = vpop.xlane.xlu1 %3029  ;;  %4499 = vmatprep.subr.bf16.mxu0 %v4498_v36  ;;  %v2962_v60 = vshll.u32 %v2961_v44, 16 }
 0xac5   : > { %3018 = vmin.xlane.f32.xlu0 %v3017_v57  ;;  %vm3031_vm13 = vcmp.eq.f32.partialorder %v3028_v38, %v6131_v56 }
 0xac6   : > { %v3032_v26 = vsel %vm3031_vm13, %v3027_v6, inf }
 0xac7   : > { %3033 = vmin.xlane.f32.xlu1 %v3032_v26  ;;  %v3006_v26 = vcvt.f32.s32 %v6125_v61 }
 0xaf6   : > { %v4228_v62 = vpop.f32.mrb[40].mxu1 }
 0xaf7   : > { %v6143_v43 = vmax.f32 %v2615_v59, %v4228_v62  ;;  %v2864_v42 = vpop.f32.mrb[41].mxu1 }
 0xaf8   : > { %v6148_v38 = vmax.f32 %v2614_v10, %v2864_v42 }
 0xafd   : > { %v4231_v41 = vpop.f32.mrb[42].mxu1 }
 0xafe   : > { %v6153_v33 = vmax.f32 %v2617_v8, %v4231_v41  ;;  %v2874_v12 = vpop.f32.mrb[43].mxu1 }
 0xaff   : > { %v6158_v22 = vmax.f32 %v2616_v3, %v2874_v12  ;;  %v3007_v12 = vshll.u32 %v3006_v26, 16  ;;  %v6376_v26 = vld [vmem:[#allocation7_spill] sm:$0xff] }
 0xb01   : > { %v4234_v11 = vpop.f32.mrb[44].mxu1 }
 0xb02   : > { %v6163_v54 = vmax.f32 %v2619_v25, %v4234_v11  ;;  %v2884_v35 = vpop.f32.mrb[45].mxu1  ;;  %v3036_v11 = vcvt.f32.s32 %v6131_v56 }
 0xb03   : > { %v6168_v59 = vmax.f32 %v2618_v21, %v2884_v35  ;;  %v2946_v21 = vcvt.f32.s32 %v6109_v34  ;;  %v2991_v34 = vcvt.f32.s32 %v6122_v19 }
 0xb05   : > { %v4237_v39 = vpop.f32.mrb[46].mxu1  ;;  %v2947_v49 = vshll.u32 %v2946_v21, 16  ;;  %v2992_v42 = vshll.u32 %v2991_v34, 16  ;;  %v3037_v21 = vshll.u32 %v3036_v11, 16 }
 0xb06   : > { %v6173_v10 = vmax.f32 %v6372_v27, %v4237_v39  ;;  %v2894_v48 = vpop.f32.mrb[47].mxu1 }
 0xb07   : > { %v6178_v8 = vmax.f32 %v6373_v40, %v2894_v48 }
 0xb09   : > { %v6180_v58 = vpop.f32.mrb[48].mxu1 }
 0xb0a   : > { %v6182_v13 = vpop.f32.mrb[49].mxu1 }
 0xb0d   : > { %v6184_v3 = vpop.f32.mrb[50].mxu1 }
 0xb0e   : > { %v6186_v24 = vpop.f32.mrb[51].mxu1 }
 0xb11   : > { %v6188_v32 = vpop.f32.mrb[52].mxu1 }
 0xb12   : > { %v6190_v25 = vpop.f32.mrb[53].mxu1 }
 0xb15   : > { %v6192_v52 = vpop.f32.mrb[54].mxu1 }
 0xb16   : > { %v6194_v7 = vpop.f32.mrb[55].mxu1 }
 0xb42   : > { %v2929_v55 = vpop.xlane.xlu0 %2928 }
 0xb43   : > { %v2930_v45 = vcvt.f32.s32 %v2929_v55 }
 0xb45   : > { %v2933_v23 = vadd.s32 %v2932_v53, %v2930_v45  ;;  %v2944_v4 = vpop.xlane.xlu1 %2943 }
 0xb46   : > { %v2945_v17 = vcvt.f32.s32 %v2944_v4 }
 0xb47   : > { %vm3039_vm14 = vcmp.eq.s32.totalorder %v5997_v16, %v2933_v23 }
 0xb48   : > { %v2948_v18 = vadd.s32 %v2947_v49, %v2945_v17  ;;  %v2959_v29 = vpop.xlane.xlu0 %2958  ;;  %v3713_v14 = vsel %vm3039_vm14, 1.0, %v6355_v50  ;;  %v6374_v17 = vld [vmem:[#allocation5_spill] sm:$0xff] }
 0xb49   : > { %v2960_v57 = vcvt.f32.s32 %v2959_v29  ;;  %4254 = vmatprep.mubr.msk.f32.mxu0 %vm903_vm7, %v3713_v14  ;;  %v3737_v14 = vld [vmem:[%s6331_s5] ss:$0 sm:$0xff] }
 0xb4a   : > { %vm3040_vm15 = vcmp.eq.s32.totalorder %v6009_v51, %v2948_v18  ;;  %v3021_v51 = vcvt.f32.s32 %v6128_v20 }
 0xb4b   : > { %v3714_v5 = vsel %vm3040_vm15, 1.0, %v6355_v50  ;;  %v2963_v6 = vadd.s32 %v2962_v60, %v2960_v57 }
 0xb4c   : > { %v2974_v16 = vpop.xlane.xlu1 %2973  ;;  %4255 = vmatmul.mubr.msk.f32.vlgmr.msra.gmra.mrb[34].mxu0 %vm903_vm7, %v3714_v5  ;;  %v3022_v27 = vshll.u32 %v3021_v51, 16  ;;  %v6378_v51 = vld [vmem:[#allocation9_spill] sm:$0xff] }
 0xb4d   : > { %v2975_v37 = vcvt.f32.s32 %v2974_v16  ;;  %vm3041_vm1 = vcmp.eq.s32.totalorder %v6025_v47, %v2963_v6  ;;  %4501 = vmatpush3.bf16.msra.mxu0 %v4498_v36  ;;  %v6375_v6 = vld [vmem:[#allocation6_spill] sm:$0xff] }
 0xb4e   : > { %v2989_v9 = vpop.xlane.xlu0 %2988  ;;  %v3715_v62 = vsel %vm3041_vm1, 1.0, %v6355_v50 }
 0xb4f   : > { %v2978_v19 = vadd.s32 %v2977_v1, %v2975_v37  ;;  %v2990_v41 = vcvt.f32.s32 %v2989_v9  ;;  %4257 = vmatprep.mubr.msk.f32.mxu0 %vm903_vm7, %v3715_v62  ;;  %v6377_v62 = vld [vmem:[#allocation8_spill] sm:$0xff] }
 0xb50   : > { %v3004_v61 = vpop.xlane.xlu1 %3003 }
 0xb51   : > { %v2993_v35 = vadd.s32 %v2992_v42, %v2990_v41  ;;  %v3005_v39 = vcvt.f32.s32 %v3004_v61  ;;  %vm3042_vm2 = vcmp.eq.s32.totalorder %v6040_v2, %v2978_v19 }
 0xb52   : > { %v3019_v47 = vpop.xlane.xlu0 %3018  ;;  %v3716_v36 = vsel %vm3042_vm2, 1.0, %v6355_v50 }
 0xb53   : > { %v3008_v48 = vadd.s32 %v3007_v12, %v3005_v39  ;;  %v3020_v40 = vcvt.f32.s32 %v3019_v47  ;;  %4258 = vmatmul.mubr.msk.f32.gmra.mrb[36].mxu0 %vm903_vm7, %v3716_v36  ;;  %vm3043_vm3 = vcmp.eq.s32.totalorder %v6053_v15, %v2993_v35  ;;  %v6380_v47 = vld [vmem:[#allocation11_spill] sm:$0xff] }
 0xb54   : > { %v3034_v20 = vpop.xlane.xlu1 %3033  ;;  %v3717_v46 = vsel %vm3043_vm3, 1.0, %v6355_v50 }
 0xb55   : > { %v3023_v55 = vadd.s32 %v3022_v27, %v3020_v40  ;;  %v3035_v56 = vcvt.f32.s32 %v3034_v20  ;;  %4260 = vmatprep.mubr.msk.f32.mxu0 %vm903_vm7, %v3717_v46  ;;  %vm3044_vm4 = vcmp.eq.s32.totalorder %v6064_v63, %v3008_v48  ;;  %v3330_v63 = vld [vmem:[%s6332_s6 + $0x10] sm:$0xff]  ;;  %v3738_v48 = vld [vmem:[%s6333_s7] ss:$0 sm:$0xff] }
 0xb56   : > { %v3718_v2 = vsel %vm3044_vm4, 1.0, %v6355_v50 }
 0xb57   : > { %vm3045_vm5 = vcmp.eq.s32.totalorder %v6073_v30, %v3023_v55  ;;  %v3038_v53 = vadd.s32 %v3037_v21, %v3035_v56  ;;  %4261 = vmatmul.mubr.msk.f32.gmra.mrb[38].mxu0 %vm903_vm7, %v3718_v2  ;;  %v3331_v30 = vld [vmem:[%s6332_s6 + $0x18] sm:$0xff] }
 0xb58   : > { %v3719_v45 = vsel %vm3045_vm5, 1.0, %v6355_v50  ;;  %v4502_v44 = vpack.c.bf16 %v3331_v30, %v3330_v63 }
 0xb59   : > { %vm3046_vm6 = vcmp.eq.s32.totalorder %v6081_v0, %v3038_v53  ;;  %4263 = vmatprep.mubr.msk.f32.mxu0 %vm903_vm7, %v3719_v45 }
 0xb5a   : > { %v3720_v15 = vsel %vm3046_vm6, 1.0, %v6355_v50  ;;  %4503 = vmatprep.subr.bf16.mxu0 %v4502_v44 }
 0xb5b   : > { %4264 = vmatmul.mubr.msk.f32.gmra.mrb[40].mxu0 %vm903_vm7, %v3720_v15 }
 0xb5c   : > { %4505 = vmatpush3.bf16.msra.mxu0 %v4502_v44 }
 0xc1f   : > { %v4256_v23 = vpop.f32.mrb[34].mxu0 }
 0xc20   : > { %v3193_v0 = vmax.f32 %v6143_v43, %v4256_v23  ;;  %v3153_v4 = vpop.f32.mrb[35].mxu0 }
 0xc21   : > { %v3192_v49 = vmax.f32 %v6148_v38, %v3153_v4 }
 0xc22   : > { %v3201_v50 = vsub.f32 %v3193_v0, %v4893_v31 }
 0xc23   : > { %v3200_v18 = vsub.f32 %v3192_v49, %v6374_v17 }
 0xc24   : > { %v3280_v29 = vadd.f32 %v6180_v58, %v3201_v50 }
 0xc25   : > { %v3275_v60 = vadd.f32 %v6182_v13, %v3200_v18 }
 0xc26   : > { %v4259_v28 = vpop.f32.mrb[36].mxu0  ;;  %v3321_v5 = vadd.f32 %v3737_v14, %v3280_v29 }
 0xc27   : > { %v3320_v57 = vadd.f32 %v3737_v14, %v3275_v60  ;;  %v3195_v34 = vmax.f32 %v6153_v33, %v4259_v28  ;;  %v3163_v43 = vpop.f32.mrb[37].mxu0 }
 0xc28   : > { %v3194_v38 = vmax.f32 %v6158_v22, %v3163_v43 }
 0xc29   : > { %v3203_v31 = vsub.f32 %v3195_v34, %v6375_v6  ;;  %4294 = vmatprep.mubr.msk.f32.mxu0 %vm323_vm0, %v3320_v57 }
 0xc2a   : > { %v3202_v58 = vsub.f32 %v3194_v38, %v6376_v26  ;;  %v4262_v16 = vpop.f32.mrb[38].mxu0  ;;  %4295 = vmatmul.mubr.msk.f32.vlgmr.msra.gmra.mrb[42].mxu0 %vm323_vm0, %v3321_v5 }
 0xc2b   : > { %v3290_v1 = vadd.f32 %v6184_v3, %v3203_v31  ;;  %v3197_v13 = vmax.f32 %v6163_v54, %v4262_v16  ;;  %v3173_v37 = vpop.f32.mrb[39].mxu0 }
 0xc2c   : > { %v3285_v33 = vadd.f32 %v6186_v24, %v3202_v58  ;;  %v3196_v9 = vmax.f32 %v6168_v59, %v3173_v37  ;;  %v6379_v59 = vld [vmem:[#allocation10_spill] sm:$0xff] }
 0xc2d   : > { %v3205_v22 = vsub.f32 %v3197_v13, %v6377_v62  ;;  %v3323_v12 = vadd.f32 %v3737_v14, %v3290_v1 }
 0xc2e   : > { %v3322_v42 = vadd.f32 %v3737_v14, %v3285_v33  ;;  %v3204_v19 = vsub.f32 %v3196_v9, %v6378_v51  ;;  %v4265_v41 = vpop.f32.mrb[40].mxu0 }
 0xc2f   : > { %v3300_v61 = vadd.f32 %v6188_v32, %v3205_v22  ;;  %v3199_v11 = vmax.f32 %v6173_v10, %v4265_v41  ;;  %v3183_v35 = vpop.f32.mrb[41].mxu0 }
 0xc30   : > { %v3295_v3 = vadd.f32 %v6190_v25, %v3204_v19  ;;  %v3198_v54 = vmax.f32 %v6178_v8, %v3183_v35  ;;  %4297 = vmatprep.mubr.msk.f32.mxu0 %vm323_vm0, %v3322_v42 }
 0xc31   : > { %v3207_v24 = vsub.f32 %v3199_v11, %v6379_v59  ;;  %4298 = vmatmul.mubr.msk.f32.gmra.mrb[44].mxu0 %vm323_vm0, %v3323_v12  ;;  %v3325_v27 = vadd.f32 %v3737_v14, %v3300_v61 }
 0xc32   : > { %v3324_v39 = vadd.f32 %v3737_v14, %v3295_v3  ;;  %v3206_v36 = vsub.f32 %v3198_v54, %v6380_v47 }
 0xc33   : > { %v3310_v32 = vadd.f32 %v6192_v52, %v3207_v24 }
 0xc34   : > { %v3305_v10 = vadd.f32 %v6194_v7, %v3206_v36  ;;  %4300 = vmatprep.mubr.msk.f32.mxu0 %vm323_vm0, %v3324_v39 }
 0xc35   : > { %4301 = vmatmul.mubr.msk.f32.gmra.mrb[46].mxu0 %vm323_vm0, %v3325_v27  ;;  %v3327_v25 = vadd.f32 %v3737_v14, %v3310_v32 }
 0xc36   : > { %v3326_v8 = vadd.f32 %v3737_v14, %v3305_v10 }
 0xc38   : > { %4303 = vmatprep.mubr.msk.f32.mxu0 %vm323_vm0, %v3326_v8 }
 0xc39   : > { %4304 = vmatmul.mubr.msk.f32.gmra.mrb[48].mxu0 %vm323_vm0, %v3327_v25 }
 0xcfd   : > { %v4296_v52 = vpop.f32.mrb[42].mxu0 }
 0xcfe   : > { %v3435_v40 = vadd.f32 %v4296_v52, %v3738_v48  ;;  %v3429_v7 = vpop.f32.mrb[43].mxu0 }
 0xcff   : > { %v3430_v20 = vadd.f32 %v3738_v48, %v3429_v7 }
 0xd00   : > { %3469 = vst [vmem:[%s298_s23 + $0x8] sm:$0xff] %v3435_v40 }
 0xd01   : > { %3468 = vst [vmem:[%s298_s23] sm:$0xff] %v3430_v20 }
 0xd04   : > { %v4299_v46 = vpop.f32.mrb[44].mxu0 }
 0xd05   : > { %v3445_v21 = vadd.f32 %v4299_v46, %v3738_v48  ;;  %v3439_v55 = vpop.f32.mrb[45].mxu0 }
 0xd06   : > { %v3440_v56 = vadd.f32 %v3738_v48, %v3439_v55 }
 0xd07   : > { %3471 = vst [vmem:[%s298_s23 + $0x18] sm:$0xff] %v3445_v21 }
 0xd08   : > { %3470 = vst [vmem:[%s298_s23 + $0x10] sm:$0xff] %v3440_v56  ;;  %v4302_v2 = vpop.f32.mrb[46].mxu0 }
 0xd09   : > { %v3455_v53 = vadd.f32 %v4302_v2, %v3738_v48  ;;  %v3449_v45 = vpop.f32.mrb[47].mxu0 }
 0xd0a   : > { %v3450_v15 = vadd.f32 %v3738_v48, %v3449_v45 }
 0xd0b   : > { %3473 = vst [vmem:[%s298_s23 + $0x28] sm:$0xff] %v3455_v53 }
 0xd0c   : > { %3472 = vst [vmem:[%s298_s23 + $0x20] sm:$0xff] %v3450_v15  ;;  %v4305_v63 = vpop.f32.mrb[48].mxu0 }
 0xd0d   : > { %v3465_v30 = vadd.f32 %v4305_v63, %v3738_v48  ;;  %v3459_v44 = vpop.f32.mrb[49].mxu0 }
 0xd0e   : > { %v3460_v23 = vadd.f32 %v3738_v48, %v3459_v44 }
 0xd0f   : > { %3475 = vst [vmem:[%s298_s23 + $0x38] sm:$0xff] %v3465_v30 }
 0xd10   : > { %3474 = vst [vmem:[%s298_s23 + $0x30] sm:$0xff] %v3460_v23 }
 0xd11   : > { %4564 = shalt.err (!%p4561_p3)
}
 0xd12   : > { %s4565_s19 = scalar_lea.hbm %s6279_s12, 1024  ;;  %s4569_s23 = scalar_lea.hbm %s6334_s8, 4096 }
 0xd13   : > { %p4566_p4 = scmp.ne.s32.totalorder %s6279_s12, %s4565_s19  ;;  %p4570_p9 = scmp.lt.u32.totalorder %s6279_s12, %s6334_s8 }
 0xd14   : > { %p4571_p10 = scmp.lt.u32.totalorder %s4569_s23, %s4565_s19  ;;  %p4573_p12 = scmp.lt.u32.totalorder %s4565_s19, %s6279_s12 }
 0xd15   : > { %p4567_p7 = pnand %p4566_p4, %p4705_p5 }
 0xd16   : > { %p4572_p11 = por %p4571_p10, %p4570_p9 }
 0xd17   : > { %p4568_p8 = pneg %p4567_p7 }
 0xd18   : > { %p4574_p13 = por %p4573_p12, %p4572_p11 }
 0xd1a   : > { %p4575_p0 = pnand %p4574_p13, %p4568_p8 }
 0xd1c   : > { %4578 = shalt.err (!%p4575_p0)
}
 0xd1d   : > { %s4620_s10 = smov 128   ;;  %s4621_s13 = smov 8  }
 0xd1e   : > { %4506 = dma.vmem_to_hbm [thread:$0]  (%p4705_p5), %s6281_s25, 1024, %s6279_s12, %s6285_s9, %s4620_s10, %s4620_s10, %s4621_s13  }
 0xd1f PF: > { %p4512_p1 = scmp.ge.s32.totalorder %s4613_s30, 2  ;;  %s3505_s17 = sand.u32 1, %s4601_s27  }
 0xd20   : > { %s3506_s18 = scalar_lea.sflag [#allocation3], %s3505_s17 }
 0xd21   : > { %p4509_p2 = pnand %p4512_p1, %p4709_p6 }
 0xd23   : > { %4596 = dma.done.wait (!%p4509_p2), %s3506_s18, 1024  }
 0xd24   : > { %4598 = vsyncadd (!%p4509_p2), %s3506_s18, 4294966272  ;;  %p18_p3 = scmp.ge.s32.totalorder %s4692_s11, 6   ;;  %s6381_s27 = smov %s4605_s28 }
 0xd25   : > { %s6382_s28 = smov %s4609_s29  ;;  %s6383_s29 = smov %s4703_s14 }
 0xd26   : > { %s6384_s30 = smov %s4692_s11  ;;  %20 = sbr.rel (!%p18_p3) target bundleno = 3 (0x3), region = 87 }
 0xd2d   :  { %3511 = vsyncpa [#allocation3], 1 }
 0xd2e   :  { %3513 = vsyncpa [#allocation3 + $0x1], 1 }

</bundles_post_ra>
